<compile_context>
chip_gen: v7x
topology: tpu7x:2x2x1
jax: 0.10.0
libtpu: 0.0.40
codegen_flags: <defaults>
</compile_context>

<pallas_src>
import jax
import jax.numpy as jnp
from jax import lax
from jax.experimental import pallas as pl
from jax.experimental.pallas import tpu as pltpu

C_PAD = 128                     # every channel dim padded to one lane width
LEAKY_SLOPE = 0.01              # nn.LeakyReLU default negative_slope
TAPS = tuple((kh, kw) for kh in range(3) for kw in range(3))


# ----------------------------------------------------------------------------
# In-kernel conv block: Conv2d(3,2,1)+bias -> LeakyReLU -> (Dropout=id) -> BN
# ----------------------------------------------------------------------------
def _conv_block(src_ref, dst_ref, layer, H, wconv_ref, b_ref, sc_ref, sh_ref):
    """One discriminator block on a zero-padded NHWC activation held in VMEM.

    src_ref : (NB, H+2, max(H,8)+2, C_PAD) f32 with zero halo + zero channel pad.
    dst_ref : storage for the next block's input (same format, spatial H/2),
              or None for the last block.
    Returns the raw (NB*Ho*W8, C_PAD) post-BN value when dst_ref is None
    (valid outputs are columns c = 2*wo, wo < H//2, of each image/row group).
    """
    Ho = H // 2                          # output spatial size (square conv)
    W8 = max(H, 8)                       # sublane-aligned read width (>= H)
    NB = src_ref.shape[0]
    M = NB * Ho * W8

    acc = jnp.zeros((M, C_PAD), jnp.float32)
    for t, (kh, kw) in enumerate(TAPS):
        # Contiguous rows kh .. kh+2*Ho-1, then keep every other row (2*ho+kh)
        # via an untiled-dim split + index; cols kw .. kw+W8-1 are contiguous.
        blk = src_ref[:, pl.ds(kh, 2 * Ho), pl.ds(kw, W8), :]      # (NB,2Ho,W8,C)
        tap = blk.reshape(NB, Ho, 2, W8, C_PAD)[:, :, 0]           # (NB,Ho,W8,C)
        lhs = tap.reshape(M, C_PAD).astype(jnp.bfloat16)           # tile-preserving
        acc = acc + jnp.dot(lhs, wconv_ref[layer, t, :, :],
                            preferred_element_type=jnp.float32)

    z = acc + b_ref[layer]                                         # conv bias
    a = jnp.maximum(z, LEAKY_SLOPE * z)                            # LeakyReLU
    y = a * sc_ref[layer] + sh_ref[layer]                          # BN affine (eval)

    if dst_ref is None:
        return y

    # Stride-2 subsample along W: valid output col wo sits at stride-1 col 2*wo.
    v = y.reshape(NB, Ho, W8, C_PAD)
    for wo in range(Ho):                                           # Wo == Ho
        dst_ref[:, 1:1 + Ho, 1 + wo:2 + wo, :] = v[:, :, 2 * wo:2 * wo + 1, :]
    return None


# ----------------------------------------------------------------------------
# Fused forward builder
# ----------------------------------------------------------------------------
def make_discriminator(batch, img_size):
    """Returns fwd(x_padded, *packed) -> (N*8, C_PAD) sigmoid outputs (padded)."""
    assert img_size == 16, "fused kernel is specialized to img_size=16 (ds_size=1)"
    N = batch
    NB = N if N <= 8 else 8
    assert N % NB == 0, "batch must be a multiple of 8 when larger than 8"
    sizes = [img_size >> i for i in range(4)]          # conv input sizes 16,8,4,2

    def stor(h):                                       # activation storage shape
        return (NB, h + 2, max(h, 8) + 2, C_PAD)

    def kernel(x_ref, wconv_ref, b_ref, sc_ref, sh_ref, wlin_ref, blin_ref,
               out_ref, act1, act2, act3):
        # Zero scratch so conv halos / unused storage columns read as 0.
        act1[...] = jnp.zeros_like(act1)
        act2[...] = jnp.zeros_like(act2)
        act3[...] = jnp.zeros_like(act3)

        srcs = (x_ref, act1, act2, act3)
        dsts = (act1, act2, act3, None)
        y = None
        for i in range(4):
            y = _conv_block(srcs[i], dsts[i], i, sizes[i],
                            wconv_ref, b_ref, sc_ref, sh_ref)

        # y: (NB*1*8, C_PAD); row nb*8 + 0 holds image nb's 1x1x128 feature.
        z = jnp.dot(y.astype(jnp.bfloat16), wlin_ref[...],
                    preferred_element_type=jnp.float32) + blin_ref[...]
        out_ref[...] = pl.reciprocal(1.0 + jnp.exp(-z), approx=True)   # sigmoid

    Hp0, Wp0 = img_size + 2, max(img_size, 8) + 2
    grid = (N // NB,)
    in_specs = [
        pl.BlockSpec((NB, Hp0, Wp0, C_PAD), lambda b: (b, 0, 0, 0)),   # padded input
        pl.BlockSpec((4, 9, C_PAD, C_PAD), lambda b: (0, 0, 0, 0)),    # conv weights
        pl.BlockSpec((4, 1, C_PAD), lambda b: (0, 0, 0)),              # conv bias
        pl.BlockSpec((4, 1, C_PAD), lambda b: (0, 0, 0)),              # BN scale
        pl.BlockSpec((4, 1, C_PAD), lambda b: (0, 0, 0)),              # BN shift
        pl.BlockSpec((C_PAD, C_PAD), lambda b: (0, 0)),                # linear w (padded)
        pl.BlockSpec((1, C_PAD), lambda b: (0, 0)),                    # linear b (padded)
    ]
    out_specs = pl.BlockSpec((NB * 8, C_PAD), lambda b: (b, 0))
    scratch_shapes = [pltpu.VMEM(stor(sizes[i]), jnp.float32) for i in (1, 2, 3)]

    return pl.pallas_call(
        kernel,
        out_shape=jax.ShapeDtypeStruct((N * 8, C_PAD), jnp.float32),
        grid=grid,
        in_specs=in_specs,
        out_specs=out_specs,
        scratch_shapes=scratch_shapes,
        compiler_params=pltpu.CompilerParams(
            dimension_semantics=("parallel",)),
    )


# ----------------------------------------------------------------------------
# One-time parameter packing / input layout plumbing
# ----------------------------------------------------------------------------
def pack_params(raw, img_channel):
    """Repack PyTorch-layout parameters into MXU-ready padded buffers (once)."""
    chans = [img_channel, 16, 32, 64, 128]
    ws, bs, scs, shs = [], [], [], []
    for i in range(4):
        w, b, scale, shift = raw[f"conv{i}"]
        cin, cout = chans[i], chans[i + 1]
        wt = jnp.transpose(w, (2, 3, 1, 0)).reshape(9, cin, cout)   # (tap,cin,cout)
        ws.append(jnp.zeros((9, C_PAD, C_PAD), jnp.float32)
                  .at[:, :cin, :cout].set(wt))
        bs.append(jnp.zeros((1, C_PAD), jnp.float32).at[0, :cout].set(b))
        scs.append(jnp.zeros((1, C_PAD), jnp.float32).at[0, :cout].set(scale))
        shs.append(jnp.zeros((1, C_PAD), jnp.float32).at[0, :cout].set(shift))
    wconv = jnp.stack(ws).astype(jnp.bfloat16)                      # (4,9,128,128)
    bias, bn_scale, bn_shift = jnp.stack(bs), jnp.stack(scs), jnp.stack(shs)
    w_lin, b_lin = raw["linear"]                                    # (1,128), (1,)
    wlin = (jnp.zeros((C_PAD, C_PAD), jnp.float32)
            .at[:, 0].set(w_lin[0]).astype(jnp.bfloat16))           # lane-dense pad
    blin = jnp.zeros((1, C_PAD), jnp.float32).at[0, 0].set(b_lin[0])
    return wconv, bias, bn_scale, bn_shift, wlin, blin


def prep_input(x):
    """NCHW -> NHWC, +1 spatial halo, zero-pad channels to C_PAD (input only)."""
    n, c, h, w = x.shape
    xp = jnp.transpose(x, (0, 2, 3, 1))
    return jnp.pad(xp, ((0, 0), (1, 1), (1, 1), (0, C_PAD - c))).astype(jnp.float32)


def discriminator_forward(fwd, x, packed):
    n = x.shape[0]
    out = fwd(prep_input(x), *packed)                 # (N*8, C_PAD)
    return out.reshape(n, 8, C_PAD)[:, 0, :1]         # valid row / valid column


# ----------------------------------------------------------------------------
# Pure-JAX f32 reference (same inference semantics) and parameter init
# ----------------------------------------------------------------------------
def reference_forward(x, raw):
    h = x
    for i in range(4):
        w, b, scale, shift = raw[f"conv{i}"]
        h = lax.conv_general_dilated(
            h, w, window_strides=(2, 2), padding=((1, 1), (1, 1)),
            dimension_numbers=("NCHW", "OIHW", "NCHW"))
        h = h + b[None, :, None, None]
        h = jnp.where(h >= 0, h, LEAKY_SLOPE * h)       # LeakyReLU
        # Dropout2d(0.25): identity at inference
        h = h * scale[None, :, None, None] + shift[None, :, None, None]
    flat = h.reshape(h.shape[0], -1)
    w_lin, b_lin = raw["linear"]
    return jax.nn.sigmoid(flat @ w_lin.T + b_lin)


def init_params(key, img_channel):
    chans = [img_channel, 16, 32, 64, 128]
    params = {}
    for i in range(4):
        cin, cout = chans[i], chans[i + 1]
        key, kw, kb, kg, kbt = jax.random.split(key, 5)
        w = jax.random.normal(kw, (cout, cin, 3, 3), jnp.float32) * 0.05
        b = jax.random.normal(kb, (cout,), jnp.float32) * 0.05
        if i == 0:
            scale = jnp.ones((cout,), jnp.float32)      # no BN in the first block
            shift = jnp.zeros((cout,), jnp.float32)
        else:
            # BatchNorm2d(cout, eps=0.8), eval: running_mean=0, running_var=1
            gamma = 1.0 + 0.05 * jax.random.normal(kg, (cout,), jnp.float32)
            beta = 0.05 * jax.random.normal(kbt, (cout,), jnp.float32)
            eps = 0.8
            scale = gamma / jnp.sqrt(1.0 + eps)
            shift = beta
        params[f"conv{i}"] = (w, b, scale, shift)
    return key, params


if __name__ == "__main__":
    key = jax.random.PRNGKey(0)

    batch, img_channel, img_size = 2, 4, 16            # img_size // 2**4 = 1
    ds_size = img_size // 2 ** 4
    lin_in = 128 * ds_size ** 2

    key, raw = init_params(key, img_channel)
    key, kw_, kb_, kx_ = jax.random.split(key, 4)
    raw["linear"] = (
        jax.random.normal(kw_, (1, lin_in), jnp.float32) * 0.05,
        jax.random.normal(kb_, (1,), jnp.float32) * 0.05,
    )

    x = jax.random.normal(kx_, (batch, img_channel, img_size, img_size),
                          jnp.float32)

    packed = pack_params(raw, img_channel)
    fwd = make_discriminator(batch, img_size)
    out = discriminator_forward(fwd, x, packed)
    out = jax.block_until_ready(out)

    ref = reference_forward(x, raw)
    assert out.shape == (batch, 1)
    assert bool(jnp.all((out >= -1e-3) & (out <= 1.0 + 1e-3)))
    assert bool(jnp.allclose(out, ref, atol=2e-2, rtol=0.0)), (out, ref)
    print("KERNEL_OK")
</pallas_src>

<mosaic_0001>
module attributes {stable_mosaic.version = 11 : i64} {
  func.func @kernel(%arg0: i32, %arg1: memref<2x18x18x128xf32, #tpu.memory_space<vmem>>, %arg2: memref<4x9x128x128xbf16, #tpu.memory_space<vmem>>, %arg3: memref<4x1x128xf32, #tpu.memory_space<vmem>>, %arg4: memref<4x1x128xf32, #tpu.memory_space<vmem>>, %arg5: memref<4x1x128xf32, #tpu.memory_space<vmem>>, %arg6: memref<128x128xbf16, #tpu.memory_space<vmem>>, %arg7: memref<1x128xf32, #tpu.memory_space<vmem>>, %arg8: memref<16x128xf32, #tpu.memory_space<vmem>>, %arg9: memref<2x10x10x128xf32, #tpu.memory_space<vmem>>, %arg10: memref<2x6x10x128xf32, #tpu.memory_space<vmem>>, %arg11: memref<2x4x10x128xf32, #tpu.memory_space<vmem>>) attributes {dimension_semantics = [#tpu.dimension_semantics<parallel>], iteration_bounds = array<i64: 1>, scalar_prefetch = 0 : i64, scratch_operands = 3 : i64, tpu.core_type = #tpu.core_type<tc>, window_params = [{transform_indices = @transform_0, window_bounds = array<i64: 2, 18, 18, 128>}, {pipeline_mode = #tpu.pipeline_mode<synchronous>, transform_indices = @transform_1, window_bounds = array<i64: 4, 9, 128, 128>}, {pipeline_mode = #tpu.pipeline_mode<synchronous>, transform_indices = @transform_2, window_bounds = array<i64: 4, 1, 128>}, {pipeline_mode = #tpu.pipeline_mode<synchronous>, transform_indices = @transform_3, window_bounds = array<i64: 4, 1, 128>}, {pipeline_mode = #tpu.pipeline_mode<synchronous>, transform_indices = @transform_4, window_bounds = array<i64: 4, 1, 128>}, {pipeline_mode = #tpu.pipeline_mode<synchronous>, transform_indices = @transform_5, window_bounds = array<i64: 128, 128>}, {pipeline_mode = #tpu.pipeline_mode<synchronous>, transform_indices = @transform_6, window_bounds = array<i64: 1, 128>}, {transform_indices = @transform_7, window_bounds = array<i64: 16, 128>}]} {
    %cst = arith.constant 0.000000e+00 : f32
    %0 = vector.broadcast %cst : f32 to vector<2x10x10x128xf32>
    %c0 = arith.constant 0 : index
    %c0_0 = arith.constant 0 : index
    %c0_1 = arith.constant 0 : index
    %c0_2 = arith.constant 0 : index
    %1 = vector.load %arg9[%c0, %c0_0, %c0_1, %c0_2] : memref<2x10x10x128xf32, #tpu.memory_space<vmem>>, vector<2x10x10x128xf32>
    tpu.vector_store %arg9[%c0, %c0_0, %c0_1, %c0_2], %0 {strides = array<i32>} : memref<2x10x10x128xf32, #tpu.memory_space<vmem>>, vector<2x10x10x128xf32>,
    %cst_3 = arith.constant 0.000000e+00 : f32
    %2 = vector.broadcast %cst_3 : f32 to vector<2x6x10x128xf32>
    %c0_4 = arith.constant 0 : index
    %c0_5 = arith.constant 0 : index
    %c0_6 = arith.constant 0 : index
    %c0_7 = arith.constant 0 : index
    %3 = vector.load %arg10[%c0_4, %c0_5, %c0_6, %c0_7] : memref<2x6x10x128xf32, #tpu.memory_space<vmem>>, vector<2x6x10x128xf32>
    tpu.vector_store %arg10[%c0_4, %c0_5, %c0_6, %c0_7], %2 {strides = array<i32>} : memref<2x6x10x128xf32, #tpu.memory_space<vmem>>, vector<2x6x10x128xf32>,
    %cst_8 = arith.constant 0.000000e+00 : f32
    %4 = vector.broadcast %cst_8 : f32 to vector<2x4x10x128xf32>
    %c0_9 = arith.constant 0 : index
    %c0_10 = arith.constant 0 : index
    %c0_11 = arith.constant 0 : index
    %c0_12 = arith.constant 0 : index
    %5 = vector.load %arg11[%c0_9, %c0_10, %c0_11, %c0_12] : memref<2x4x10x128xf32, #tpu.memory_space<vmem>>, vector<2x4x10x128xf32>
    tpu.vector_store %arg11[%c0_9, %c0_10, %c0_11, %c0_12], %4 {strides = array<i32>} : memref<2x4x10x128xf32, #tpu.memory_space<vmem>>, vector<2x4x10x128xf32>,
    %cst_13 = arith.constant 0.000000e+00 : f32
    %6 = vector.broadcast %cst_13 : f32 to vector<256x128xf32>
    %c0_14 = arith.constant 0 : index
    %c0_15 = arith.constant 0 : index
    %c0_16 = arith.constant 0 : index
    %c0_17 = arith.constant 0 : index
    %7 = vector.load %arg1[%c0_14, %c0_15, %c0_16, %c0_17] : memref<2x18x18x128xf32, #tpu.memory_space<vmem>>, vector<2x16x16x128xf32>
    %8 = vector.shape_cast %7 : vector<2x16x16x128xf32> to vector<2x8x2x16x128xf32>
    %9 = vector.extract_strided_slice %8 {offsets = [0, 0, 0, 0, 0], sizes = [2, 8, 1, 16, 128], strides = [1, 1, 1, 1, 1]} : vector<2x8x2x16x128xf32> to vector<2x8x1x16x128xf32>
    %10 = vector.shape_cast %9 : vector<2x8x1x16x128xf32> to vector<2x8x16x128xf32>
    %11 = vector.shape_cast %10 : vector<2x8x16x128xf32> to vector<256x128xf32>
    %12 = arith.truncf %11 : vector<256x128xf32> to vector<256x128xbf16>
    %c0_18 = arith.constant 0 : index
    %c0_19 = arith.constant 0 : index
    %c0_20 = arith.constant 0 : index
    %c0_21 = arith.constant 0 : index
    %13 = vector.load %arg2[%c0_18, %c0_19, %c0_20, %c0_21] : memref<4x9x128x128xbf16, #tpu.memory_space<vmem>>, vector<1x1x128x128xbf16>
    %14 = vector.shape_cast %13 : vector<1x1x128x128xbf16> to vector<128x128xbf16>
    %cst_22 = arith.constant dense<0.000000e+00> : vector<256x128xf32>
    %15 = tpu.matmul %12, %14, %cst_22 {dimension_numbers = #tpu.dot_dimension_numbers<[1], [0], [0], [1], [0, 0, 1, 1], [], []>} : vector<256x128xbf16>, vector<128x128xbf16>, vector<256x128xf32> -> vector<256x128xf32>
    %16 = arith.addf %6, %15 : vector<256x128xf32>
    %c0_23 = arith.constant 0 : index
    %c0_24 = arith.constant 0 : index
    %c1 = arith.constant 1 : index
    %c0_25 = arith.constant 0 : index
    %17 = vector.load %arg1[%c0_23, %c0_24, %c1, %c0_25] : memref<2x18x18x128xf32, #tpu.memory_space<vmem>>, vector<2x16x16x128xf32>
    %18 = vector.shape_cast %17 : vector<2x16x16x128xf32> to vector<2x8x2x16x128xf32>
    %19 = vector.extract_strided_slice %18 {offsets = [0, 0, 0, 0, 0], sizes = [2, 8, 1, 16, 128], strides = [1, 1, 1, 1, 1]} : vector<2x8x2x16x128xf32> to vector<2x8x1x16x128xf32>
    %20 = vector.shape_cast %19 : vector<2x8x1x16x128xf32> to vector<2x8x16x128xf32>
    %21 = vector.shape_cast %20 : vector<2x8x16x128xf32> to vector<256x128xf32>
    %22 = arith.truncf %21 : vector<256x128xf32> to vector<256x128xbf16>
    %c0_26 = arith.constant 0 : index
    %c1_27 = arith.constant 1 : index
    %c0_28 = arith.constant 0 : index
    %c0_29 = arith.constant 0 : index
    %23 = vector.load %arg2[%c0_26, %c1_27, %c0_28, %c0_29] : memref<4x9x128x128xbf16, #tpu.memory_space<vmem>>, vector<1x1x128x128xbf16>
    %24 = vector.shape_cast %23 : vector<1x1x128x128xbf16> to vector<128x128xbf16>
    %cst_30 = arith.constant dense<0.000000e+00> : vector<256x128xf32>
    %25 = tpu.matmul %22, %24, %cst_30 {dimension_numbers = #tpu.dot_dimension_numbers<[1], [0], [0], [1], [0, 0, 1, 1], [], []>} : vector<256x128xbf16>, vector<128x128xbf16>, vector<256x128xf32> -> vector<256x128xf32>
    %26 = arith.addf %16, %25 : vector<256x128xf32>
    %c0_31 = arith.constant 0 : index
    %c0_32 = arith.constant 0 : index
    %c2 = arith.constant 2 : index
    %c0_33 = arith.constant 0 : index
    %27 = vector.load %arg1[%c0_31, %c0_32, %c2, %c0_33] : memref<2x18x18x128xf32, #tpu.memory_space<vmem>>, vector<2x16x16x128xf32>
    %28 = vector.shape_cast %27 : vector<2x16x16x128xf32> to vector<2x8x2x16x128xf32>
    %29 = vector.extract_strided_slice %28 {offsets = [0, 0, 0, 0, 0], sizes = [2, 8, 1, 16, 128], strides = [1, 1, 1, 1, 1]} : vector<2x8x2x16x128xf32> to vector<2x8x1x16x128xf32>
    %30 = vector.shape_cast %29 : vector<2x8x1x16x128xf32> to vector<2x8x16x128xf32>
    %31 = vector.shape_cast %30 : vector<2x8x16x128xf32> to vector<256x128xf32>
    %32 = arith.truncf %31 : vector<256x128xf32> to vector<256x128xbf16>
    %c0_34 = arith.constant 0 : index
    %c2_35 = arith.constant 2 : index
    %c0_36 = arith.constant 0 : index
    %c0_37 = arith.constant 0 : index
    %33 = vector.load %arg2[%c0_34, %c2_35, %c0_36, %c0_37] : memref<4x9x128x128xbf16, #tpu.memory_space<vmem>>, vector<1x1x128x128xbf16>
    %34 = vector.shape_cast %33 : vector<1x1x128x128xbf16> to vector<128x128xbf16>
    %cst_38 = arith.constant dense<0.000000e+00> : vector<256x128xf32>
    %35 = tpu.matmul %32, %34, %cst_38 {dimension_numbers = #tpu.dot_dimension_numbers<[1], [0], [0], [1], [0, 0, 1, 1], [], []>} : vector<256x128xbf16>, vector<128x128xbf16>, vector<256x128xf32> -> vector<256x128xf32>
    %36 = arith.addf %26, %35 : vector<256x128xf32>
    %c0_39 = arith.constant 0 : index
    %c1_40 = arith.constant 1 : index
    %c0_41 = arith.constant 0 : index
    %c0_42 = arith.constant 0 : index
    %37 = vector.load %arg1[%c0_39, %c1_40, %c0_41, %c0_42] : memref<2x18x18x128xf32, #tpu.memory_space<vmem>>, vector<2x16x16x128xf32>
    %38 = vector.shape_cast %37 : vector<2x16x16x128xf32> to vector<2x8x2x16x128xf32>
    %39 = vector.extract_strided_slice %38 {offsets = [0, 0, 0, 0, 0], sizes = [2, 8, 1, 16, 128], strides = [1, 1, 1, 1, 1]} : vector<2x8x2x16x128xf32> to vector<2x8x1x16x128xf32>
    %40 = vector.shape_cast %39 : vector<2x8x1x16x128xf32> to vector<2x8x16x128xf32>
    %41 = vector.shape_cast %40 : vector<2x8x16x128xf32> to vector<256x128xf32>
    %42 = arith.truncf %41 : vector<256x128xf32> to vector<256x128xbf16>
    %c0_43 = arith.constant 0 : index
    %c3 = arith.constant 3 : index
    %c0_44 = arith.constant 0 : index
    %c0_45 = arith.constant 0 : index
    %43 = vector.load %arg2[%c0_43, %c3, %c0_44, %c0_45] : memref<4x9x128x128xbf16, #tpu.memory_space<vmem>>, vector<1x1x128x128xbf16>
    %44 = vector.shape_cast %43 : vector<1x1x128x128xbf16> to vector<128x128xbf16>
    %cst_46 = arith.constant dense<0.000000e+00> : vector<256x128xf32>
    %45 = tpu.matmul %42, %44, %cst_46 {dimension_numbers = #tpu.dot_dimension_numbers<[1], [0], [0], [1], [0, 0, 1, 1], [], []>} : vector<256x128xbf16>, vector<128x128xbf16>, vector<256x128xf32> -> vector<256x128xf32>
    %46 = arith.addf %36, %45 : vector<256x128xf32>
    %c0_47 = arith.constant 0 : index
    %c1_48 = arith.constant 1 : index
    %c1_49 = arith.constant 1 : index
    %c0_50 = arith.constant 0 : index
    %47 = vector.load %arg1[%c0_47, %c1_48, %c1_49, %c0_50] : memref<2x18x18x128xf32, #tpu.memory_space<vmem>>, vector<2x16x16x128xf32>
    %48 = vector.shape_cast %47 : vector<2x16x16x128xf32> to vector<2x8x2x16x128xf32>
    %49 = vector.extract_strided_slice %48 {offsets = [0, 0, 0, 0, 0], sizes = [2, 8, 1, 16, 128], strides = [1, 1, 1, 1, 1]} : vector<2x8x2x16x128xf32> to vector<2x8x1x16x128xf32>
    %50 = vector.shape_cast %49 : vector<2x8x1x16x128xf32> to vector<2x8x16x128xf32>
    %51 = vector.shape_cast %50 : vector<2x8x16x128xf32> to vector<256x128xf32>
    %52 = arith.truncf %51 : vector<256x128xf32> to vector<256x128xbf16>
    %c0_51 = arith.constant 0 : index
    %c4 = arith.constant 4 : index
    %c0_52 = arith.constant 0 : index
    %c0_53 = arith.constant 0 : index
    %53 = vector.load %arg2[%c0_51, %c4, %c0_52, %c0_53] : memref<4x9x128x128xbf16, #tpu.memory_space<vmem>>, vector<1x1x128x128xbf16>
    %54 = vector.shape_cast %53 : vector<1x1x128x128xbf16> to vector<128x128xbf16>
    %cst_54 = arith.constant dense<0.000000e+00> : vector<256x128xf32>
    %55 = tpu.matmul %52, %54, %cst_54 {dimension_numbers = #tpu.dot_dimension_numbers<[1], [0], [0], [1], [0, 0, 1, 1], [], []>} : vector<256x128xbf16>, vector<128x128xbf16>, vector<256x128xf32> -> vector<256x128xf32>
    %56 = arith.addf %46, %55 : vector<256x128xf32>
    %c0_55 = arith.constant 0 : index
    %c1_56 = arith.constant 1 : index
    %c2_57 = arith.constant 2 : index
    %c0_58 = arith.constant 0 : index
    %57 = vector.load %arg1[%c0_55, %c1_56, %c2_57, %c0_58] : memref<2x18x18x128xf32, #tpu.memory_space<vmem>>, vector<2x16x16x128xf32>
    %58 = vector.shape_cast %57 : vector<2x16x16x128xf32> to vector<2x8x2x16x128xf32>
    %59 = vector.extract_strided_slice %58 {offsets = [0, 0, 0, 0, 0], sizes = [2, 8, 1, 16, 128], strides = [1, 1, 1, 1, 1]} : vector<2x8x2x16x128xf32> to vector<2x8x1x16x128xf32>
    %60 = vector.shape_cast %59 : vector<2x8x1x16x128xf32> to vector<2x8x16x128xf32>
    %61 = vector.shape_cast %60 : vector<2x8x16x128xf32> to vector<256x128xf32>
    %62 = arith.truncf %61 : vector<256x128xf32> to vector<256x128xbf16>
    %c0_59 = arith.constant 0 : index
    %c5 = arith.constant 5 : index
    %c0_60 = arith.constant 0 : index
    %c0_61 = arith.constant 0 : index
    %63 = vector.load %arg2[%c0_59, %c5, %c0_60, %c0_61] : memref<4x9x128x128xbf16, #tpu.memory_space<vmem>>, vector<1x1x128x128xbf16>
    %64 = vector.shape_cast %63 : vector<1x1x128x128xbf16> to vector<128x128xbf16>
    %cst_62 = arith.constant dense<0.000000e+00> : vector<256x128xf32>
    %65 = tpu.matmul %62, %64, %cst_62 {dimension_numbers = #tpu.dot_dimension_numbers<[1], [0], [0], [1], [0, 0, 1, 1], [], []>} : vector<256x128xbf16>, vector<128x128xbf16>, vector<256x128xf32> -> vector<256x128xf32>
    %66 = arith.addf %56, %65 : vector<256x128xf32>
    %c0_63 = arith.constant 0 : index
    %c2_64 = arith.constant 2 : index
    %c0_65 = arith.constant 0 : index
    %c0_66 = arith.constant 0 : index
    %67 = vector.load %arg1[%c0_63, %c2_64, %c0_65, %c0_66] : memref<2x18x18x128xf32, #tpu.memory_space<vmem>>, vector<2x16x16x128xf32>
    %68 = vector.shape_cast %67 : vector<2x16x16x128xf32> to vector<2x8x2x16x128xf32>
    %69 = vector.extract_strided_slice %68 {offsets = [0, 0, 0, 0, 0], sizes = [2, 8, 1, 16, 128], strides = [1, 1, 1, 1, 1]} : vector<2x8x2x16x128xf32> to vector<2x8x1x16x128xf32>
    %70 = vector.shape_cast %69 : vector<2x8x1x16x128xf32> to vector<2x8x16x128xf32>
    %71 = vector.shape_cast %70 : vector<2x8x16x128xf32> to vector<256x128xf32>
    %72 = arith.truncf %71 : vector<256x128xf32> to vector<256x128xbf16>
    %c0_67 = arith.constant 0 : index
    %c6 = arith.constant 6 : index
    %c0_68 = arith.constant 0 : index
    %c0_69 = arith.constant 0 : index
    %73 = vector.load %arg2[%c0_67, %c6, %c0_68, %c0_69] : memref<4x9x128x128xbf16, #tpu.memory_space<vmem>>, vector<1x1x128x128xbf16>
    %74 = vector.shape_cast %73 : vector<1x1x128x128xbf16> to vector<128x128xbf16>
    %cst_70 = arith.constant dense<0.000000e+00> : vector<256x128xf32>
    %75 = tpu.matmul %72, %74, %cst_70 {dimension_numbers = #tpu.dot_dimension_numbers<[1], [0], [0], [1], [0, 0, 1, 1], [], []>} : vector<256x128xbf16>, vector<128x128xbf16>, vector<256x128xf32> -> vector<256x128xf32>
    %76 = arith.addf %66, %75 : vector<256x128xf32>
    %c0_71 = arith.constant 0 : index
    %c2_72 = arith.constant 2 : index
    %c1_73 = arith.constant 1 : index
    %c0_74 = arith.constant 0 : index
    %77 = vector.load %arg1[%c0_71, %c2_72, %c1_73, %c0_74] : memref<2x18x18x128xf32, #tpu.memory_space<vmem>>, vector<2x16x16x128xf32>
    %78 = vector.shape_cast %77 : vector<2x16x16x128xf32> to vector<2x8x2x16x128xf32>
    %79 = vector.extract_strided_slice %78 {offsets = [0, 0, 0, 0, 0], sizes = [2, 8, 1, 16, 128], strides = [1, 1, 1, 1, 1]} : vector<2x8x2x16x128xf32> to vector<2x8x1x16x128xf32>
    %80 = vector.shape_cast %79 : vector<2x8x1x16x128xf32> to vector<2x8x16x128xf32>
    %81 = vector.shape_cast %80 : vector<2x8x16x128xf32> to vector<256x128xf32>
    %82 = arith.truncf %81 : vector<256x128xf32> to vector<256x128xbf16>
    %c0_75 = arith.constant 0 : index
    %c7 = arith.constant 7 : index
    %c0_76 = arith.constant 0 : index
    %c0_77 = arith.constant 0 : index
    %83 = vector.load %arg2[%c0_75, %c7, %c0_76, %c0_77] : memref<4x9x128x128xbf16, #tpu.memory_space<vmem>>, vector<1x1x128x128xbf16>
    %84 = vector.shape_cast %83 : vector<1x1x128x128xbf16> to vector<128x128xbf16>
    %cst_78 = arith.constant dense<0.000000e+00> : vector<256x128xf32>
    %85 = tpu.matmul %82, %84, %cst_78 {dimension_numbers = #tpu.dot_dimension_numbers<[1], [0], [0], [1], [0, 0, 1, 1], [], []>} : vector<256x128xbf16>, vector<128x128xbf16>, vector<256x128xf32> -> vector<256x128xf32>
    %86 = arith.addf %76, %85 : vector<256x128xf32>
    %c0_79 = arith.constant 0 : index
    %c2_80 = arith.constant 2 : index
    %c2_81 = arith.constant 2 : index
    %c0_82 = arith.constant 0 : index
    %87 = vector.load %arg1[%c0_79, %c2_80, %c2_81, %c0_82] : memref<2x18x18x128xf32, #tpu.memory_space<vmem>>, vector<2x16x16x128xf32>
    %88 = vector.shape_cast %87 : vector<2x16x16x128xf32> to vector<2x8x2x16x128xf32>
    %89 = vector.extract_strided_slice %88 {offsets = [0, 0, 0, 0, 0], sizes = [2, 8, 1, 16, 128], strides = [1, 1, 1, 1, 1]} : vector<2x8x2x16x128xf32> to vector<2x8x1x16x128xf32>
    %90 = vector.shape_cast %89 : vector<2x8x1x16x128xf32> to vector<2x8x16x128xf32>
    %91 = vector.shape_cast %90 : vector<2x8x16x128xf32> to vector<256x128xf32>
    %92 = arith.truncf %91 : vector<256x128xf32> to vector<256x128xbf16>
    %c0_83 = arith.constant 0 : index
    %c8 = arith.constant 8 : index
    %c0_84 = arith.constant 0 : index
    %c0_85 = arith.constant 0 : index
    %93 = vector.load %arg2[%c0_83, %c8, %c0_84, %c0_85] : memref<4x9x128x128xbf16, #tpu.memory_space<vmem>>, vector<1x1x128x128xbf16>
    %94 = vector.shape_cast %93 : vector<1x1x128x128xbf16> to vector<128x128xbf16>
    %cst_86 = arith.constant dense<0.000000e+00> : vector<256x128xf32>
    %95 = tpu.matmul %92, %94, %cst_86 {dimension_numbers = #tpu.dot_dimension_numbers<[1], [0], [0], [1], [0, 0, 1, 1], [], []>} : vector<256x128xbf16>, vector<128x128xbf16>, vector<256x128xf32> -> vector<256x128xf32>
    %96 = arith.addf %86, %95 : vector<256x128xf32>
    %c0_87 = arith.constant 0 : index
    %c0_88 = arith.constant 0 : index
    %c0_89 = arith.constant 0 : index
    %97 = vector.load %arg3[%c0_87, %c0_88, %c0_89] : memref<4x1x128xf32, #tpu.memory_space<vmem>>, vector<1x1x128xf32>
    %98 = vector.shape_cast %97 : vector<1x1x128xf32> to vector<1x128xf32>
    %99 = vector.broadcast %98 : vector<1x128xf32> to vector<256x128xf32>
    %100 = arith.addf %96, %99 : vector<256x128xf32>
    %cst_90 = arith.constant 0.00999999977 : f32
    %101 = vector.broadcast %cst_90 : f32 to vector<256x128xf32>
    %102 = arith.mulf %101, %100 : vector<256x128xf32>
    %103 = arith.maximumf %100, %102 : vector<256x128xf32>
    %c0_91 = arith.constant 0 : index
    %c0_92 = arith.constant 0 : index
    %c0_93 = arith.constant 0 : index
    %104 = vector.load %arg4[%c0_91, %c0_92, %c0_93] : memref<4x1x128xf32, #tpu.memory_space<vmem>>, vector<1x1x128xf32>
    %105 = vector.shape_cast %104 : vector<1x1x128xf32> to vector<1x128xf32>
    %106 = vector.broadcast %105 : vector<1x128xf32> to vector<256x128xf32>
    %107 = arith.mulf %103, %106 : vector<256x128xf32>
    %c0_94 = arith.constant 0 : index
    %c0_95 = arith.constant 0 : index
    %c0_96 = arith.constant 0 : index
    %108 = vector.load %arg5[%c0_94, %c0_95, %c0_96] : memref<4x1x128xf32, #tpu.memory_space<vmem>>, vector<1x1x128xf32>
    %109 = vector.shape_cast %108 : vector<1x1x128xf32> to vector<1x128xf32>
    %110 = vector.broadcast %109 : vector<1x128xf32> to vector<256x128xf32>
    %111 = arith.addf %107, %110 : vector<256x128xf32>
    %112 = vector.shape_cast %111 : vector<256x128xf32> to vector<2x8x16x128xf32>
    %113 = vector.extract_strided_slice %112 {offsets = [0, 0, 0, 0], sizes = [2, 8, 1, 128], strides = [1, 1, 1, 1]} : vector<2x8x16x128xf32> to vector<2x8x1x128xf32>
    %c0_97 = arith.constant 0 : index
    %c1_98 = arith.constant 1 : index
    %c1_99 = arith.constant 1 : index
    %c0_100 = arith.constant 0 : index
    %114 = vector.load %arg9[%c0_97, %c1_98, %c1_99, %c0_100] : memref<2x10x10x128xf32, #tpu.memory_space<vmem>>, vector<2x8x1x128xf32>
    tpu.vector_store %arg9[%c0_97, %c1_98, %c1_99, %c0_100], %113 {strides = array<i32>} : memref<2x10x10x128xf32, #tpu.memory_space<vmem>>, vector<2x8x1x128xf32>,
    %115 = vector.extract_strided_slice %112 {offsets = [0, 0, 2, 0], sizes = [2, 8, 1, 128], strides = [1, 1, 1, 1]} : vector<2x8x16x128xf32> to vector<2x8x1x128xf32>
    %c0_101 = arith.constant 0 : index
    %c1_102 = arith.constant 1 : index
    %c2_103 = arith.constant 2 : index
    %c0_104 = arith.constant 0 : index
    %116 = vector.load %arg9[%c0_101, %c1_102, %c2_103, %c0_104] : memref<2x10x10x128xf32, #tpu.memory_space<vmem>>, vector<2x8x1x128xf32>
    tpu.vector_store %arg9[%c0_101, %c1_102, %c2_103, %c0_104], %115 {strides = array<i32>} : memref<2x10x10x128xf32, #tpu.memory_space<vmem>>, vector<2x8x1x128xf32>,
    %117 = vector.extract_strided_slice %112 {offsets = [0, 0, 4, 0], sizes = [2, 8, 1, 128], strides = [1, 1, 1, 1]} : vector<2x8x16x128xf32> to vector<2x8x1x128xf32>
    %c0_105 = arith.constant 0 : index
    %c1_106 = arith.constant 1 : index
    %c3_107 = arith.constant 3 : index
    %c0_108 = arith.constant 0 : index
    %118 = vector.load %arg9[%c0_105, %c1_106, %c3_107, %c0_108] : memref<2x10x10x128xf32, #tpu.memory_space<vmem>>, vector<2x8x1x128xf32>
    tpu.vector_store %arg9[%c0_105, %c1_106, %c3_107, %c0_108], %117 {strides = array<i32>} : memref<2x10x10x128xf32, #tpu.memory_space<vmem>>, vector<2x8x1x128xf32>,
    %119 = vector.extract_strided_slice %112 {offsets = [0, 0, 6, 0], sizes = [2, 8, 1, 128], strides = [1, 1, 1, 1]} : vector<2x8x16x128xf32> to vector<2x8x1x128xf32>
    %c0_109 = arith.constant 0 : index
    %c1_110 = arith.constant 1 : index
    %c4_111 = arith.constant 4 : index
    %c0_112 = arith.constant 0 : index
    %120 = vector.load %arg9[%c0_109, %c1_110, %c4_111, %c0_112] : memref<2x10x10x128xf32, #tpu.memory_space<vmem>>, vector<2x8x1x128xf32>
    tpu.vector_store %arg9[%c0_109, %c1_110, %c4_111, %c0_112], %119 {strides = array<i32>} : memref<2x10x10x128xf32, #tpu.memory_space<vmem>>, vector<2x8x1x128xf32>,
    %121 = vector.extract_strided_slice %112 {offsets = [0, 0, 8, 0], sizes = [2, 8, 1, 128], strides = [1, 1, 1, 1]} : vector<2x8x16x128xf32> to vector<2x8x1x128xf32>
    %c0_113 = arith.constant 0 : index
    %c1_114 = arith.constant 1 : index
    %c5_115 = arith.constant 5 : index
    %c0_116 = arith.constant 0 : index
    %122 = vector.load %arg9[%c0_113, %c1_114, %c5_115, %c0_116] : memref<2x10x10x128xf32, #tpu.memory_space<vmem>>, vector<2x8x1x128xf32>
    tpu.vector_store %arg9[%c0_113, %c1_114, %c5_115, %c0_116], %121 {strides = array<i32>} : memref<2x10x10x128xf32, #tpu.memory_space<vmem>>, vector<2x8x1x128xf32>,
    %123 = vector.extract_strided_slice %112 {offsets = [0, 0, 10, 0], sizes = [2, 8, 1, 128], strides = [1, 1, 1, 1]} : vector<2x8x16x128xf32> to vector<2x8x1x128xf32>
    %c0_117 = arith.constant 0 : index
    %c1_118 = arith.constant 1 : index
    %c6_119 = arith.constant 6 : index
    %c0_120 = arith.constant 0 : index
    %124 = vector.load %arg9[%c0_117, %c1_118, %c6_119, %c0_120] : memref<2x10x10x128xf32, #tpu.memory_space<vmem>>, vector<2x8x1x128xf32>
    tpu.vector_store %arg9[%c0_117, %c1_118, %c6_119, %c0_120], %123 {strides = array<i32>} : memref<2x10x10x128xf32, #tpu.memory_space<vmem>>, vector<2x8x1x128xf32>,
    %125 = vector.extract_strided_slice %112 {offsets = [0, 0, 12, 0], sizes = [2, 8, 1, 128], strides = [1, 1, 1, 1]} : vector<2x8x16x128xf32> to vector<2x8x1x128xf32>
    %c0_121 = arith.constant 0 : index
    %c1_122 = arith.constant 1 : index
    %c7_123 = arith.constant 7 : index
    %c0_124 = arith.constant 0 : index
    %126 = vector.load %arg9[%c0_121, %c1_122, %c7_123, %c0_124] : memref<2x10x10x128xf32, #tpu.memory_space<vmem>>, vector<2x8x1x128xf32>
    tpu.vector_store %arg9[%c0_121, %c1_122, %c7_123, %c0_124], %125 {strides = array<i32>} : memref<2x10x10x128xf32, #tpu.memory_space<vmem>>, vector<2x8x1x128xf32>,
    %127 = vector.extract_strided_slice %112 {offsets = [0, 0, 14, 0], sizes = [2, 8, 1, 128], strides = [1, 1, 1, 1]} : vector<2x8x16x128xf32> to vector<2x8x1x128xf32>
    %c0_125 = arith.constant 0 : index
    %c1_126 = arith.constant 1 : index
    %c8_127 = arith.constant 8 : index
    %c0_128 = arith.constant 0 : index
    %128 = vector.load %arg9[%c0_125, %c1_126, %c8_127, %c0_128] : memref<2x10x10x128xf32, #tpu.memory_space<vmem>>, vector<2x8x1x128xf32>
    tpu.vector_store %arg9[%c0_125, %c1_126, %c8_127, %c0_128], %127 {strides = array<i32>} : memref<2x10x10x128xf32, #tpu.memory_space<vmem>>, vector<2x8x1x128xf32>,
    %cst_129 = arith.constant 0.000000e+00 : f32
    %129 = vector.broadcast %cst_129 : f32 to vector<64x128xf32>
    %c0_130 = arith.constant 0 : index
    %c0_131 = arith.constant 0 : index
    %c0_132 = arith.constant 0 : index
    %c0_133 = arith.constant 0 : index
    %130 = vector.load %arg9[%c0_130, %c0_131, %c0_132, %c0_133] : memref<2x10x10x128xf32, #tpu.memory_space<vmem>>, vector<2x8x8x128xf32>
    %131 = vector.shape_cast %130 : vector<2x8x8x128xf32> to vector<2x4x2x8x128xf32>
    %132 = vector.extract_strided_slice %131 {offsets = [0, 0, 0, 0, 0], sizes = [2, 4, 1, 8, 128], strides = [1, 1, 1, 1, 1]} : vector<2x4x2x8x128xf32> to vector<2x4x1x8x128xf32>
    %133 = vector.shape_cast %132 : vector<2x4x1x8x128xf32> to vector<2x4x8x128xf32>
    %134 = vector.shape_cast %133 : vector<2x4x8x128xf32> to vector<64x128xf32>
    %135 = arith.truncf %134 : vector<64x128xf32> to vector<64x128xbf16>
    %c1_134 = arith.constant 1 : index
    %c0_135 = arith.constant 0 : index
    %c0_136 = arith.constant 0 : index
    %c0_137 = arith.constant 0 : index
    %136 = vector.load %arg2[%c1_134, %c0_135, %c0_136, %c0_137] : memref<4x9x128x128xbf16, #tpu.memory_space<vmem>>, vector<1x1x128x128xbf16>
    %137 = vector.shape_cast %136 : vector<1x1x128x128xbf16> to vector<128x128xbf16>
    %cst_138 = arith.constant dense<0.000000e+00> : vector<64x128xf32>
    %138 = tpu.matmul %135, %137, %cst_138 {dimension_numbers = #tpu.dot_dimension_numbers<[1], [0], [0], [1], [0, 0, 1, 1], [], []>} : vector<64x128xbf16>, vector<128x128xbf16>, vector<64x128xf32> -> vector<64x128xf32>
    %139 = arith.addf %129, %138 : vector<64x128xf32>
    %c0_139 = arith.constant 0 : index
    %c0_140 = arith.constant 0 : index
    %c1_141 = arith.constant 1 : index
    %c0_142 = arith.constant 0 : index
    %140 = vector.load %arg9[%c0_139, %c0_140, %c1_141, %c0_142] : memref<2x10x10x128xf32, #tpu.memory_space<vmem>>, vector<2x8x8x128xf32>
    %141 = vector.shape_cast %140 : vector<2x8x8x128xf32> to vector<2x4x2x8x128xf32>
    %142 = vector.extract_strided_slice %141 {offsets = [0, 0, 0, 0, 0], sizes = [2, 4, 1, 8, 128], strides = [1, 1, 1, 1, 1]} : vector<2x4x2x8x128xf32> to vector<2x4x1x8x128xf32>
    %143 = vector.shape_cast %142 : vector<2x4x1x8x128xf32> to vector<2x4x8x128xf32>
    %144 = vector.shape_cast %143 : vector<2x4x8x128xf32> to vector<64x128xf32>
    %145 = arith.truncf %144 : vector<64x128xf32> to vector<64x128xbf16>
    %c1_143 = arith.constant 1 : index
    %c1_144 = arith.constant 1 : index
    %c0_145 = arith.constant 0 : index
    %c0_146 = arith.constant 0 : index
    %146 = vector.load %arg2[%c1_143, %c1_144, %c0_145, %c0_146] : memref<4x9x128x128xbf16, #tpu.memory_space<vmem>>, vector<1x1x128x128xbf16>
    %147 = vector.shape_cast %146 : vector<1x1x128x128xbf16> to vector<128x128xbf16>
    %cst_147 = arith.constant dense<0.000000e+00> : vector<64x128xf32>
    %148 = tpu.matmul %145, %147, %cst_147 {dimension_numbers = #tpu.dot_dimension_numbers<[1], [0], [0], [1], [0, 0, 1, 1], [], []>} : vector<64x128xbf16>, vector<128x128xbf16>, vector<64x128xf32> -> vector<64x128xf32>
    %149 = arith.addf %139, %148 : vector<64x128xf32>
    %c0_148 = arith.constant 0 : index
    %c0_149 = arith.constant 0 : index
    %c2_150 = arith.constant 2 : index
    %c0_151 = arith.constant 0 : index
    %150 = vector.load %arg9[%c0_148, %c0_149, %c2_150, %c0_151] : memref<2x10x10x128xf32, #tpu.memory_space<vmem>>, vector<2x8x8x128xf32>
    %151 = vector.shape_cast %150 : vector<2x8x8x128xf32> to vector<2x4x2x8x128xf32>
    %152 = vector.extract_strided_slice %151 {offsets = [0, 0, 0, 0, 0], sizes = [2, 4, 1, 8, 128], strides = [1, 1, 1, 1, 1]} : vector<2x4x2x8x128xf32> to vector<2x4x1x8x128xf32>
    %153 = vector.shape_cast %152 : vector<2x4x1x8x128xf32> to vector<2x4x8x128xf32>
    %154 = vector.shape_cast %153 : vector<2x4x8x128xf32> to vector<64x128xf32>
    %155 = arith.truncf %154 : vector<64x128xf32> to vector<64x128xbf16>
    %c1_152 = arith.constant 1 : index
    %c2_153 = arith.constant 2 : index
    %c0_154 = arith.constant 0 : index
    %c0_155 = arith.constant 0 : index
    %156 = vector.load %arg2[%c1_152, %c2_153, %c0_154, %c0_155] : memref<4x9x128x128xbf16, #tpu.memory_space<vmem>>, vector<1x1x128x128xbf16>
    %157 = vector.shape_cast %156 : vector<1x1x128x128xbf16> to vector<128x128xbf16>
    %cst_156 = arith.constant dense<0.000000e+00> : vector<64x128xf32>
    %158 = tpu.matmul %155, %157, %cst_156 {dimension_numbers = #tpu.dot_dimension_numbers<[1], [0], [0], [1], [0, 0, 1, 1], [], []>} : vector<64x128xbf16>, vector<128x128xbf16>, vector<64x128xf32> -> vector<64x128xf32>
    %159 = arith.addf %149, %158 : vector<64x128xf32>
    %c0_157 = arith.constant 0 : index
    %c1_158 = arith.constant 1 : index
    %c0_159 = arith.constant 0 : index
    %c0_160 = arith.constant 0 : index
    %160 = vector.load %arg9[%c0_157, %c1_158, %c0_159, %c0_160] : memref<2x10x10x128xf32, #tpu.memory_space<vmem>>, vector<2x8x8x128xf32>
    %161 = vector.shape_cast %160 : vector<2x8x8x128xf32> to vector<2x4x2x8x128xf32>
    %162 = vector.extract_strided_slice %161 {offsets = [0, 0, 0, 0, 0], sizes = [2, 4, 1, 8, 128], strides = [1, 1, 1, 1, 1]} : vector<2x4x2x8x128xf32> to vector<2x4x1x8x128xf32>
    %163 = vector.shape_cast %162 : vector<2x4x1x8x128xf32> to vector<2x4x8x128xf32>
    %164 = vector.shape_cast %163 : vector<2x4x8x128xf32> to vector<64x128xf32>
    %165 = arith.truncf %164 : vector<64x128xf32> to vector<64x128xbf16>
    %c1_161 = arith.constant 1 : index
    %c3_162 = arith.constant 3 : index
    %c0_163 = arith.constant 0 : index
    %c0_164 = arith.constant 0 : index
    %166 = vector.load %arg2[%c1_161, %c3_162, %c0_163, %c0_164] : memref<4x9x128x128xbf16, #tpu.memory_space<vmem>>, vector<1x1x128x128xbf16>
    %167 = vector.shape_cast %166 : vector<1x1x128x128xbf16> to vector<128x128xbf16>
    %cst_165 = arith.constant dense<0.000000e+00> : vector<64x128xf32>
    %168 = tpu.matmul %165, %167, %cst_165 {dimension_numbers = #tpu.dot_dimension_numbers<[1], [0], [0], [1], [0, 0, 1, 1], [], []>} : vector<64x128xbf16>, vector<128x128xbf16>, vector<64x128xf32> -> vector<64x128xf32>
    %169 = arith.addf %159, %168 : vector<64x128xf32>
    %c0_166 = arith.constant 0 : index
    %c1_167 = arith.constant 1 : index
    %c1_168 = arith.constant 1 : index
    %c0_169 = arith.constant 0 : index
    %170 = vector.load %arg9[%c0_166, %c1_167, %c1_168, %c0_169] : memref<2x10x10x128xf32, #tpu.memory_space<vmem>>, vector<2x8x8x128xf32>
    %171 = vector.shape_cast %170 : vector<2x8x8x128xf32> to vector<2x4x2x8x128xf32>
    %172 = vector.extract_strided_slice %171 {offsets = [0, 0, 0, 0, 0], sizes = [2, 4, 1, 8, 128], strides = [1, 1, 1, 1, 1]} : vector<2x4x2x8x128xf32> to vector<2x4x1x8x128xf32>
    %173 = vector.shape_cast %172 : vector<2x4x1x8x128xf32> to vector<2x4x8x128xf32>
    %174 = vector.shape_cast %173 : vector<2x4x8x128xf32> to vector<64x128xf32>
    %175 = arith.truncf %174 : vector<64x128xf32> to vector<64x128xbf16>
    %c1_170 = arith.constant 1 : index
    %c4_171 = arith.constant 4 : index
    %c0_172 = arith.constant 0 : index
    %c0_173 = arith.constant 0 : index
    %176 = vector.load %arg2[%c1_170, %c4_171, %c0_172, %c0_173] : memref<4x9x128x128xbf16, #tpu.memory_space<vmem>>, vector<1x1x128x128xbf16>
    %177 = vector.shape_cast %176 : vector<1x1x128x128xbf16> to vector<128x128xbf16>
    %cst_174 = arith.constant dense<0.000000e+00> : vector<64x128xf32>
    %178 = tpu.matmul %175, %177, %cst_174 {dimension_numbers = #tpu.dot_dimension_numbers<[1], [0], [0], [1], [0, 0, 1, 1], [], []>} : vector<64x128xbf16>, vector<128x128xbf16>, vector<64x128xf32> -> vector<64x128xf32>
    %179 = arith.addf %169, %178 : vector<64x128xf32>
    %c0_175 = arith.constant 0 : index
    %c1_176 = arith.constant 1 : index
    %c2_177 = arith.constant 2 : index
    %c0_178 = arith.constant 0 : index
    %180 = vector.load %arg9[%c0_175, %c1_176, %c2_177, %c0_178] : memref<2x10x10x128xf32, #tpu.memory_space<vmem>>, vector<2x8x8x128xf32>
    %181 = vector.shape_cast %180 : vector<2x8x8x128xf32> to vector<2x4x2x8x128xf32>
    %182 = vector.extract_strided_slice %181 {offsets = [0, 0, 0, 0, 0], sizes = [2, 4, 1, 8, 128], strides = [1, 1, 1, 1, 1]} : vector<2x4x2x8x128xf32> to vector<2x4x1x8x128xf32>
    %183 = vector.shape_cast %182 : vector<2x4x1x8x128xf32> to vector<2x4x8x128xf32>
    %184 = vector.shape_cast %183 : vector<2x4x8x128xf32> to vector<64x128xf32>
    %185 = arith.truncf %184 : vector<64x128xf32> to vector<64x128xbf16>
    %c1_179 = arith.constant 1 : index
    %c5_180 = arith.constant 5 : index
    %c0_181 = arith.constant 0 : index
    %c0_182 = arith.constant 0 : index
    %186 = vector.load %arg2[%c1_179, %c5_180, %c0_181, %c0_182] : memref<4x9x128x128xbf16, #tpu.memory_space<vmem>>, vector<1x1x128x128xbf16>
    %187 = vector.shape_cast %186 : vector<1x1x128x128xbf16> to vector<128x128xbf16>
    %cst_183 = arith.constant dense<0.000000e+00> : vector<64x128xf32>
    %188 = tpu.matmul %185, %187, %cst_183 {dimension_numbers = #tpu.dot_dimension_numbers<[1], [0], [0], [1], [0, 0, 1, 1], [], []>} : vector<64x128xbf16>, vector<128x128xbf16>, vector<64x128xf32> -> vector<64x128xf32>
    %189 = arith.addf %179, %188 : vector<64x128xf32>
    %c0_184 = arith.constant 0 : index
    %c2_185 = arith.constant 2 : index
    %c0_186 = arith.constant 0 : index
    %c0_187 = arith.constant 0 : index
    %190 = vector.load %arg9[%c0_184, %c2_185, %c0_186, %c0_187] : memref<2x10x10x128xf32, #tpu.memory_space<vmem>>, vector<2x8x8x128xf32>
    %191 = vector.shape_cast %190 : vector<2x8x8x128xf32> to vector<2x4x2x8x128xf32>
    %192 = vector.extract_strided_slice %191 {offsets = [0, 0, 0, 0, 0], sizes = [2, 4, 1, 8, 128], strides = [1, 1, 1, 1, 1]} : vector<2x4x2x8x128xf32> to vector<2x4x1x8x128xf32>
    %193 = vector.shape_cast %192 : vector<2x4x1x8x128xf32> to vector<2x4x8x128xf32>
    %194 = vector.shape_cast %193 : vector<2x4x8x128xf32> to vector<64x128xf32>
    %195 = arith.truncf %194 : vector<64x128xf32> to vector<64x128xbf16>
    %c1_188 = arith.constant 1 : index
    %c6_189 = arith.constant 6 : index
    %c0_190 = arith.constant 0 : index
    %c0_191 = arith.constant 0 : index
    %196 = vector.load %arg2[%c1_188, %c6_189, %c0_190, %c0_191] : memref<4x9x128x128xbf16, #tpu.memory_space<vmem>>, vector<1x1x128x128xbf16>
    %197 = vector.shape_cast %196 : vector<1x1x128x128xbf16> to vector<128x128xbf16>
    %cst_192 = arith.constant dense<0.000000e+00> : vector<64x128xf32>
    %198 = tpu.matmul %195, %197, %cst_192 {dimension_numbers = #tpu.dot_dimension_numbers<[1], [0], [0], [1], [0, 0, 1, 1], [], []>} : vector<64x128xbf16>, vector<128x128xbf16>, vector<64x128xf32> -> vector<64x128xf32>
    %199 = arith.addf %189, %198 : vector<64x128xf32>
    %c0_193 = arith.constant 0 : index
    %c2_194 = arith.constant 2 : index
    %c1_195 = arith.constant 1 : index
    %c0_196 = arith.constant 0 : index
    %200 = vector.load %arg9[%c0_193, %c2_194, %c1_195, %c0_196] : memref<2x10x10x128xf32, #tpu.memory_space<vmem>>, vector<2x8x8x128xf32>
    %201 = vector.shape_cast %200 : vector<2x8x8x128xf32> to vector<2x4x2x8x128xf32>
    %202 = vector.extract_strided_slice %201 {offsets = [0, 0, 0, 0, 0], sizes = [2, 4, 1, 8, 128], strides = [1, 1, 1, 1, 1]} : vector<2x4x2x8x128xf32> to vector<2x4x1x8x128xf32>
    %203 = vector.shape_cast %202 : vector<2x4x1x8x128xf32> to vector<2x4x8x128xf32>
    %204 = vector.shape_cast %203 : vector<2x4x8x128xf32> to vector<64x128xf32>
    %205 = arith.truncf %204 : vector<64x128xf32> to vector<64x128xbf16>
    %c1_197 = arith.constant 1 : index
    %c7_198 = arith.constant 7 : index
    %c0_199 = arith.constant 0 : index
    %c0_200 = arith.constant 0 : index
    %206 = vector.load %arg2[%c1_197, %c7_198, %c0_199, %c0_200] : memref<4x9x128x128xbf16, #tpu.memory_space<vmem>>, vector<1x1x128x128xbf16>
    %207 = vector.shape_cast %206 : vector<1x1x128x128xbf16> to vector<128x128xbf16>
    %cst_201 = arith.constant dense<0.000000e+00> : vector<64x128xf32>
    %208 = tpu.matmul %205, %207, %cst_201 {dimension_numbers = #tpu.dot_dimension_numbers<[1], [0], [0], [1], [0, 0, 1, 1], [], []>} : vector<64x128xbf16>, vector<128x128xbf16>, vector<64x128xf32> -> vector<64x128xf32>
    %209 = arith.addf %199, %208 : vector<64x128xf32>
    %c0_202 = arith.constant 0 : index
    %c2_203 = arith.constant 2 : index
    %c2_204 = arith.constant 2 : index
    %c0_205 = arith.constant 0 : index
    %210 = vector.load %arg9[%c0_202, %c2_203, %c2_204, %c0_205] : memref<2x10x10x128xf32, #tpu.memory_space<vmem>>, vector<2x8x8x128xf32>
    %211 = vector.shape_cast %210 : vector<2x8x8x128xf32> to vector<2x4x2x8x128xf32>
    %212 = vector.extract_strided_slice %211 {offsets = [0, 0, 0, 0, 0], sizes = [2, 4, 1, 8, 128], strides = [1, 1, 1, 1, 1]} : vector<2x4x2x8x128xf32> to vector<2x4x1x8x128xf32>
    %213 = vector.shape_cast %212 : vector<2x4x1x8x128xf32> to vector<2x4x8x128xf32>
    %214 = vector.shape_cast %213 : vector<2x4x8x128xf32> to vector<64x128xf32>
    %215 = arith.truncf %214 : vector<64x128xf32> to vector<64x128xbf16>
    %c1_206 = arith.constant 1 : index
    %c8_207 = arith.constant 8 : index
    %c0_208 = arith.constant 0 : index
    %c0_209 = arith.constant 0 : index
    %216 = vector.load %arg2[%c1_206, %c8_207, %c0_208, %c0_209] : memref<4x9x128x128xbf16, #tpu.memory_space<vmem>>, vector<1x1x128x128xbf16>
    %217 = vector.shape_cast %216 : vector<1x1x128x128xbf16> to vector<128x128xbf16>
    %cst_210 = arith.constant dense<0.000000e+00> : vector<64x128xf32>
    %218 = tpu.matmul %215, %217, %cst_210 {dimension_numbers = #tpu.dot_dimension_numbers<[1], [0], [0], [1], [0, 0, 1, 1], [], []>} : vector<64x128xbf16>, vector<128x128xbf16>, vector<64x128xf32> -> vector<64x128xf32>
    %219 = arith.addf %209, %218 : vector<64x128xf32>
    %c1_211 = arith.constant 1 : index
    %c0_212 = arith.constant 0 : index
    %c0_213 = arith.constant 0 : index
    %220 = vector.load %arg3[%c1_211, %c0_212, %c0_213] : memref<4x1x128xf32, #tpu.memory_space<vmem>>, vector<1x1x128xf32>
    %221 = vector.shape_cast %220 : vector<1x1x128xf32> to vector<1x128xf32>
    %222 = vector.broadcast %221 : vector<1x128xf32> to vector<64x128xf32>
    %223 = arith.addf %219, %222 : vector<64x128xf32>
    %cst_214 = arith.constant 0.00999999977 : f32
    %224 = vector.broadcast %cst_214 : f32 to vector<64x128xf32>
    %225 = arith.mulf %224, %223 : vector<64x128xf32>
    %226 = arith.maximumf %223, %225 : vector<64x128xf32>
    %c1_215 = arith.constant 1 : index
    %c0_216 = arith.constant 0 : index
    %c0_217 = arith.constant 0 : index
    %227 = vector.load %arg4[%c1_215, %c0_216, %c0_217] : memref<4x1x128xf32, #tpu.memory_space<vmem>>, vector<1x1x128xf32>
    %228 = vector.shape_cast %227 : vector<1x1x128xf32> to vector<1x128xf32>
    %229 = vector.broadcast %228 : vector<1x128xf32> to vector<64x128xf32>
    %230 = arith.mulf %226, %229 : vector<64x128xf32>
    %c1_218 = arith.constant 1 : index
    %c0_219 = arith.constant 0 : index
    %c0_220 = arith.constant 0 : index
    %231 = vector.load %arg5[%c1_218, %c0_219, %c0_220] : memref<4x1x128xf32, #tpu.memory_space<vmem>>, vector<1x1x128xf32>
    %232 = vector.shape_cast %231 : vector<1x1x128xf32> to vector<1x128xf32>
    %233 = vector.broadcast %232 : vector<1x128xf32> to vector<64x128xf32>
    %234 = arith.addf %230, %233 : vector<64x128xf32>
    %235 = vector.shape_cast %234 : vector<64x128xf32> to vector<2x4x8x128xf32>
    %236 = vector.extract_strided_slice %235 {offsets = [0, 0, 0, 0], sizes = [2, 4, 1, 128], strides = [1, 1, 1, 1]} : vector<2x4x8x128xf32> to vector<2x4x1x128xf32>
    %c0_221 = arith.constant 0 : index
    %c1_222 = arith.constant 1 : index
    %c1_223 = arith.constant 1 : index
    %c0_224 = arith.constant 0 : index
    %237 = vector.load %arg10[%c0_221, %c1_222, %c1_223, %c0_224] : memref<2x6x10x128xf32, #tpu.memory_space<vmem>>, vector<2x4x1x128xf32>
    tpu.vector_store %arg10[%c0_221, %c1_222, %c1_223, %c0_224], %236 {strides = array<i32>} : memref<2x6x10x128xf32, #tpu.memory_space<vmem>>, vector<2x4x1x128xf32>,
    %238 = vector.extract_strided_slice %235 {offsets = [0, 0, 2, 0], sizes = [2, 4, 1, 128], strides = [1, 1, 1, 1]} : vector<2x4x8x128xf32> to vector<2x4x1x128xf32>
    %c0_225 = arith.constant 0 : index
    %c1_226 = arith.constant 1 : index
    %c2_227 = arith.constant 2 : index
    %c0_228 = arith.constant 0 : index
    %239 = vector.load %arg10[%c0_225, %c1_226, %c2_227, %c0_228] : memref<2x6x10x128xf32, #tpu.memory_space<vmem>>, vector<2x4x1x128xf32>
    tpu.vector_store %arg10[%c0_225, %c1_226, %c2_227, %c0_228], %238 {strides = array<i32>} : memref<2x6x10x128xf32, #tpu.memory_space<vmem>>, vector<2x4x1x128xf32>,
    %240 = vector.extract_strided_slice %235 {offsets = [0, 0, 4, 0], sizes = [2, 4, 1, 128], strides = [1, 1, 1, 1]} : vector<2x4x8x128xf32> to vector<2x4x1x128xf32>
    %c0_229 = arith.constant 0 : index
    %c1_230 = arith.constant 1 : index
    %c3_231 = arith.constant 3 : index
    %c0_232 = arith.constant 0 : index
    %241 = vector.load %arg10[%c0_229, %c1_230, %c3_231, %c0_232] : memref<2x6x10x128xf32, #tpu.memory_space<vmem>>, vector<2x4x1x128xf32>
    tpu.vector_store %arg10[%c0_229, %c1_230, %c3_231, %c0_232], %240 {strides = array<i32>} : memref<2x6x10x128xf32, #tpu.memory_space<vmem>>, vector<2x4x1x128xf32>,
    %242 = vector.extract_strided_slice %235 {offsets = [0, 0, 6, 0], sizes = [2, 4, 1, 128], strides = [1, 1, 1, 1]} : vector<2x4x8x128xf32> to vector<2x4x1x128xf32>
    %c0_233 = arith.constant 0 : index
    %c1_234 = arith.constant 1 : index
    %c4_235 = arith.constant 4 : index
    %c0_236 = arith.constant 0 : index
    %243 = vector.load %arg10[%c0_233, %c1_234, %c4_235, %c0_236] : memref<2x6x10x128xf32, #tpu.memory_space<vmem>>, vector<2x4x1x128xf32>
    tpu.vector_store %arg10[%c0_233, %c1_234, %c4_235, %c0_236], %242 {strides = array<i32>} : memref<2x6x10x128xf32, #tpu.memory_space<vmem>>, vector<2x4x1x128xf32>,
    %cst_237 = arith.constant 0.000000e+00 : f32
    %244 = vector.broadcast %cst_237 : f32 to vector<32x128xf32>
    %c0_238 = arith.constant 0 : index
    %c0_239 = arith.constant 0 : index
    %c0_240 = arith.constant 0 : index
    %c0_241 = arith.constant 0 : index
    %245 = vector.load %arg10[%c0_238, %c0_239, %c0_240, %c0_241] : memref<2x6x10x128xf32, #tpu.memory_space<vmem>>, vector<2x4x8x128xf32>
    %246 = vector.shape_cast %245 : vector<2x4x8x128xf32> to vector<2x2x2x8x128xf32>
    %247 = vector.extract_strided_slice %246 {offsets = [0, 0, 0, 0, 0], sizes = [2, 2, 1, 8, 128], strides = [1, 1, 1, 1, 1]} : vector<2x2x2x8x128xf32> to vector<2x2x1x8x128xf32>
    %248 = vector.shape_cast %247 : vector<2x2x1x8x128xf32> to vector<2x2x8x128xf32>
    %249 = vector.shape_cast %248 : vector<2x2x8x128xf32> to vector<32x128xf32>
    %250 = arith.truncf %249 : vector<32x128xf32> to vector<32x128xbf16>
    %c2_242 = arith.constant 2 : index
    %c0_243 = arith.constant 0 : index
    %c0_244 = arith.constant 0 : index
    %c0_245 = arith.constant 0 : index
    %251 = vector.load %arg2[%c2_242, %c0_243, %c0_244, %c0_245] : memref<4x9x128x128xbf16, #tpu.memory_space<vmem>>, vector<1x1x128x128xbf16>
    %252 = vector.shape_cast %251 : vector<1x1x128x128xbf16> to vector<128x128xbf16>
    %cst_246 = arith.constant dense<0.000000e+00> : vector<32x128xf32>
    %253 = tpu.matmul %250, %252, %cst_246 {dimension_numbers = #tpu.dot_dimension_numbers<[1], [0], [0], [1], [0, 0, 1, 1], [], []>} : vector<32x128xbf16>, vector<128x128xbf16>, vector<32x128xf32> -> vector<32x128xf32>
    %254 = arith.addf %244, %253 : vector<32x128xf32>
    %c0_247 = arith.constant 0 : index
    %c0_248 = arith.constant 0 : index
    %c1_249 = arith.constant 1 : index
    %c0_250 = arith.constant 0 : index
    %255 = vector.load %arg10[%c0_247, %c0_248, %c1_249, %c0_250] : memref<2x6x10x128xf32, #tpu.memory_space<vmem>>, vector<2x4x8x128xf32>
    %256 = vector.shape_cast %255 : vector<2x4x8x128xf32> to vector<2x2x2x8x128xf32>
    %257 = vector.extract_strided_slice %256 {offsets = [0, 0, 0, 0, 0], sizes = [2, 2, 1, 8, 128], strides = [1, 1, 1, 1, 1]} : vector<2x2x2x8x128xf32> to vector<2x2x1x8x128xf32>
    %258 = vector.shape_cast %257 : vector<2x2x1x8x128xf32> to vector<2x2x8x128xf32>
    %259 = vector.shape_cast %258 : vector<2x2x8x128xf32> to vector<32x128xf32>
    %260 = arith.truncf %259 : vector<32x128xf32> to vector<32x128xbf16>
    %c2_251 = arith.constant 2 : index
    %c1_252 = arith.constant 1 : index
    %c0_253 = arith.constant 0 : index
    %c0_254 = arith.constant 0 : index
    %261 = vector.load %arg2[%c2_251, %c1_252, %c0_253, %c0_254] : memref<4x9x128x128xbf16, #tpu.memory_space<vmem>>, vector<1x1x128x128xbf16>
    %262 = vector.shape_cast %261 : vector<1x1x128x128xbf16> to vector<128x128xbf16>
    %cst_255 = arith.constant dense<0.000000e+00> : vector<32x128xf32>
    %263 = tpu.matmul %260, %262, %cst_255 {dimension_numbers = #tpu.dot_dimension_numbers<[1], [0], [0], [1], [0, 0, 1, 1], [], []>} : vector<32x128xbf16>, vector<128x128xbf16>, vector<32x128xf32> -> vector<32x128xf32>
    %264 = arith.addf %254, %263 : vector<32x128xf32>
    %c0_256 = arith.constant 0 : index
    %c0_257 = arith.constant 0 : index
    %c2_258 = arith.constant 2 : index
    %c0_259 = arith.constant 0 : index
    %265 = vector.load %arg10[%c0_256, %c0_257, %c2_258, %c0_259] : memref<2x6x10x128xf32, #tpu.memory_space<vmem>>, vector<2x4x8x128xf32>
    %266 = vector.shape_cast %265 : vector<2x4x8x128xf32> to vector<2x2x2x8x128xf32>
    %267 = vector.extract_strided_slice %266 {offsets = [0, 0, 0, 0, 0], sizes = [2, 2, 1, 8, 128], strides = [1, 1, 1, 1, 1]} : vector<2x2x2x8x128xf32> to vector<2x2x1x8x128xf32>
    %268 = vector.shape_cast %267 : vector<2x2x1x8x128xf32> to vector<2x2x8x128xf32>
    %269 = vector.shape_cast %268 : vector<2x2x8x128xf32> to vector<32x128xf32>
    %270 = arith.truncf %269 : vector<32x128xf32> to vector<32x128xbf16>
    %c2_260 = arith.constant 2 : index
    %c2_261 = arith.constant 2 : index
    %c0_262 = arith.constant 0 : index
    %c0_263 = arith.constant 0 : index
    %271 = vector.load %arg2[%c2_260, %c2_261, %c0_262, %c0_263] : memref<4x9x128x128xbf16, #tpu.memory_space<vmem>>, vector<1x1x128x128xbf16>
    %272 = vector.shape_cast %271 : vector<1x1x128x128xbf16> to vector<128x128xbf16>
    %cst_264 = arith.constant dense<0.000000e+00> : vector<32x128xf32>
    %273 = tpu.matmul %270, %272, %cst_264 {dimension_numbers = #tpu.dot_dimension_numbers<[1], [0], [0], [1], [0, 0, 1, 1], [], []>} : vector<32x128xbf16>, vector<128x128xbf16>, vector<32x128xf32> -> vector<32x128xf32>
    %274 = arith.addf %264, %273 : vector<32x128xf32>
    %c0_265 = arith.constant 0 : index
    %c1_266 = arith.constant 1 : index
    %c0_267 = arith.constant 0 : index
    %c0_268 = arith.constant 0 : index
    %275 = vector.load %arg10[%c0_265, %c1_266, %c0_267, %c0_268] : memref<2x6x10x128xf32, #tpu.memory_space<vmem>>, vector<2x4x8x128xf32>
    %276 = vector.shape_cast %275 : vector<2x4x8x128xf32> to vector<2x2x2x8x128xf32>
    %277 = vector.extract_strided_slice %276 {offsets = [0, 0, 0, 0, 0], sizes = [2, 2, 1, 8, 128], strides = [1, 1, 1, 1, 1]} : vector<2x2x2x8x128xf32> to vector<2x2x1x8x128xf32>
    %278 = vector.shape_cast %277 : vector<2x2x1x8x128xf32> to vector<2x2x8x128xf32>
    %279 = vector.shape_cast %278 : vector<2x2x8x128xf32> to vector<32x128xf32>
    %280 = arith.truncf %279 : vector<32x128xf32> to vector<32x128xbf16>
    %c2_269 = arith.constant 2 : index
    %c3_270 = arith.constant 3 : index
    %c0_271 = arith.constant 0 : index
    %c0_272 = arith.constant 0 : index
    %281 = vector.load %arg2[%c2_269, %c3_270, %c0_271, %c0_272] : memref<4x9x128x128xbf16, #tpu.memory_space<vmem>>, vector<1x1x128x128xbf16>
    %282 = vector.shape_cast %281 : vector<1x1x128x128xbf16> to vector<128x128xbf16>
    %cst_273 = arith.constant dense<0.000000e+00> : vector<32x128xf32>
    %283 = tpu.matmul %280, %282, %cst_273 {dimension_numbers = #tpu.dot_dimension_numbers<[1], [0], [0], [1], [0, 0, 1, 1], [], []>} : vector<32x128xbf16>, vector<128x128xbf16>, vector<32x128xf32> -> vector<32x128xf32>
    %284 = arith.addf %274, %283 : vector<32x128xf32>
    %c0_274 = arith.constant 0 : index
    %c1_275 = arith.constant 1 : index
    %c1_276 = arith.constant 1 : index
    %c0_277 = arith.constant 0 : index
    %285 = vector.load %arg10[%c0_274, %c1_275, %c1_276, %c0_277] : memref<2x6x10x128xf32, #tpu.memory_space<vmem>>, vector<2x4x8x128xf32>
    %286 = vector.shape_cast %285 : vector<2x4x8x128xf32> to vector<2x2x2x8x128xf32>
    %287 = vector.extract_strided_slice %286 {offsets = [0, 0, 0, 0, 0], sizes = [2, 2, 1, 8, 128], strides = [1, 1, 1, 1, 1]} : vector<2x2x2x8x128xf32> to vector<2x2x1x8x128xf32>
    %288 = vector.shape_cast %287 : vector<2x2x1x8x128xf32> to vector<2x2x8x128xf32>
    %289 = vector.shape_cast %288 : vector<2x2x8x128xf32> to vector<32x128xf32>
    %290 = arith.truncf %289 : vector<32x128xf32> to vector<32x128xbf16>
    %c2_278 = arith.constant 2 : index
    %c4_279 = arith.constant 4 : index
    %c0_280 = arith.constant 0 : index
    %c0_281 = arith.constant 0 : index
    %291 = vector.load %arg2[%c2_278, %c4_279, %c0_280, %c0_281] : memref<4x9x128x128xbf16, #tpu.memory_space<vmem>>, vector<1x1x128x128xbf16>
    %292 = vector.shape_cast %291 : vector<1x1x128x128xbf16> to vector<128x128xbf16>
    %cst_282 = arith.constant dense<0.000000e+00> : vector<32x128xf32>
    %293 = tpu.matmul %290, %292, %cst_282 {dimension_numbers = #tpu.dot_dimension_numbers<[1], [0], [0], [1], [0, 0, 1, 1], [], []>} : vector<32x128xbf16>, vector<128x128xbf16>, vector<32x128xf32> -> vector<32x128xf32>
    %294 = arith.addf %284, %293 : vector<32x128xf32>
    %c0_283 = arith.constant 0 : index
    %c1_284 = arith.constant 1 : index
    %c2_285 = arith.constant 2 : index
    %c0_286 = arith.constant 0 : index
    %295 = vector.load %arg10[%c0_283, %c1_284, %c2_285, %c0_286] : memref<2x6x10x128xf32, #tpu.memory_space<vmem>>, vector<2x4x8x128xf32>
    %296 = vector.shape_cast %295 : vector<2x4x8x128xf32> to vector<2x2x2x8x128xf32>
    %297 = vector.extract_strided_slice %296 {offsets = [0, 0, 0, 0, 0], sizes = [2, 2, 1, 8, 128], strides = [1, 1, 1, 1, 1]} : vector<2x2x2x8x128xf32> to vector<2x2x1x8x128xf32>
    %298 = vector.shape_cast %297 : vector<2x2x1x8x128xf32> to vector<2x2x8x128xf32>
    %299 = vector.shape_cast %298 : vector<2x2x8x128xf32> to vector<32x128xf32>
    %300 = arith.truncf %299 : vector<32x128xf32> to vector<32x128xbf16>
    %c2_287 = arith.constant 2 : index
    %c5_288 = arith.constant 5 : index
    %c0_289 = arith.constant 0 : index
    %c0_290 = arith.constant 0 : index
    %301 = vector.load %arg2[%c2_287, %c5_288, %c0_289, %c0_290] : memref<4x9x128x128xbf16, #tpu.memory_space<vmem>>, vector<1x1x128x128xbf16>
    %302 = vector.shape_cast %301 : vector<1x1x128x128xbf16> to vector<128x128xbf16>
    %cst_291 = arith.constant dense<0.000000e+00> : vector<32x128xf32>
    %303 = tpu.matmul %300, %302, %cst_291 {dimension_numbers = #tpu.dot_dimension_numbers<[1], [0], [0], [1], [0, 0, 1, 1], [], []>} : vector<32x128xbf16>, vector<128x128xbf16>, vector<32x128xf32> -> vector<32x128xf32>
    %304 = arith.addf %294, %303 : vector<32x128xf32>
    %c0_292 = arith.constant 0 : index
    %c2_293 = arith.constant 2 : index
    %c0_294 = arith.constant 0 : index
    %c0_295 = arith.constant 0 : index
    %305 = vector.load %arg10[%c0_292, %c2_293, %c0_294, %c0_295] : memref<2x6x10x128xf32, #tpu.memory_space<vmem>>, vector<2x4x8x128xf32>
    %306 = vector.shape_cast %305 : vector<2x4x8x128xf32> to vector<2x2x2x8x128xf32>
    %307 = vector.extract_strided_slice %306 {offsets = [0, 0, 0, 0, 0], sizes = [2, 2, 1, 8, 128], strides = [1, 1, 1, 1, 1]} : vector<2x2x2x8x128xf32> to vector<2x2x1x8x128xf32>
    %308 = vector.shape_cast %307 : vector<2x2x1x8x128xf32> to vector<2x2x8x128xf32>
    %309 = vector.shape_cast %308 : vector<2x2x8x128xf32> to vector<32x128xf32>
    %310 = arith.truncf %309 : vector<32x128xf32> to vector<32x128xbf16>
    %c2_296 = arith.constant 2 : index
    %c6_297 = arith.constant 6 : index
    %c0_298 = arith.constant 0 : index
    %c0_299 = arith.constant 0 : index
    %311 = vector.load %arg2[%c2_296, %c6_297, %c0_298, %c0_299] : memref<4x9x128x128xbf16, #tpu.memory_space<vmem>>, vector<1x1x128x128xbf16>
    %312 = vector.shape_cast %311 : vector<1x1x128x128xbf16> to vector<128x128xbf16>
    %cst_300 = arith.constant dense<0.000000e+00> : vector<32x128xf32>
    %313 = tpu.matmul %310, %312, %cst_300 {dimension_numbers = #tpu.dot_dimension_numbers<[1], [0], [0], [1], [0, 0, 1, 1], [], []>} : vector<32x128xbf16>, vector<128x128xbf16>, vector<32x128xf32> -> vector<32x128xf32>
    %314 = arith.addf %304, %313 : vector<32x128xf32>
    %c0_301 = arith.constant 0 : index
    %c2_302 = arith.constant 2 : index
    %c1_303 = arith.constant 1 : index
    %c0_304 = arith.constant 0 : index
    %315 = vector.load %arg10[%c0_301, %c2_302, %c1_303, %c0_304] : memref<2x6x10x128xf32, #tpu.memory_space<vmem>>, vector<2x4x8x128xf32>
    %316 = vector.shape_cast %315 : vector<2x4x8x128xf32> to vector<2x2x2x8x128xf32>
    %317 = vector.extract_strided_slice %316 {offsets = [0, 0, 0, 0, 0], sizes = [2, 2, 1, 8, 128], strides = [1, 1, 1, 1, 1]} : vector<2x2x2x8x128xf32> to vector<2x2x1x8x128xf32>
    %318 = vector.shape_cast %317 : vector<2x2x1x8x128xf32> to vector<2x2x8x128xf32>
    %319 = vector.shape_cast %318 : vector<2x2x8x128xf32> to vector<32x128xf32>
    %320 = arith.truncf %319 : vector<32x128xf32> to vector<32x128xbf16>
    %c2_305 = arith.constant 2 : index
    %c7_306 = arith.constant 7 : index
    %c0_307 = arith.constant 0 : index
    %c0_308 = arith.constant 0 : index
    %321 = vector.load %arg2[%c2_305, %c7_306, %c0_307, %c0_308] : memref<4x9x128x128xbf16, #tpu.memory_space<vmem>>, vector<1x1x128x128xbf16>
    %322 = vector.shape_cast %321 : vector<1x1x128x128xbf16> to vector<128x128xbf16>
    %cst_309 = arith.constant dense<0.000000e+00> : vector<32x128xf32>
    %323 = tpu.matmul %320, %322, %cst_309 {dimension_numbers = #tpu.dot_dimension_numbers<[1], [0], [0], [1], [0, 0, 1, 1], [], []>} : vector<32x128xbf16>, vector<128x128xbf16>, vector<32x128xf32> -> vector<32x128xf32>
    %324 = arith.addf %314, %323 : vector<32x128xf32>
    %c0_310 = arith.constant 0 : index
    %c2_311 = arith.constant 2 : index
    %c2_312 = arith.constant 2 : index
    %c0_313 = arith.constant 0 : index
    %325 = vector.load %arg10[%c0_310, %c2_311, %c2_312, %c0_313] : memref<2x6x10x128xf32, #tpu.memory_space<vmem>>, vector<2x4x8x128xf32>
    %326 = vector.shape_cast %325 : vector<2x4x8x128xf32> to vector<2x2x2x8x128xf32>
    %327 = vector.extract_strided_slice %326 {offsets = [0, 0, 0, 0, 0], sizes = [2, 2, 1, 8, 128], strides = [1, 1, 1, 1, 1]} : vector<2x2x2x8x128xf32> to vector<2x2x1x8x128xf32>
    %328 = vector.shape_cast %327 : vector<2x2x1x8x128xf32> to vector<2x2x8x128xf32>
    %329 = vector.shape_cast %328 : vector<2x2x8x128xf32> to vector<32x128xf32>
    %330 = arith.truncf %329 : vector<32x128xf32> to vector<32x128xbf16>
    %c2_314 = arith.constant 2 : index
    %c8_315 = arith.constant 8 : index
    %c0_316 = arith.constant 0 : index
    %c0_317 = arith.constant 0 : index
    %331 = vector.load %arg2[%c2_314, %c8_315, %c0_316, %c0_317] : memref<4x9x128x128xbf16, #tpu.memory_space<vmem>>, vector<1x1x128x128xbf16>
    %332 = vector.shape_cast %331 : vector<1x1x128x128xbf16> to vector<128x128xbf16>
    %cst_318 = arith.constant dense<0.000000e+00> : vector<32x128xf32>
    %333 = tpu.matmul %330, %332, %cst_318 {dimension_numbers = #tpu.dot_dimension_numbers<[1], [0], [0], [1], [0, 0, 1, 1], [], []>} : vector<32x128xbf16>, vector<128x128xbf16>, vector<32x128xf32> -> vector<32x128xf32>
    %334 = arith.addf %324, %333 : vector<32x128xf32>
    %c2_319 = arith.constant 2 : index
    %c0_320 = arith.constant 0 : index
    %c0_321 = arith.constant 0 : index
    %335 = vector.load %arg3[%c2_319, %c0_320, %c0_321] : memref<4x1x128xf32, #tpu.memory_space<vmem>>, vector<1x1x128xf32>
    %336 = vector.shape_cast %335 : vector<1x1x128xf32> to vector<1x128xf32>
    %337 = vector.broadcast %336 : vector<1x128xf32> to vector<32x128xf32>
    %338 = arith.addf %334, %337 : vector<32x128xf32>
    %cst_322 = arith.constant 0.00999999977 : f32
    %339 = vector.broadcast %cst_322 : f32 to vector<32x128xf32>
    %340 = arith.mulf %339, %338 : vector<32x128xf32>
    %341 = arith.maximumf %338, %340 : vector<32x128xf32>
    %c2_323 = arith.constant 2 : index
    %c0_324 = arith.constant 0 : index
    %c0_325 = arith.constant 0 : index
    %342 = vector.load %arg4[%c2_323, %c0_324, %c0_325] : memref<4x1x128xf32, #tpu.memory_space<vmem>>, vector<1x1x128xf32>
    %343 = vector.shape_cast %342 : vector<1x1x128xf32> to vector<1x128xf32>
    %344 = vector.broadcast %343 : vector<1x128xf32> to vector<32x128xf32>
    %345 = arith.mulf %341, %344 : vector<32x128xf32>
    %c2_326 = arith.constant 2 : index
    %c0_327 = arith.constant 0 : index
    %c0_328 = arith.constant 0 : index
    %346 = vector.load %arg5[%c2_326, %c0_327, %c0_328] : memref<4x1x128xf32, #tpu.memory_space<vmem>>, vector<1x1x128xf32>
    %347 = vector.shape_cast %346 : vector<1x1x128xf32> to vector<1x128xf32>
    %348 = vector.broadcast %347 : vector<1x128xf32> to vector<32x128xf32>
    %349 = arith.addf %345, %348 : vector<32x128xf32>
    %350 = vector.shape_cast %349 : vector<32x128xf32> to vector<2x2x8x128xf32>
    %351 = vector.extract_strided_slice %350 {offsets = [0, 0, 0, 0], sizes = [2, 2, 1, 128], strides = [1, 1, 1, 1]} : vector<2x2x8x128xf32> to vector<2x2x1x128xf32>
    %c0_329 = arith.constant 0 : index
    %c1_330 = arith.constant 1 : index
    %c1_331 = arith.constant 1 : index
    %c0_332 = arith.constant 0 : index
    %352 = vector.load %arg11[%c0_329, %c1_330, %c1_331, %c0_332] : memref<2x4x10x128xf32, #tpu.memory_space<vmem>>, vector<2x2x1x128xf32>
    tpu.vector_store %arg11[%c0_329, %c1_330, %c1_331, %c0_332], %351 {strides = array<i32>} : memref<2x4x10x128xf32, #tpu.memory_space<vmem>>, vector<2x2x1x128xf32>,
    %353 = vector.extract_strided_slice %350 {offsets = [0, 0, 2, 0], sizes = [2, 2, 1, 128], strides = [1, 1, 1, 1]} : vector<2x2x8x128xf32> to vector<2x2x1x128xf32>
    %c0_333 = arith.constant 0 : index
    %c1_334 = arith.constant 1 : index
    %c2_335 = arith.constant 2 : index
    %c0_336 = arith.constant 0 : index
    %354 = vector.load %arg11[%c0_333, %c1_334, %c2_335, %c0_336] : memref<2x4x10x128xf32, #tpu.memory_space<vmem>>, vector<2x2x1x128xf32>
    tpu.vector_store %arg11[%c0_333, %c1_334, %c2_335, %c0_336], %353 {strides = array<i32>} : memref<2x4x10x128xf32, #tpu.memory_space<vmem>>, vector<2x2x1x128xf32>,
    %cst_337 = arith.constant 0.000000e+00 : f32
    %355 = vector.broadcast %cst_337 : f32 to vector<16x128xf32>
    %c0_338 = arith.constant 0 : index
    %c0_339 = arith.constant 0 : index
    %c0_340 = arith.constant 0 : index
    %c0_341 = arith.constant 0 : index
    %356 = vector.load %arg11[%c0_338, %c0_339, %c0_340, %c0_341] : memref<2x4x10x128xf32, #tpu.memory_space<vmem>>, vector<2x2x8x128xf32>
    %357 = vector.shape_cast %356 : vector<2x2x8x128xf32> to vector<2x1x2x8x128xf32>
    %358 = vector.extract_strided_slice %357 {offsets = [0, 0, 0, 0, 0], sizes = [2, 1, 1, 8, 128], strides = [1, 1, 1, 1, 1]} : vector<2x1x2x8x128xf32> to vector<2x1x1x8x128xf32>
    %359 = vector.shape_cast %358 : vector<2x1x1x8x128xf32> to vector<2x1x8x128xf32>
    %360 = vector.shape_cast %359 : vector<2x1x8x128xf32> to vector<16x128xf32>
    %361 = arith.truncf %360 : vector<16x128xf32> to vector<16x128xbf16>
    %c3_342 = arith.constant 3 : index
    %c0_343 = arith.constant 0 : index
    %c0_344 = arith.constant 0 : index
    %c0_345 = arith.constant 0 : index
    %362 = vector.load %arg2[%c3_342, %c0_343, %c0_344, %c0_345] : memref<4x9x128x128xbf16, #tpu.memory_space<vmem>>, vector<1x1x128x128xbf16>
    %363 = vector.shape_cast %362 : vector<1x1x128x128xbf16> to vector<128x128xbf16>
    %cst_346 = arith.constant dense<0.000000e+00> : vector<16x128xf32>
    %364 = tpu.matmul %361, %363, %cst_346 {dimension_numbers = #tpu.dot_dimension_numbers<[1], [0], [0], [1], [0, 0, 1, 1], [], []>} : vector<16x128xbf16>, vector<128x128xbf16>, vector<16x128xf32> -> vector<16x128xf32>
    %365 = arith.addf %355, %364 : vector<16x128xf32>
    %c0_347 = arith.constant 0 : index
    %c0_348 = arith.constant 0 : index
    %c1_349 = arith.constant 1 : index
    %c0_350 = arith.constant 0 : index
    %366 = vector.load %arg11[%c0_347, %c0_348, %c1_349, %c0_350] : memref<2x4x10x128xf32, #tpu.memory_space<vmem>>, vector<2x2x8x128xf32>
    %367 = vector.shape_cast %366 : vector<2x2x8x128xf32> to vector<2x1x2x8x128xf32>
    %368 = vector.extract_strided_slice %367 {offsets = [0, 0, 0, 0, 0], sizes = [2, 1, 1, 8, 128], strides = [1, 1, 1, 1, 1]} : vector<2x1x2x8x128xf32> to vector<2x1x1x8x128xf32>
    %369 = vector.shape_cast %368 : vector<2x1x1x8x128xf32> to vector<2x1x8x128xf32>
    %370 = vector.shape_cast %369 : vector<2x1x8x128xf32> to vector<16x128xf32>
    %371 = arith.truncf %370 : vector<16x128xf32> to vector<16x128xbf16>
    %c3_351 = arith.constant 3 : index
    %c1_352 = arith.constant 1 : index
    %c0_353 = arith.constant 0 : index
    %c0_354 = arith.constant 0 : index
    %372 = vector.load %arg2[%c3_351, %c1_352, %c0_353, %c0_354] : memref<4x9x128x128xbf16, #tpu.memory_space<vmem>>, vector<1x1x128x128xbf16>
    %373 = vector.shape_cast %372 : vector<1x1x128x128xbf16> to vector<128x128xbf16>
    %cst_355 = arith.constant dense<0.000000e+00> : vector<16x128xf32>
    %374 = tpu.matmul %371, %373, %cst_355 {dimension_numbers = #tpu.dot_dimension_numbers<[1], [0], [0], [1], [0, 0, 1, 1], [], []>} : vector<16x128xbf16>, vector<128x128xbf16>, vector<16x128xf32> -> vector<16x128xf32>
    %375 = arith.addf %365, %374 : vector<16x128xf32>
    %c0_356 = arith.constant 0 : index
    %c0_357 = arith.constant 0 : index
    %c2_358 = arith.constant 2 : index
    %c0_359 = arith.constant 0 : index
    %376 = vector.load %arg11[%c0_356, %c0_357, %c2_358, %c0_359] : memref<2x4x10x128xf32, #tpu.memory_space<vmem>>, vector<2x2x8x128xf32>
    %377 = vector.shape_cast %376 : vector<2x2x8x128xf32> to vector<2x1x2x8x128xf32>
    %378 = vector.extract_strided_slice %377 {offsets = [0, 0, 0, 0, 0], sizes = [2, 1, 1, 8, 128], strides = [1, 1, 1, 1, 1]} : vector<2x1x2x8x128xf32> to vector<2x1x1x8x128xf32>
    %379 = vector.shape_cast %378 : vector<2x1x1x8x128xf32> to vector<2x1x8x128xf32>
    %380 = vector.shape_cast %379 : vector<2x1x8x128xf32> to vector<16x128xf32>
    %381 = arith.truncf %380 : vector<16x128xf32> to vector<16x128xbf16>
    %c3_360 = arith.constant 3 : index
    %c2_361 = arith.constant 2 : index
    %c0_362 = arith.constant 0 : index
    %c0_363 = arith.constant 0 : index
    %382 = vector.load %arg2[%c3_360, %c2_361, %c0_362, %c0_363] : memref<4x9x128x128xbf16, #tpu.memory_space<vmem>>, vector<1x1x128x128xbf16>
    %383 = vector.shape_cast %382 : vector<1x1x128x128xbf16> to vector<128x128xbf16>
    %cst_364 = arith.constant dense<0.000000e+00> : vector<16x128xf32>
    %384 = tpu.matmul %381, %383, %cst_364 {dimension_numbers = #tpu.dot_dimension_numbers<[1], [0], [0], [1], [0, 0, 1, 1], [], []>} : vector<16x128xbf16>, vector<128x128xbf16>, vector<16x128xf32> -> vector<16x128xf32>
    %385 = arith.addf %375, %384 : vector<16x128xf32>
    %c0_365 = arith.constant 0 : index
    %c1_366 = arith.constant 1 : index
    %c0_367 = arith.constant 0 : index
    %c0_368 = arith.constant 0 : index
    %386 = vector.load %arg11[%c0_365, %c1_366, %c0_367, %c0_368] : memref<2x4x10x128xf32, #tpu.memory_space<vmem>>, vector<2x2x8x128xf32>
    %387 = vector.shape_cast %386 : vector<2x2x8x128xf32> to vector<2x1x2x8x128xf32>
    %388 = vector.extract_strided_slice %387 {offsets = [0, 0, 0, 0, 0], sizes = [2, 1, 1, 8, 128], strides = [1, 1, 1, 1, 1]} : vector<2x1x2x8x128xf32> to vector<2x1x1x8x128xf32>
    %389 = vector.shape_cast %388 : vector<2x1x1x8x128xf32> to vector<2x1x8x128xf32>
    %390 = vector.shape_cast %389 : vector<2x1x8x128xf32> to vector<16x128xf32>
    %391 = arith.truncf %390 : vector<16x128xf32> to vector<16x128xbf16>
    %c3_369 = arith.constant 3 : index
    %c3_370 = arith.constant 3 : index
    %c0_371 = arith.constant 0 : index
    %c0_372 = arith.constant 0 : index
    %392 = vector.load %arg2[%c3_369, %c3_370, %c0_371, %c0_372] : memref<4x9x128x128xbf16, #tpu.memory_space<vmem>>, vector<1x1x128x128xbf16>
    %393 = vector.shape_cast %392 : vector<1x1x128x128xbf16> to vector<128x128xbf16>
    %cst_373 = arith.constant dense<0.000000e+00> : vector<16x128xf32>
    %394 = tpu.matmul %391, %393, %cst_373 {dimension_numbers = #tpu.dot_dimension_numbers<[1], [0], [0], [1], [0, 0, 1, 1], [], []>} : vector<16x128xbf16>, vector<128x128xbf16>, vector<16x128xf32> -> vector<16x128xf32>
    %395 = arith.addf %385, %394 : vector<16x128xf32>
    %c0_374 = arith.constant 0 : index
    %c1_375 = arith.constant 1 : index
    %c1_376 = arith.constant 1 : index
    %c0_377 = arith.constant 0 : index
    %396 = vector.load %arg11[%c0_374, %c1_375, %c1_376, %c0_377] : memref<2x4x10x128xf32, #tpu.memory_space<vmem>>, vector<2x2x8x128xf32>
    %397 = vector.shape_cast %396 : vector<2x2x8x128xf32> to vector<2x1x2x8x128xf32>
    %398 = vector.extract_strided_slice %397 {offsets = [0, 0, 0, 0, 0], sizes = [2, 1, 1, 8, 128], strides = [1, 1, 1, 1, 1]} : vector<2x1x2x8x128xf32> to vector<2x1x1x8x128xf32>
    %399 = vector.shape_cast %398 : vector<2x1x1x8x128xf32> to vector<2x1x8x128xf32>
    %400 = vector.shape_cast %399 : vector<2x1x8x128xf32> to vector<16x128xf32>
    %401 = arith.truncf %400 : vector<16x128xf32> to vector<16x128xbf16>
    %c3_378 = arith.constant 3 : index
    %c4_379 = arith.constant 4 : index
    %c0_380 = arith.constant 0 : index
    %c0_381 = arith.constant 0 : index
    %402 = vector.load %arg2[%c3_378, %c4_379, %c0_380, %c0_381] : memref<4x9x128x128xbf16, #tpu.memory_space<vmem>>, vector<1x1x128x128xbf16>
    %403 = vector.shape_cast %402 : vector<1x1x128x128xbf16> to vector<128x128xbf16>
    %cst_382 = arith.constant dense<0.000000e+00> : vector<16x128xf32>
    %404 = tpu.matmul %401, %403, %cst_382 {dimension_numbers = #tpu.dot_dimension_numbers<[1], [0], [0], [1], [0, 0, 1, 1], [], []>} : vector<16x128xbf16>, vector<128x128xbf16>, vector<16x128xf32> -> vector<16x128xf32>
    %405 = arith.addf %395, %404 : vector<16x128xf32>
    %c0_383 = arith.constant 0 : index
    %c1_384 = arith.constant 1 : index
    %c2_385 = arith.constant 2 : index
    %c0_386 = arith.constant 0 : index
    %406 = vector.load %arg11[%c0_383, %c1_384, %c2_385, %c0_386] : memref<2x4x10x128xf32, #tpu.memory_space<vmem>>, vector<2x2x8x128xf32>
    %407 = vector.shape_cast %406 : vector<2x2x8x128xf32> to vector<2x1x2x8x128xf32>
    %408 = vector.extract_strided_slice %407 {offsets = [0, 0, 0, 0, 0], sizes = [2, 1, 1, 8, 128], strides = [1, 1, 1, 1, 1]} : vector<2x1x2x8x128xf32> to vector<2x1x1x8x128xf32>
    %409 = vector.shape_cast %408 : vector<2x1x1x8x128xf32> to vector<2x1x8x128xf32>
    %410 = vector.shape_cast %409 : vector<2x1x8x128xf32> to vector<16x128xf32>
    %411 = arith.truncf %410 : vector<16x128xf32> to vector<16x128xbf16>
    %c3_387 = arith.constant 3 : index
    %c5_388 = arith.constant 5 : index
    %c0_389 = arith.constant 0 : index
    %c0_390 = arith.constant 0 : index
    %412 = vector.load %arg2[%c3_387, %c5_388, %c0_389, %c0_390] : memref<4x9x128x128xbf16, #tpu.memory_space<vmem>>, vector<1x1x128x128xbf16>
    %413 = vector.shape_cast %412 : vector<1x1x128x128xbf16> to vector<128x128xbf16>
    %cst_391 = arith.constant dense<0.000000e+00> : vector<16x128xf32>
    %414 = tpu.matmul %411, %413, %cst_391 {dimension_numbers = #tpu.dot_dimension_numbers<[1], [0], [0], [1], [0, 0, 1, 1], [], []>} : vector<16x128xbf16>, vector<128x128xbf16>, vector<16x128xf32> -> vector<16x128xf32>
    %415 = arith.addf %405, %414 : vector<16x128xf32>
    %c0_392 = arith.constant 0 : index
    %c2_393 = arith.constant 2 : index
    %c0_394 = arith.constant 0 : index
    %c0_395 = arith.constant 0 : index
    %416 = vector.load %arg11[%c0_392, %c2_393, %c0_394, %c0_395] : memref<2x4x10x128xf32, #tpu.memory_space<vmem>>, vector<2x2x8x128xf32>
    %417 = vector.shape_cast %416 : vector<2x2x8x128xf32> to vector<2x1x2x8x128xf32>
    %418 = vector.extract_strided_slice %417 {offsets = [0, 0, 0, 0, 0], sizes = [2, 1, 1, 8, 128], strides = [1, 1, 1, 1, 1]} : vector<2x1x2x8x128xf32> to vector<2x1x1x8x128xf32>
    %419 = vector.shape_cast %418 : vector<2x1x1x8x128xf32> to vector<2x1x8x128xf32>
    %420 = vector.shape_cast %419 : vector<2x1x8x128xf32> to vector<16x128xf32>
    %421 = arith.truncf %420 : vector<16x128xf32> to vector<16x128xbf16>
    %c3_396 = arith.constant 3 : index
    %c6_397 = arith.constant 6 : index
    %c0_398 = arith.constant 0 : index
    %c0_399 = arith.constant 0 : index
    %422 = vector.load %arg2[%c3_396, %c6_397, %c0_398, %c0_399] : memref<4x9x128x128xbf16, #tpu.memory_space<vmem>>, vector<1x1x128x128xbf16>
    %423 = vector.shape_cast %422 : vector<1x1x128x128xbf16> to vector<128x128xbf16>
    %cst_400 = arith.constant dense<0.000000e+00> : vector<16x128xf32>
    %424 = tpu.matmul %421, %423, %cst_400 {dimension_numbers = #tpu.dot_dimension_numbers<[1], [0], [0], [1], [0, 0, 1, 1], [], []>} : vector<16x128xbf16>, vector<128x128xbf16>, vector<16x128xf32> -> vector<16x128xf32>
    %425 = arith.addf %415, %424 : vector<16x128xf32>
    %c0_401 = arith.constant 0 : index
    %c2_402 = arith.constant 2 : index
    %c1_403 = arith.constant 1 : index
    %c0_404 = arith.constant 0 : index
    %426 = vector.load %arg11[%c0_401, %c2_402, %c1_403, %c0_404] : memref<2x4x10x128xf32, #tpu.memory_space<vmem>>, vector<2x2x8x128xf32>
    %427 = vector.shape_cast %426 : vector<2x2x8x128xf32> to vector<2x1x2x8x128xf32>
    %428 = vector.extract_strided_slice %427 {offsets = [0, 0, 0, 0, 0], sizes = [2, 1, 1, 8, 128], strides = [1, 1, 1, 1, 1]} : vector<2x1x2x8x128xf32> to vector<2x1x1x8x128xf32>
    %429 = vector.shape_cast %428 : vector<2x1x1x8x128xf32> to vector<2x1x8x128xf32>
    %430 = vector.shape_cast %429 : vector<2x1x8x128xf32> to vector<16x128xf32>
    %431 = arith.truncf %430 : vector<16x128xf32> to vector<16x128xbf16>
    %c3_405 = arith.constant 3 : index
    %c7_406 = arith.constant 7 : index
    %c0_407 = arith.constant 0 : index
    %c0_408 = arith.constant 0 : index
    %432 = vector.load %arg2[%c3_405, %c7_406, %c0_407, %c0_408] : memref<4x9x128x128xbf16, #tpu.memory_space<vmem>>, vector<1x1x128x128xbf16>
    %433 = vector.shape_cast %432 : vector<1x1x128x128xbf16> to vector<128x128xbf16>
    %cst_409 = arith.constant dense<0.000000e+00> : vector<16x128xf32>
    %434 = tpu.matmul %431, %433, %cst_409 {dimension_numbers = #tpu.dot_dimension_numbers<[1], [0], [0], [1], [0, 0, 1, 1], [], []>} : vector<16x128xbf16>, vector<128x128xbf16>, vector<16x128xf32> -> vector<16x128xf32>
    %435 = arith.addf %425, %434 : vector<16x128xf32>
    %c0_410 = arith.constant 0 : index
    %c2_411 = arith.constant 2 : index
    %c2_412 = arith.constant 2 : index
    %c0_413 = arith.constant 0 : index
    %436 = vector.load %arg11[%c0_410, %c2_411, %c2_412, %c0_413] : memref<2x4x10x128xf32, #tpu.memory_space<vmem>>, vector<2x2x8x128xf32>
    %437 = vector.shape_cast %436 : vector<2x2x8x128xf32> to vector<2x1x2x8x128xf32>
    %438 = vector.extract_strided_slice %437 {offsets = [0, 0, 0, 0, 0], sizes = [2, 1, 1, 8, 128], strides = [1, 1, 1, 1, 1]} : vector<2x1x2x8x128xf32> to vector<2x1x1x8x128xf32>
    %439 = vector.shape_cast %438 : vector<2x1x1x8x128xf32> to vector<2x1x8x128xf32>
    %440 = vector.shape_cast %439 : vector<2x1x8x128xf32> to vector<16x128xf32>
    %441 = arith.truncf %440 : vector<16x128xf32> to vector<16x128xbf16>
    %c3_414 = arith.constant 3 : index
    %c8_415 = arith.constant 8 : index
    %c0_416 = arith.constant 0 : index
    %c0_417 = arith.constant 0 : index
    %442 = vector.load %arg2[%c3_414, %c8_415, %c0_416, %c0_417] : memref<4x9x128x128xbf16, #tpu.memory_space<vmem>>, vector<1x1x128x128xbf16>
    %443 = vector.shape_cast %442 : vector<1x1x128x128xbf16> to vector<128x128xbf16>
    %cst_418 = arith.constant dense<0.000000e+00> : vector<16x128xf32>
    %444 = tpu.matmul %441, %443, %cst_418 {dimension_numbers = #tpu.dot_dimension_numbers<[1], [0], [0], [1], [0, 0, 1, 1], [], []>} : vector<16x128xbf16>, vector<128x128xbf16>, vector<16x128xf32> -> vector<16x128xf32>
    %445 = arith.addf %435, %444 : vector<16x128xf32>
    %c3_419 = arith.constant 3 : index
    %c0_420 = arith.constant 0 : index
    %c0_421 = arith.constant 0 : index
    %446 = vector.load %arg3[%c3_419, %c0_420, %c0_421] : memref<4x1x128xf32, #tpu.memory_space<vmem>>, vector<1x1x128xf32>
    %447 = vector.shape_cast %446 : vector<1x1x128xf32> to vector<1x128xf32>
    %448 = vector.broadcast %447 : vector<1x128xf32> to vector<16x128xf32>
    %449 = arith.addf %445, %448 : vector<16x128xf32>
    %cst_422 = arith.constant 0.00999999977 : f32
    %450 = vector.broadcast %cst_422 : f32 to vector<16x128xf32>
    %451 = arith.mulf %450, %449 : vector<16x128xf32>
    %452 = arith.maximumf %449, %451 : vector<16x128xf32>
    %c3_423 = arith.constant 3 : index
    %c0_424 = arith.constant 0 : index
    %c0_425 = arith.constant 0 : index
    %453 = vector.load %arg4[%c3_423, %c0_424, %c0_425] : memref<4x1x128xf32, #tpu.memory_space<vmem>>, vector<1x1x128xf32>
    %454 = vector.shape_cast %453 : vector<1x1x128xf32> to vector<1x128xf32>
    %455 = vector.broadcast %454 : vector<1x128xf32> to vector<16x128xf32>
    %456 = arith.mulf %452, %455 : vector<16x128xf32>
    %c3_426 = arith.constant 3 : index
    %c0_427 = arith.constant 0 : index
    %c0_428 = arith.constant 0 : index
    %457 = vector.load %arg5[%c3_426, %c0_427, %c0_428] : memref<4x1x128xf32, #tpu.memory_space<vmem>>, vector<1x1x128xf32>
    %458 = vector.shape_cast %457 : vector<1x1x128xf32> to vector<1x128xf32>
    %459 = vector.broadcast %458 : vector<1x128xf32> to vector<16x128xf32>
    %460 = arith.addf %456, %459 : vector<16x128xf32>
    %461 = arith.truncf %460 : vector<16x128xf32> to vector<16x128xbf16>
    %c0_429 = arith.constant 0 : index
    %c0_430 = arith.constant 0 : index
    %462 = vector.load %arg6[%c0_429, %c0_430] : memref<128x128xbf16, #tpu.memory_space<vmem>>, vector<128x128xbf16>
    %cst_431 = arith.constant dense<0.000000e+00> : vector<16x128xf32>
    %463 = tpu.matmul %461, %462, %cst_431 {dimension_numbers = #tpu.dot_dimension_numbers<[1], [0], [0], [1], [0, 0, 1, 1], [], []>} : vector<16x128xbf16>, vector<128x128xbf16>, vector<16x128xf32> -> vector<16x128xf32>
    %c0_432 = arith.constant 0 : index
    %c0_433 = arith.constant 0 : index
    %464 = vector.load %arg7[%c0_432, %c0_433] : memref<1x128xf32, #tpu.memory_space<vmem>>, vector<1x128xf32>
    %465 = vector.broadcast %464 : vector<1x128xf32> to vector<16x128xf32>
    %466 = arith.addf %463, %465 : vector<16x128xf32>
    %cst_434 = arith.constant 0.000000e+00 : f32
    %467 = vector.broadcast %cst_434 : f32 to vector<16x128xf32>
    %468 = arith.subf %467, %466 : vector<16x128xf32>
    %469 = math.exp %468 : vector<16x128xf32>
    %cst_435 = arith.constant 1.000000e+00 : f32
    %470 = vector.broadcast %cst_435 : f32 to vector<16x128xf32>
    %471 = arith.addf %470, %469 : vector<16x128xf32>
    %472 = tpu.reciprocal %471 {approx = true} : vector<16x128xf32> -> vector<16x128xf32>
    %c0_436 = arith.constant 0 : index
    %c0_437 = arith.constant 0 : index
    %473 = vector.load %arg8[%c0_436, %c0_437] : memref<16x128xf32, #tpu.memory_space<vmem>>, vector<16x128xf32>
    tpu.vector_store %arg8[%c0_436, %c0_437], %472 {strides = array<i32>} : memref<16x128xf32, #tpu.memory_space<vmem>>, vector<16x128xf32>,
    return
  }
  func.func @transform_0(%arg0: i32) -> (i32, i32, i32, i32) {
    %c0_i32 = arith.constant 0 : i32
    %c0_i32_0 = arith.constant 0 : i32
    %c0_i32_1 = arith.constant 0 : i32
    %c0_i32_2 = arith.constant 0 : i32
    return %arg0, %c0_i32, %c0_i32_0, %c0_i32_1 : i32, i32, i32, i32
  }
  func.func @transform_1(%arg0: i32) -> (i32, i32, i32, i32) {
    %c0_i32 = arith.constant 0 : i32
    %c0_i32_0 = arith.constant 0 : i32
    %c0_i32_1 = arith.constant 0 : i32
    %c0_i32_2 = arith.constant 0 : i32
    %c0_i32_3 = arith.constant 0 : i32
    return %c0_i32, %c0_i32_0, %c0_i32_1, %c0_i32_2 : i32, i32, i32, i32
  }
  func.func @transform_2(%arg0: i32) -> (i32, i32, i32) {
    %c0_i32 = arith.constant 0 : i32
    %c0_i32_0 = arith.constant 0 : i32
    %c0_i32_1 = arith.constant 0 : i32
    %c0_i32_2 = arith.constant 0 : i32
    return %c0_i32, %c0_i32_0, %c0_i32_1 : i32, i32, i32
  }
  func.func @transform_3(%arg0: i32) -> (i32, i32, i32) {
    %c0_i32 = arith.constant 0 : i32
    %c0_i32_0 = arith.constant 0 : i32
    %c0_i32_1 = arith.constant 0 : i32
    %c0_i32_2 = arith.constant 0 : i32
    return %c0_i32, %c0_i32_0, %c0_i32_1 : i32, i32, i32
  }
  func.func @transform_4(%arg0: i32) -> (i32, i32, i32) {
    %c0_i32 = arith.constant 0 : i32
    %c0_i32_0 = arith.constant 0 : i32
    %c0_i32_1 = arith.constant 0 : i32
    %c0_i32_2 = arith.constant 0 : i32
    return %c0_i32, %c0_i32_0, %c0_i32_1 : i32, i32, i32
  }
  func.func @transform_5(%arg0: i32) -> (i32, i32) {
    %c0_i32 = arith.constant 0 : i32
    %c0_i32_0 = arith.constant 0 : i32
    %c0_i32_1 = arith.constant 0 : i32
    return %c0_i32, %c0_i32_0 : i32, i32
  }
  func.func @transform_6(%arg0: i32) -> (i32, i32) {
    %c0_i32 = arith.constant 0 : i32
    %c0_i32_0 = arith.constant 0 : i32
    %c0_i32_1 = arith.constant 0 : i32
    return %c0_i32, %c0_i32_0 : i32, i32
  }
  func.func @transform_7(%arg0: i32) -> (i32, i32) {
    %c0_i32 = arith.constant 0 : i32
    %c0_i32_0 = arith.constant 0 : i32
    return %arg0, %c0_i32 : i32, i32
  }
}

</mosaic_0001>

<bundles_post_ra>
// kernel: tpu_custom_call.1
= control target key start
LH: loop header
LB: loop body
LE: loop exit
PB: predicated region body
PF: predicated region fallthrough
CT: control target
= control target key end

     0   :  { %12 = vsyncpa [#allocation6], 0  ;;  %s11251_s0 = inlined_call_operand.vmem [shape: f32[2,18,18,128], index: 0, kind: input, shape index: {}]   ;;  %s11252_s1 = inlined_call_operand.hbm [shape: bf16[4,9,128,128], index: 1, kind: input, shape index: {}]   ;;  %s11253_s2 = inlined_call_operand.hbm [shape: f32[4,1,128], index: 2, kind: input, shape index: {}]   ;;  %s11254_s3 = inlined_call_operand.hbm [shape: f32[4,1,128], index: 3, kind: input, shape index: {}]   ;;  %s11255_s4 = inlined_call_operand.hbm [shape: f32[4,1,128], index: 4, kind: input, shape index: {}]   ;;  %s11256_s5 = inlined_call_operand.hbm [shape: bf16[128,128], index: 5, kind: input, shape index: {}]   ;;  %s11257_s6 = inlined_call_operand.hbm [shape: f32[1,128], index: 6, kind: input, shape index: {}]   ;;  %s11258_s7 = inlined_call_operand.hbm [shape: f32[16,128], index: 7, kind: output, shape index: {}]  }
   0x1   :  { %13 = vsyncpa [#allocation9], 0 }
   0x2   :  { %14 = vsyncpa [#allocation12], 0 }
   0x3   :  { %15 = vsyncpa [#allocation15], 0 }
   0x4   :  { %16 = vsyncpa [#allocation7], 0  ;;  %s9829_s24 = smov [#allocation8]   ;;  %s9665_s28 = scalar_lea.hbm %s11253_s2, 64 }
   0x5   :  { %s36_s25 = sshll.u32 %s9829_s24, 4  ;;  %p9666_p0 = scmp.ne.s32.totalorder %s11253_s2, %s9665_s28  ;;  %s37_s25 = int_to_ptr.vmem [resolvable:$true] %s36_s25 }
   0x6   :  { %p9669_p1 = scmp.lt.u32.totalorder %s9665_s28, %s11253_s2 }
   0x8   :  { %p9671_p2 = pnand %p9669_p1, %p9666_p0 }
   0xa   :  { %9674 = shalt.err (!%p9671_p2)
}
   0xb   :  { %s9675_s10 = scalar_lea.vmem %s37_s25, 64  ;;  %p9680_p4 = scmp.lt.s32.totalorder %s37_s25, %s37_s25 }
   0xc   :  { %p9676_p3 = scmp.ne.s32.totalorder %s37_s25, %s9675_s10  ;;  %p9681_p5 = scmp.lt.s32.totalorder %s9675_s10, %s9675_s10 }
   0xe   :  { %p9682_p6 = por %p9681_p5, %p9680_p4 }
  0x10   :  { %p9683_p7 = pnand %p9682_p6, %p9676_p3 }
  0x12   :  { %9686 = shalt.err (!%p9683_p7)
}
  0x13   :  { %s9830_s11 = smov 16   ;;  %s9831_s12 = smov 1  }
  0x14   :  { %42 = dma.hbm_to_vmem [thread:$0]  %s11253_s2, 64, %s37_s25, [#allocation9], %s9830_s11, %s9830_s11, %s9831_s12  }
  0x15   :  { %s9832_s15 = smov [#allocation11]   ;;  %s9833_s17 = smov [#allocation5]  }
  0x16   :  { %s60_s16 = sshll.u32 %s9832_s15, 4  ;;  %s24_s18 = sshll.u32 %s9833_s17, 4  ;;  %s61_s16 = int_to_ptr.vmem [resolvable:$true] %s60_s16  ;;  %s25_s18 = int_to_ptr.vmem [resolvable:$true] %s24_s18 }
  0x17   :  { %s9687_s21 = scalar_lea.hbm %s11255_s4, 64 }
  0x18   :  { %p9688_p8 = scmp.ne.s32.totalorder %s11255_s4, %s9687_s21  ;;  %p9691_p9 = scmp.lt.u32.totalorder %s9687_s21, %s11255_s4 }
  0x1a   :  { %p9693_p10 = pnand %p9691_p9, %p9688_p8 }
  0x1c   :  { %9696 = shalt.err (!%p9693_p10)
}
  0x1d   :  { %s9697_s2 = scalar_lea.vmem %s61_s16, 64  ;;  %p9702_p12 = scmp.lt.s32.totalorder %s61_s16, %s61_s16 }
  0x1e   :  { %p9698_p11 = scmp.ne.s32.totalorder %s61_s16, %s9697_s2  ;;  %p9703_p13 = scmp.lt.s32.totalorder %s9697_s2, %s9697_s2 }
  0x20   :  { %p9704_p0 = por %p9703_p13, %p9702_p12 }
  0x22   :  { %p9705_p1 = pnand %p9704_p0, %p9698_p11 }
  0x24   :  { %9708 = shalt.err (!%p9705_p1)
}
  0x25   :  { %66 = dma.hbm_to_vmem [thread:$0]  %s11255_s4, 64, %s61_s16, [#allocation12], %s9830_s11, %s9830_s11, %s9831_s12  }
  0x26   :  { %s9709_s30 = scalar_lea.hbm %s11252_s1, 36864 }
  0x27   :  { %p9710_p2 = scmp.ne.s32.totalorder %s11252_s1, %s9709_s30  ;;  %p9713_p3 = scmp.lt.u32.totalorder %s9709_s30, %s11252_s1 }
  0x29   :  { %p9715_p4 = pnand %p9713_p3, %p9710_p2 }
  0x2b   :  { %9718 = shalt.err (!%p9715_p4)
}
  0x2c   :  { %s9719_s14 = scalar_lea.vmem %s25_s18, 36864  ;;  %p9724_p6 = scmp.lt.s32.totalorder %s25_s18, %s25_s18 }
  0x2d   :  { %p9720_p5 = scmp.ne.s32.totalorder %s25_s18, %s9719_s14  ;;  %p9725_p7 = scmp.lt.s32.totalorder %s9719_s14, %s9719_s14 }
  0x2f   :  { %p9726_p8 = por %p9725_p7, %p9724_p6 }
  0x31   :  { %p9727_p9 = pnand %p9726_p8, %p9720_p5 }
  0x33   :  { %9730 = shalt.err (!%p9727_p9)
}
  0x34   :  { %s9834_s4 = smov 64   ;;  %s9835_s15 = smov 4  }
  0x35   :  { %30 = dma.hbm_to_vmem [thread:$0]  %s11252_s1, 36864, %s25_s18, [#allocation6], %s9834_s4, %s9834_s4, %s9835_s15  }
  0x36   :  { %s9836_s19 = smov [#allocation10]   ;;  %s9837_s21 = smov [#allocation13]  }
  0x37   :  { %s48_s20 = sshll.u32 %s9836_s19, 4  ;;  %s72_s22 = sshll.u32 %s9837_s21, 4  ;;  %s49_s20 = int_to_ptr.vmem [resolvable:$true] %s48_s20  ;;  %s73_s22 = int_to_ptr.vmem [resolvable:$true] %s72_s22 }
  0x38   :  { %s9731_s26 = scalar_lea.hbm %s11254_s3, 64 }
  0x39   :  { %p9732_p10 = scmp.ne.s32.totalorder %s11254_s3, %s9731_s26  ;;  %p9735_p11 = scmp.lt.u32.totalorder %s9731_s26, %s11254_s3 }
  0x3b   :  { %p9737_p12 = pnand %p9735_p11, %p9732_p10 }
  0x3d   :  { %9740 = shalt.err (!%p9737_p12)
}
  0x3e   :  { %s9741_s1 = scalar_lea.vmem %s49_s20, 64  ;;  %p9746_p0 = scmp.lt.s32.totalorder %s49_s20, %s49_s20 }
  0x3f   :  { %p9742_p13 = scmp.ne.s32.totalorder %s49_s20, %s9741_s1  ;;  %p9747_p1 = scmp.lt.s32.totalorder %s9741_s1, %s9741_s1 }
  0x41   :  { %p9748_p2 = por %p9747_p1, %p9746_p0 }
  0x43   :  { %p9749_p3 = pnand %p9748_p2, %p9742_p13 }
  0x45   :  { %9752 = shalt.err (!%p9749_p3)
}
  0x46   :  { %54 = dma.hbm_to_vmem [thread:$0]  %s11254_s3, 64, %s49_s20, [#allocation9], %s9830_s11, %s9830_s11, %s9831_s12  }
  0x47   :  { %s9753_s9 = scalar_lea.hbm %s11256_s5, 1024 }
  0x48   :  { %p9754_p4 = scmp.ne.s32.totalorder %s11256_s5, %s9753_s9  ;;  %p9757_p5 = scmp.lt.u32.totalorder %s9753_s9, %s11256_s5 }
  0x4a   :  { %p9759_p6 = pnand %p9757_p5, %p9754_p4 }
  0x4c   :  { %9762 = shalt.err (!%p9759_p6)
}
  0x4d   :  { %s9763_s17 = scalar_lea.vmem %s73_s22, 1024  ;;  %p9768_p8 = scmp.lt.s32.totalorder %s73_s22, %s73_s22 }
  0x4e   :  { %p9764_p7 = scmp.ne.s32.totalorder %s73_s22, %s9763_s17  ;;  %p9769_p9 = scmp.lt.s32.totalorder %s9763_s17, %s9763_s17 }
  0x50   :  { %p9770_p10 = por %p9769_p9, %p9768_p8 }
  0x52   :  { %p9771_p11 = pnand %p9770_p10, %p9764_p7 }
  0x54   :  { %9774 = shalt.err (!%p9771_p11)
}
  0x55   :  { %78 = dma.hbm_to_vmem [thread:$0]  %s11256_s5, 1024, %s73_s22, [#allocation12], %s9834_s4, %s9834_s4, %s9835_s15  }
  0x56   :  { %s9838_s12 = smov [#allocation14]   ;;  %s9775_s23 = scalar_lea.hbm %s11257_s6, 16 }
  0x57   :  { %s85_s19 = sshll.u32 %s9838_s12, 4  ;;  %p9776_p12 = scmp.ne.s32.totalorder %s11257_s6, %s9775_s23  ;;  %s86_s19 = int_to_ptr.vmem [resolvable:$true] %s85_s19 }
  0x58   :  { %p9779_p13 = scmp.lt.u32.totalorder %s9775_s23, %s11257_s6 }
  0x5a   :  { %p9781_p0 = pnand %p9779_p13, %p9776_p12 }
  0x5c   :  { %9784 = shalt.err (!%p9781_p0)
}
  0x5d   :  { %s9785_s27 = scalar_lea.vmem %s86_s19, 16  ;;  %s9789_s5 = scalar_lea.vmem %s86_s19, 32 }
  0x5e   :  { %p9786_p1 = scmp.ne.s32.totalorder %s86_s19, %s9785_s27  ;;  %p9790_p2 = scmp.lt.s32.totalorder %s86_s19, %s86_s19 }
  0x5f   :  { %p9791_p3 = scmp.lt.s32.totalorder %s9789_s5, %s9785_s27 }
  0x61   :  { %p9792_p4 = por %p9791_p3, %p9790_p2 }
  0x63   :  { %p9793_p5 = pnand %p9792_p4, %p9786_p1 }
  0x65   :  { %9796 = shalt.err (!%p9793_p5)
}
  0x66   :  { %88 = dma.hbm_to_vmem [thread:$0]  %s11257_s6, 16, %s86_s19, [#allocation15]  }
  0x67   :  { %9819 = dma.done.wait [#allocation6], 36864  }
  0x68   :  { %9820 = vsyncadd [#allocation6], 4294930432 }
  0x69   :  { %9821 = dma.done.wait [#allocation9], 128  }
  0x6a   :  { %9822 = vsyncadd [#allocation9], 4294967168 }
  0x6b   :  { %9823 = dma.done.wait [#allocation12], 1088  }
  0x6c   :  { %9824 = vsyncadd [#allocation12], 4294966208 }
  0x6d   :  { %9825 = dma.done.wait [#allocation15], 16  }
  0x6e   :  { %9826 = vsyncadd [#allocation15], 4294967280  ;;  %v9839_v0 = vmov 0.0   ;;  %v9358_v1 = vld [vmem:[#allocation5 + $0x40] sm:$0xff]   ;;  %v9359_v2 = vld [vmem:[#allocation5 + $0x48] sm:$0xff]   ;;  %vm9840_vm0 = vmmov 0  }
  0x6f   :  { %126 = vst [vmem:[#allocation2 + $0x90] sm:$0xff] %v9839_v0  ;;  %108 = vst [vmem:[#allocation2] sm:$0xff] %v9839_v0  ;;  %7963 = vmatprep.subr.bf16.mxu0 %v9358_v1  ;;  %v9360_v3 = vld [vmem:[#allocation5 + $0x50] sm:$0xff]   ;;  %v9361_v4 = vld [vmem:[#allocation5 + $0x58] sm:$0xff]  }
  0x70   :  { %109 = vst [vmem:[#allocation2 + $0x8] sm:$0x3] %v9839_v0  ;;  %110 = vst [vmem:[#allocation2 + $0x10] sm:$0xff] %v9839_v0  ;;  %7964 = vmatpush3.bf16.msra.mxu0 %v9358_v1  ;;  %v252_v5 = vld [vmem:[%s11251_s0 + $0x1] sm:$0xff]  ;;  %v253_v6 = vld [vmem:[%s11251_s0 + $0x9] sm:$0xff] }
  0x71   :  { %111 = vst [vmem:[#allocation2 + $0x18] sm:$0x3] %v9839_v0  ;;  %112 = vst [vmem:[#allocation2 + $0x20] sm:$0xff] %v9839_v0  ;;  %7965 = vmatprep.subr.bf16.mxu0 %v9359_v2  ;;  %v284_v7 = vpack.c.bf16 %v253_v6, %v252_v5  ;;  %v9362_v8 = vld [vmem:[#allocation5 + $0x60] sm:$0xff]   ;;  %v9363_v9 = vld [vmem:[#allocation5 + $0x68] sm:$0xff]  }
  0x72   :  { %113 = vst [vmem:[#allocation2 + $0x28] sm:$0x3] %v9839_v0  ;;  %114 = vst [vmem:[#allocation2 + $0x30] sm:$0xff] %v9839_v0  ;;  %v9364_v10 = vld [vmem:[#allocation5 + $0x70] sm:$0xff]   ;;  %v9365_v11 = vld [vmem:[#allocation5 + $0x78] sm:$0xff]  }
  0x73   :  { %115 = vst [vmem:[#allocation2 + $0x38] sm:$0x3] %v9839_v0  ;;  %116 = vst [vmem:[#allocation2 + $0x40] sm:$0xff] %v9839_v0  ;;  %7979 = vmatprep.mubr.bf16.mxu0 %v284_v7  ;;  %v254_v12 = vld [vmem:[%s11251_s0 + $0x31] sm:$0xff]  ;;  %v255_v13 = vld [vmem:[%s11251_s0 + $0x39] sm:$0xff] }
  0x74   :  { %117 = vst [vmem:[#allocation2 + $0x48] sm:$0x3] %v9839_v0  ;;  %118 = vst [vmem:[#allocation2 + $0x50] sm:$0xff] %v9839_v0  ;;  %7966 = vmatpush3.bf16.msra.mxu0 %v9359_v2  ;;  %v9366_v14 = vld [vmem:[#allocation5] sm:$0xff]   ;;  %v257_v16 = vld [vmem:[%s11251_s0 + $0x69] sm:$0xff]  ;;  %v285_v17 = vpack.c.bf16 %v255_v13, %v254_v12 }
  0x75   :  { %119 = vst [vmem:[#allocation2 + $0x58] sm:$0x3] %v9839_v0  ;;  %120 = vst [vmem:[#allocation2 + $0x60] sm:$0xff] %v9839_v0  ;;  %7967 = vmatprep.subr.bf16.mxu0 %v9360_v3  ;;  %v256_v15 = vld [vmem:[%s11251_s0 + $0x61] sm:$0xff]  ;;  %v258_v20 = vld [vmem:[%s11251_s0 + $0x91] sm:$0xff] }
  0x76   :  { %121 = vst [vmem:[#allocation2 + $0x68] sm:$0x3] %v9839_v0  ;;  %122 = vst [vmem:[#allocation2 + $0x70] sm:$0xff] %v9839_v0  ;;  %v286_v18 = vpack.c.bf16 %v257_v16, %v256_v15  ;;  %v9367_v19 = vld [vmem:[#allocation5 + $0x8] sm:$0xff]   ;;  %v259_v21 = vld [vmem:[%s11251_s0 + $0x99] sm:$0xff] }
  0x77   :  { %123 = vst [vmem:[#allocation2 + $0x78] sm:$0x3] %v9839_v0  ;;  %124 = vst [vmem:[#allocation2 + $0x80] sm:$0xff] %v9839_v0  ;;  %v260_v22 = vld [vmem:[%s11251_s0 + $0xc1] sm:$0xff]  ;;  %v261_v23 = vld [vmem:[%s11251_s0 + $0xc9] sm:$0xff]  ;;  %v287_v25 = vpack.c.bf16 %v259_v21, %v258_v20 }
  0x78   :  { %125 = vst [vmem:[#allocation2 + $0x88] sm:$0x3] %v9839_v0  ;;  %128 = vst [vmem:[#allocation2 + $0xa0] sm:$0xff] %v9839_v0  ;;  %7968 = vmatpush3.bf16.msra.mxu0 %v9360_v3  ;;  %v9368_v24 = vld [vmem:[#allocation5 + $0x10] sm:$0xff]   ;;  %v288_v26 = vpack.c.bf16 %v261_v23, %v260_v22  ;;  %v9369_v27 = vld [vmem:[#allocation5 + $0x18] sm:$0xff]  }
  0x79   :  { %129 = vst [vmem:[#allocation2 + $0xa8] sm:$0x3] %v9839_v0  ;;  %130 = vst [vmem:[#allocation2 + $0xb0] sm:$0xff] %v9839_v0  ;;  %7969 = vmatprep.subr.bf16.mxu0 %v9361_v4  ;;  %v262_v28 = vld [vmem:[%s11251_s0 + $0xf1] sm:$0xff]  ;;  %v263_v29 = vld [vmem:[%s11251_s0 + $0xf9] sm:$0xff] }
  0x7a   :  { %131 = vst [vmem:[#allocation2 + $0xb8] sm:$0x3] %v9839_v0  ;;  %132 = vst [vmem:[#allocation2 + $0xc0] sm:$0xff] %v9839_v0  ;;  %v264_v30 = vld [vmem:[%s11251_s0 + $0x121] sm:$0xff]  ;;  %v265_v31 = vld [vmem:[%s11251_s0 + $0x129] sm:$0xff]  ;;  %v289_v33 = vpack.c.bf16 %v263_v29, %v262_v28 }
  0x7b   :  { %133 = vst [vmem:[#allocation2 + $0xc8] sm:$0x3] %v9839_v0  ;;  %134 = vst [vmem:[#allocation2 + $0xd0] sm:$0xff] %v9839_v0  ;;  %v9370_v32 = vld [vmem:[#allocation5 + $0x20] sm:$0xff]   ;;  %v290_v34 = vpack.c.bf16 %v265_v31, %v264_v30  ;;  %v9371_v35 = vld [vmem:[#allocation5 + $0x28] sm:$0xff]  }
  0x7c   :  { %135 = vst [vmem:[#allocation2 + $0xd8] sm:$0x3] %v9839_v0  ;;  %136 = vst [vmem:[#allocation2 + $0xe0] sm:$0xff] %v9839_v0  ;;  %7970 = vmatpush3.bf16.msra.mxu0 %v9361_v4  ;;  %v266_v36 = vld [vmem:[%s11251_s0 + $0x151] sm:$0xff]  ;;  %v267_v37 = vld [vmem:[%s11251_s0 + $0x159] sm:$0xff] }
  0x7d   :  { %137 = vst [vmem:[#allocation2 + $0xe8] sm:$0x3] %v9839_v0  ;;  %138 = vst [vmem:[#allocation2 + $0xf0] sm:$0xff] %v9839_v0  ;;  %7971 = vmatprep.subr.bf16.mxu0 %v9362_v8  ;;  %v268_v38 = vld [vmem:[%s11251_s0 + $0x1b1] sm:$0xff]  ;;  %v269_v39 = vld [vmem:[%s11251_s0 + $0x1b9] sm:$0xff]  ;;  %v291_v41 = vpack.c.bf16 %v267_v37, %v266_v36 }
  0x7e   :  { %139 = vst [vmem:[#allocation2 + $0xf8] sm:$0x3] %v9839_v0  ;;  %140 = vst [vmem:[#allocation2 + $0x100] sm:$0xff] %v9839_v0  ;;  %v9372_v40 = vld [vmem:[#allocation5 + $0x30] sm:$0xff]   ;;  %v9373_v42 = vld [vmem:[#allocation5 + $0x38] sm:$0xff]   ;;  %v292_v43 = vpack.c.bf16 %v269_v39, %v268_v38 }
  0x7f   :  { %141 = vst [vmem:[#allocation2 + $0x108] sm:$0x3] %v9839_v0  ;;  %142 = vst [vmem:[#allocation2 + $0x110] sm:$0xff] %v9839_v0  ;;  %v270_v44 = vld [vmem:[%s11251_s0 + $0x1e1] sm:$0xff]  ;;  %v271_v45 = vld [vmem:[%s11251_s0 + $0x1e9] sm:$0xff] }
  0x80   :  { %143 = vst [vmem:[#allocation2 + $0x118] sm:$0x3] %v9839_v0  ;;  %144 = vst [vmem:[#allocation2 + $0x120] sm:$0xff] %v9839_v0  ;;  %7972 = vmatpush3.bf16.msra.mxu0 %v9362_v8  ;;  %v272_v46 = vld [vmem:[%s11251_s0 + $0x211] sm:$0xff]  ;;  %v273_v47 = vld [vmem:[%s11251_s0 + $0x219] sm:$0xff]  ;;  %v293_v49 = vpack.c.bf16 %v271_v45, %v270_v44 }
  0x81   :  { %145 = vst [vmem:[#allocation2 + $0x128] sm:$0x3] %v9839_v0  ;;  %148 = vst [vmem:[#allocation3] sm:$0xff] %v9839_v0  ;;  %7973 = vmatprep.subr.bf16.mxu0 %v9363_v9  ;;  %v9374_v48 = vld [vmem:[#allocation5 + $0x80] sm:$0xff]   ;;  %v294_v50 = vpack.c.bf16 %v273_v47, %v272_v46  ;;  %v275_v52 = vld [vmem:[%s11251_s0 + $0x249] sm:$0xff] }
  0x82   :  { %149 = vst [vmem:[#allocation3 + $0x8] sm:$0x3] %v9839_v0  ;;  %150 = vst [vmem:[#allocation3 + $0x10] sm:$0xff] %v9839_v0  ;;  %v274_v51 = vld [vmem:[%s11251_s0 + $0x241] sm:$0xff]  ;;  %v276_v53 = vld [vmem:[%s11251_s0 + $0x271] sm:$0xff] }
  0x83   :  { %151 = vst [vmem:[#allocation3 + $0x18] sm:$0x3] %v9839_v0  ;;  %152 = vst [vmem:[#allocation3 + $0x20] sm:$0xff] %v9839_v0  ;;  %v277_v54 = vld [vmem:[%s11251_s0 + $0x279] sm:$0xff]  ;;  %v295_v55 = vpack.c.bf16 %v275_v52, %v274_v51  ;;  %v278_v57 = vld [vmem:[%s11251_s0 + $0x2a1] sm:$0xff] }
  0x84   :  { %153 = vst [vmem:[#allocation3 + $0x28] sm:$0x3] %v9839_v0  ;;  %154 = vst [vmem:[#allocation3 + $0x30] sm:$0xff] %v9839_v0  ;;  %7974 = vmatpush3.bf16.msra.mxu0 %v9363_v9  ;;  %v296_v56 = vpack.c.bf16 %v277_v54, %v276_v53  ;;  %v279_v58 = vld [vmem:[%s11251_s0 + $0x2a9] sm:$0xff]  ;;  %v280_v59 = vld [vmem:[%s11251_s0 + $0x2d1] sm:$0xff] }
  0x85   :  { %155 = vst [vmem:[#allocation3 + $0x38] sm:$0x3] %v9839_v0  ;;  %156 = vst [vmem:[#allocation3 + $0x40] sm:$0xff] %v9839_v0  ;;  %7975 = vmatprep.subr.bf16.mxu0 %v9364_v10  ;;  %v281_v60 = vld [vmem:[%s11251_s0 + $0x2d9] sm:$0xff]  ;;  %v297_v61 = vpack.c.bf16 %v279_v58, %v278_v57  ;;  %v282_v63 = vld [vmem:[%s11251_s0 + $0x301] sm:$0xff] }
  0x86   :  { %157 = vst [vmem:[#allocation3 + $0x48] sm:$0x3] %v9839_v0  ;;  %160 = vst [vmem:[#allocation3 + $0x60] sm:$0xff] %v9839_v0  ;;  %v298_v62 = vpack.c.bf16 %v281_v60, %v280_v59  ;;  %v188_v1 = vld [vmem:[%s11251_s0] sm:$0xff]  ;;  %v189_v2 = vld [vmem:[%s11251_s0 + $0x8] sm:$0xff] }
  0x87   :  { %161 = vst [vmem:[#allocation3 + $0x68] sm:$0x3] %v9839_v0  ;;  %162 = vst [vmem:[#allocation3 + $0x70] sm:$0xff] %v9839_v0  ;;  %v220_v4 = vpack.c.bf16 %v189_v2, %v188_v1  ;;  %v190_v5 = vld [vmem:[%s11251_s0 + $0x30] sm:$0xff]  ;;  %v191_v6 = vld [vmem:[%s11251_s0 + $0x38] sm:$0xff] }
  0x88   :  { %163 = vst [vmem:[#allocation3 + $0x78] sm:$0x3] %v9839_v0  ;;  %164 = vst [vmem:[#allocation3 + $0x80] sm:$0xff] %v9839_v0  ;;  %7976 = vmatpush3.bf16.msra.mxu0 %v9364_v10  ;;  %v192_v7 = vld [vmem:[%s11251_s0 + $0x60] sm:$0xff]  ;;  %v193_v8 = vld [vmem:[%s11251_s0 + $0x68] sm:$0xff]  ;;  %v221_v9 = vpack.c.bf16 %v191_v6, %v190_v5 }
  0x89   :  { %165 = vst [vmem:[#allocation3 + $0x88] sm:$0x3] %v9839_v0  ;;  %166 = vst [vmem:[#allocation3 + $0x90] sm:$0xff] %v9839_v0  ;;  %7977 = vmatprep.subr.bf16.mxu0 %v9365_v11  ;;  %v9375_v10 = vld [vmem:[#allocation5 + $0x88] sm:$0xff]   ;;  %v194_v12 = vld [vmem:[%s11251_s0 + $0x90] sm:$0xff] }
  0x8a   :  { %167 = vst [vmem:[#allocation3 + $0x98] sm:$0x3] %v9839_v0  ;;  %168 = vst [vmem:[#allocation3 + $0xa0] sm:$0xff] %v9839_v0  ;;  %v195_v13 = vld [vmem:[%s11251_s0 + $0x98] sm:$0xff]  ;;  %v197_v15 = vld [vmem:[%s11251_s0 + $0xc8] sm:$0xff] }
  0x8b   :  { %169 = vst [vmem:[#allocation3 + $0xa8] sm:$0x3] %v9839_v0  ;;  %172 = vst [vmem:[#allocation4] sm:$0xff] %v9839_v0  ;;  %v9376_v16 = vld [vmem:[#allocation5 + $0x90] sm:$0xff]   ;;  %v199_v21 = vld [vmem:[%s11251_s0 + $0xf8] sm:$0xff] }
  0x8c   :  { %173 = vst [vmem:[#allocation4 + $0x8] sm:$0x3] %v9839_v0  ;;  %174 = vst [vmem:[#allocation4 + $0x10] sm:$0xff] %v9839_v0  ;;  %7978 = vmatpush3.bf16.msra.mxu0 %v9365_v11  ;;  %v10154_v11 = vpack.c.bf16 %v193_v8, %v192_v7  ;;  %v198_v20 = vld [vmem:[%s11251_s0 + $0xf0] sm:$0xff]  ;;  %v200_v22 = vld [vmem:[%s11251_s0 + $0x120] sm:$0xff] }
  0x8d   :  { %175 = vst [vmem:[#allocation4 + $0x18] sm:$0x3] %v9839_v0  ;;  %176 = vst [vmem:[#allocation4 + $0x20] sm:$0xff] %v9839_v0  ;;  %8011 = vmatprep.subr.bf16.mxu0 %v9366_v14  ;;  %v201_v23 = vld [vmem:[%s11251_s0 + $0x128] sm:$0xff]  ;;  %v202_v28 = vld [vmem:[%s11251_s0 + $0x150] sm:$0xff] }
  0x8e   :  { %177 = vst [vmem:[#allocation4 + $0x28] sm:$0x3] %v9839_v0  ;;  %180 = vst [vmem:[#allocation4 + $0x40] sm:$0xff] %v9839_v0  ;;  %v203_v29 = vld [vmem:[%s11251_s0 + $0x158] sm:$0xff]  ;;  %v204_v30 = vld [vmem:[%s11251_s0 + $0x1b0] sm:$0xff] }
  0x8f   :  { %181 = vst [vmem:[#allocation4 + $0x48] sm:$0x3] %v9839_v0  ;;  %182 = vst [vmem:[#allocation4 + $0x50] sm:$0xff] %v9839_v0  ;;  %7980 = vmatmul.mubr.bf16.vlgmr.msra.gmra.mrb[0].mxu0 %v285_v17  ;;  %v223_v17 = vpack.c.bf16 %v195_v13, %v194_v12  ;;  %v205_v31 = vld [vmem:[%s11251_s0 + $0x1b8] sm:$0xff]  ;;  %v206_v36 = vld [vmem:[%s11251_s0 + $0x1e0] sm:$0xff] }
  0x90   :  { %183 = vst [vmem:[#allocation4 + $0x58] sm:$0x3] %v9839_v0  ;;  %184 = vst [vmem:[#allocation4 + $0x60] sm:$0xff] %v9839_v0  ;;  %8012 = vmatpush3.bf16.msra.mxu0 %v9366_v14  ;;  %7983 = vmatprep.mubr.bf16.mxu0 %v286_v18  ;;  %v196_v14 = vld [vmem:[%s11251_s0 + $0xc0] sm:$0xff]  ;;  %v9377_v18 = vld [vmem:[#allocation5 + $0x98] sm:$0xff]  }
  0x91   :  { %185 = vst [vmem:[#allocation4 + $0x68] sm:$0x3] %v9839_v0  ;;  %8013 = vmatprep.subr.bf16.mxu0 %v9367_v19  ;;  %v283_v0 = vld [vmem:[%s11251_s0 + $0x309] sm:$0xff]  ;;  %v209_v39 = vld [vmem:[%s11251_s0 + $0x218] sm:$0xff] }
  0x92   :  { %v299_v3 = vpack.c.bf16 %v283_v0, %v282_v63  ;;  %v207_v37 = vld [vmem:[%s11251_s0 + $0x1e8] sm:$0xff]  ;;  %v208_v38 = vld [vmem:[%s11251_s0 + $0x210] sm:$0xff]  ;;  %v213_v46 = vld [vmem:[%s11251_s0 + $0x278] sm:$0xff] }
  0x93   :  { %v211_v44 = vld [vmem:[%s11251_s0 + $0x248] sm:$0xff]  ;;  %v212_v45 = vld [vmem:[%s11251_s0 + $0x270] sm:$0xff]  ;;  %v217_v52 = vld [vmem:[%s11251_s0 + $0x2d8] sm:$0xff] }
  0x94   :  { %8014 = vmatpush3.bf16.msra.mxu0 %v9367_v19  ;;  %v10169_v19 = vpack.c.bf16 %v197_v15, %v196_v14  ;;  %v216_v51 = vld [vmem:[%s11251_s0 + $0x2d0] sm:$0xff]  ;;  %v735_v57 = vld [vmem:[%s11251_s0 + $0x2] sm:$0xff]  ;;  %v742_v5 = vld [vmem:[%s11251_s0 + $0x9a] sm:$0xff] }
  0x95   :  { %8015 = vmatprep.subr.bf16.mxu0 %v9368_v24  ;;  %v10241_v54 = vpack.c.bf16 %v217_v52, %v216_v51  ;;  %v736_v58 = vld [vmem:[%s11251_s0 + $0xa] sm:$0xff]  ;;  %v739_v63 = vld [vmem:[%s11251_s0 + $0x62] sm:$0xff]  ;;  %v745_v13 = vld [vmem:[%s11251_s0 + $0xf2] sm:$0xff] }
  0x96   :  { %v767_v60 = vpack.c.bf16 %v736_v58, %v735_v57  ;;  %v740_v0 = vld [vmem:[%s11251_s0 + $0x6a] sm:$0xff]  ;;  %v743_v6 = vld [vmem:[%s11251_s0 + $0xc2] sm:$0xff]  ;;  %v746_v14 = vld [vmem:[%s11251_s0 + $0xfa] sm:$0xff] }
  0x97   :  { %7984 = vmatmul.mubr.bf16.gmra.mrb[4].mxu0 %v287_v25  ;;  %v225_v25 = vpack.c.bf16 %v199_v21, %v198_v20  ;;  %v9383_v2 = vld [vmem:[#allocation5 + $0xc8] sm:$0xff]   ;;  %v9384_v8 = vld [vmem:[#allocation5 + $0xd0] sm:$0xff]  }
  0x98   :  { %7987 = vmatprep.mubr.bf16.mxu0 %v288_v26  ;;  %8016 = vmatpush3.bf16.msra.mxu0 %v9368_v24  ;;  %v9378_v24 = vld [vmem:[#allocation5 + $0xa0] sm:$0xff]   ;;  %v9379_v26 = vld [vmem:[#allocation5 + $0xa8] sm:$0xff]  }
  0x99   :  { %8017 = vmatprep.subr.bf16.mxu0 %v9369_v27  ;;  %v744_v7 = vld [vmem:[%s11251_s0 + $0xca] sm:$0xff]  ;;  %v747_v15 = vld [vmem:[%s11251_s0 + $0x122] sm:$0xff] }
  0x9a   :  { %v771_v12 = vpack.c.bf16 %v744_v7, %v743_v6  ;;  %v9387_v20 = vld [vmem:[#allocation5 + $0xe8] sm:$0xff]   ;;  %v9392_v6 = vld [vmem:[#allocation5 + $0x110] sm:$0xff]  }
  0x9b   :  { %v765_v52 = vld [vmem:[%s11251_s0 + $0x302] sm:$0xff] }
  0x9c   :  { %8018 = vmatpush3.bf16.msra.mxu0 %v9369_v27  ;;  %v10184_v27 = vpack.c.bf16 %v201_v23, %v200_v22  ;;  %v749_v22 = vld [vmem:[%s11251_s0 + $0x152] sm:$0xff]  ;;  %v750_v23 = vld [vmem:[%s11251_s0 + $0x15a] sm:$0xff] }
  0x9d   :  { %8019 = vmatprep.subr.bf16.mxu0 %v9370_v32 }
  0x9f   :  { %7988 = vmatmul.mubr.bf16.gmra.mrb[8].mxu0 %v289_v33  ;;  %v227_v33 = vpack.c.bf16 %v203_v29, %v202_v28  ;;  %v774_v28 = vpack.c.bf16 %v750_v23, %v749_v22  ;;  %v9389_v29 = vld [vmem:[#allocation5 + $0xf8] sm:$0xff]   ;;  %v6998_v22 = vld [vmem:[%s11251_s0 + $0x1c8] sm:$0xff]  ;;  %v6999_v23 = vld [vmem:[%s11251_s0 + $0x1d0] sm:$0xff] }
  0xa0   :  { %7991 = vmatprep.mubr.bf16.mxu0 %v290_v34  ;;  %8020 = vmatpush3.bf16.msra.mxu0 %v9370_v32  ;;  %v9380_v32 = vld [vmem:[#allocation5 + $0xb0] sm:$0xff]   ;;  %v9381_v34 = vld [vmem:[#allocation5 + $0xb8] sm:$0xff]  }
  0xa1   :  { %8021 = vmatprep.subr.bf16.mxu0 %v9371_v35 }
  0xa4   :  { %8022 = vmatpush3.bf16.msra.mxu0 %v9371_v35  ;;  %v228_v35 = vpack.c.bf16 %v205_v31, %v204_v30  ;;  %v753_v31 = vld [vmem:[%s11251_s0 + $0x1e2] sm:$0xff] }
  0xa5   :  { %8023 = vmatprep.subr.bf16.mxu0 %v9372_v40 }
  0xa7   :  { %7992 = vmatmul.mubr.bf16.gmra.mrb[12].mxu0 %v291_v41  ;;  %v229_v41 = vpack.c.bf16 %v207_v37, %v206_v36 }
  0xa8   :  { %7995 = vmatprep.mubr.bf16.mxu0 %v292_v43  ;;  %8024 = vmatpush3.bf16.msra.mxu0 %v9372_v40  ;;  %v9382_v40 = vld [vmem:[#allocation5 + $0xc0] sm:$0xff]  }
  0xa9   :  { %8025 = vmatprep.subr.bf16.mxu0 %v9373_v42  ;;  %v210_v43 = vld [vmem:[%s11251_s0 + $0x240] sm:$0xff] }
  0xaa   :  { %v231_v47 = vpack.c.bf16 %v211_v44, %v210_v43 }
  0xac   :  { %8026 = vmatpush3.bf16.msra.mxu0 %v9373_v42  ;;  %v10211_v42 = vpack.c.bf16 %v209_v39, %v208_v38  ;;  %v757_v38 = vld [vmem:[%s11251_s0 + $0x242] sm:$0xff]  ;;  %v758_v39 = vld [vmem:[%s11251_s0 + $0x24a] sm:$0xff] }
  0xad   :  { %8059 = vmatprep.subr.bf16.mxu0 %v9374_v48  ;;  %v778_v43 = vpack.c.bf16 %v758_v39, %v757_v38  ;;  %v7006_v38 = vld [vmem:[%s11251_s0 + $0x288] sm:$0xff]  ;;  %v7007_v39 = vld [vmem:[%s11251_s0 + $0x290] sm:$0xff] }
  0xaf   :  { %7996 = vmatmul.mubr.bf16.gmra.mrb[16].mxu0 %v293_v49  ;;  %v214_v49 = vld [vmem:[%s11251_s0 + $0x2a0] sm:$0xff] }
  0xb0   :  { %7999 = vmatprep.mubr.bf16.mxu0 %v294_v50  ;;  %v215_v50 = vld [vmem:[%s11251_s0 + $0x2a8] sm:$0xff] }
  0xb1   :  { %v233_v53 = vpack.c.bf16 %v215_v50, %v214_v49  ;;  %v764_v49 = vld [vmem:[%s11251_s0 + $0x2da] sm:$0xff] }
  0xb7   :  { %8000 = vmatmul.mubr.bf16.gmra.mrb[20].mxu0 %v295_v55  ;;  %v218_v55 = vld [vmem:[%s11251_s0 + $0x300] sm:$0xff] }
  0xb8   :  { %8003 = vmatprep.mubr.bf16.mxu0 %v296_v56  ;;  %v219_v56 = vld [vmem:[%s11251_s0 + $0x308] sm:$0xff] }
  0xb9   :  { %v235_v59 = vpack.c.bf16 %v219_v56, %v218_v55  ;;  %v6982_v55 = vld [vmem:[%s11251_s0 + $0x18] sm:$0xff]  ;;  %v6983_v56 = vld [vmem:[%s11251_s0 + $0x20] sm:$0xff] }
  0xba   :  { %v1074_v58 = vpack.c.bf16 %v6983_v56, %v6982_v55 }
  0xbf   :  { %8004 = vmatmul.mubr.bf16.gmra.mrb[24].mxu0 %v297_v61  ;;  %v737_v61 = vld [vmem:[%s11251_s0 + $0x32] sm:$0xff] }
  0xc0   :  { %8007 = vmatprep.mubr.bf16.mxu0 %v298_v62  ;;  %v738_v62 = vld [vmem:[%s11251_s0 + $0x3a] sm:$0xff] }
  0xc1   :  { %v768_v1 = vpack.c.bf16 %v738_v62, %v737_v61  ;;  %v6986_v61 = vld [vmem:[%s11251_s0 + $0x78] sm:$0xff]  ;;  %v6987_v62 = vld [vmem:[%s11251_s0 + $0x80] sm:$0xff] }
  0xc7   :  { %8008 = vmatmul.mubr.bf16.gmra.mrb[28].mxu0 %v299_v3  ;;  %v769_v3 = vpack.c.bf16 %v740_v0, %v739_v63  ;;  %v9391_v0 = vld [vmem:[#allocation5 + $0x108] sm:$0xff]  }
  0xc8   :  { %8027 = vmatprep.mubr.bf16.mxu0 %v220_v4  ;;  %v741_v4 = vld [vmem:[%s11251_s0 + $0x92] sm:$0xff] }
  0xcf   :  { %8028 = vmatmul.mubr.bf16.vlgmr.msra.gmra.mrb[0].mxu0 %v221_v9  ;;  %v770_v9 = vpack.c.bf16 %v742_v5, %v741_v4  ;;  %v6990_v4 = vld [vmem:[%s11251_s0 + $0xd8] sm:$0xff]  ;;  %v6991_v5 = vld [vmem:[%s11251_s0 + $0xe0] sm:$0xff] }
  0xd0   :  { %8060 = vmatpush3.bf16.msra.mxu0 %v9374_v48  ;;  %8031 = vmatprep.mubr.bf16.mxu0 %v10154_v11  ;;  %v10226_v48 = vpack.c.bf16 %v213_v46, %v212_v45  ;;  %v761_v45 = vld [vmem:[%s11251_s0 + $0x2a2] sm:$0xff]  ;;  %v762_v46 = vld [vmem:[%s11251_s0 + $0x2aa] sm:$0xff] }
  0xd1   :  { %8061 = vmatprep.subr.bf16.mxu0 %v9375_v10  ;;  %v780_v50 = vpack.c.bf16 %v762_v46, %v761_v45  ;;  %v7010_v45 = vld [vmem:[%s11251_s0 + $0x2e8] sm:$0xff]  ;;  %v7011_v46 = vld [vmem:[%s11251_s0 + $0x2f0] sm:$0xff] }
  0xd4   :  { %8062 = vmatpush3.bf16.msra.mxu0 %v9375_v10  ;;  %v9385_v10 = vld [vmem:[#allocation5 + $0xd8] sm:$0xff]  }
  0xd5   :  { %8063 = vmatprep.subr.bf16.mxu0 %v9376_v16 }
  0xd7   :  { %8032 = vmatmul.mubr.bf16.gmra.mrb[4].mxu0 %v223_v17  ;;  %v9386_v17 = vld [vmem:[#allocation5 + $0xe0] sm:$0xff]  }
  0xd8   :  { %8035 = vmatprep.mubr.bf16.mxu0 %v10169_v19  ;;  %8064 = vmatpush3.bf16.msra.mxu0 %v9376_v16  ;;  %v748_v16 = vld [vmem:[%s11251_s0 + $0x12a] sm:$0xff] }
  0xd9   :  { %8065 = vmatprep.subr.bf16.mxu0 %v9377_v18  ;;  %v773_v21 = vpack.c.bf16 %v748_v16, %v747_v15  ;;  %v9394_v15 = vld [vmem:[#allocation5 + $0x120] sm:$0xff]  }
  0xdc   :  { %8066 = vmatpush3.bf16.msra.mxu0 %v9377_v18  ;;  %v772_v18 = vpack.c.bf16 %v746_v14, %v745_v13  ;;  %v6994_v13 = vld [vmem:[%s11251_s0 + $0x138] sm:$0xff]  ;;  %v6995_v14 = vld [vmem:[%s11251_s0 + $0x140] sm:$0xff] }
  0xdd   :  { %8067 = vmatprep.subr.bf16.mxu0 %v9378_v24 }
  0xdf   :  { %8036 = vmatmul.mubr.bf16.gmra.mrb[8].mxu0 %v225_v25  ;;  %v752_v25 = vld [vmem:[%s11251_s0 + $0x1ba] sm:$0xff] }
  0xe0   :  { %8039 = vmatprep.mubr.bf16.mxu0 %v10184_v27  ;;  %8068 = vmatpush3.bf16.msra.mxu0 %v9378_v24  ;;  %v751_v24 = vld [vmem:[%s11251_s0 + $0x1b2] sm:$0xff] }
  0xe1   :  { %8069 = vmatprep.subr.bf16.mxu0 %v9379_v26  ;;  %v775_v30 = vpack.c.bf16 %v752_v25, %v751_v24  ;;  %v9396_v24 = vld [vmem:[#allocation5 + $0x130] sm:$0xff]  }
  0xe4   :  { %8070 = vmatpush3.bf16.msra.mxu0 %v9379_v26  ;;  %v9388_v26 = vld [vmem:[#allocation5 + $0xf0] sm:$0xff]  }
  0xe5   :  { %8071 = vmatprep.subr.bf16.mxu0 %v9380_v32 }
  0xe7   :  { %8040 = vmatmul.mubr.bf16.gmra.mrb[12].mxu0 %v227_v33  ;;  %v755_v33 = vld [vmem:[%s11251_s0 + $0x212] sm:$0xff] }
  0xe8   :  { %8043 = vmatprep.mubr.bf16.mxu0 %v228_v35  ;;  %8072 = vmatpush3.bf16.msra.mxu0 %v9380_v32  ;;  %v754_v32 = vld [vmem:[%s11251_s0 + $0x1ea] sm:$0xff]  ;;  %v9390_v35 = vld [vmem:[#allocation5 + $0x100] sm:$0xff]  }
  0xe9   :  { %8073 = vmatprep.subr.bf16.mxu0 %v9381_v34  ;;  %v776_v36 = vpack.c.bf16 %v754_v32, %v753_v31  ;;  %v7002_v31 = vld [vmem:[%s11251_s0 + $0x228] sm:$0xff]  ;;  %v7003_v32 = vld [vmem:[%s11251_s0 + $0x230] sm:$0xff] }
  0xec   :  { %8074 = vmatpush3.bf16.msra.mxu0 %v9381_v34  ;;  %v756_v34 = vld [vmem:[%s11251_s0 + $0x21a] sm:$0xff] }
  0xed   :  { %8107 = vmatprep.subr.bf16.mxu0 %v9382_v40  ;;  %v777_v37 = vpack.c.bf16 %v756_v34, %v755_v33  ;;  %v9398_v33 = vld [vmem:[#allocation5 + $0x140] sm:$0xff]  }
  0xef   :  { %8044 = vmatmul.mubr.bf16.gmra.mrb[16].mxu0 %v229_v41  ;;  %v760_v41 = vld [vmem:[%s11251_s0 + $0x27a] sm:$0xff] }
  0xf0   :  { %8047 = vmatprep.mubr.bf16.mxu0 %v10211_v42 }
  0xf7   :  { %8048 = vmatmul.mubr.bf16.gmra.mrb[20].mxu0 %v231_v47  ;;  %v763_v47 = vld [vmem:[%s11251_s0 + $0x2d2] sm:$0xff] }
  0xf8   :  { %8051 = vmatprep.mubr.bf16.mxu0 %v10226_v48  ;;  %v781_v51 = vpack.c.bf16 %v764_v49, %v763_v47  ;;  %v1088_v49 = vpack.c.bf16 %v7011_v46, %v7010_v45 }
  0xff   :  { %8052 = vmatmul.mubr.bf16.gmra.mrb[24].mxu0 %v233_v53  ;;  %v766_v53 = vld [vmem:[%s11251_s0 + $0x30a] sm:$0xff] }
 0x100   :  { %8055 = vmatprep.mubr.bf16.mxu0 %v10241_v54  ;;  %v782_v57 = vpack.c.bf16 %v766_v53, %v765_v52  ;;  %v7022_v52 = vld [vmem:[%s11251_s0 + $0x19] sm:$0xff]  ;;  %v7023_v53 = vld [vmem:[%s11251_s0 + $0x21] sm:$0xff] }
 0x101   :  { %v1380_v56 = vpack.c.bf16 %v7023_v53, %v7022_v52 }
 0x107   :  { %8056 = vmatmul.mubr.bf16.gmra.mrb[28].mxu0 %v235_v59  ;;  %v6984_v59 = vld [vmem:[%s11251_s0 + $0x48] sm:$0xff] }
 0x108   :  { %8075 = vmatprep.mubr.bf16.mxu0 %v767_v60  ;;  %v6985_v60 = vld [vmem:[%s11251_s0 + $0x50] sm:$0xff] }
 0x109   :  { %v1075_v63 = vpack.c.bf16 %v6985_v60, %v6984_v59  ;;  %v7026_v59 = vld [vmem:[%s11251_s0 + $0x79] sm:$0xff]  ;;  %v7027_v60 = vld [vmem:[%s11251_s0 + $0x81] sm:$0xff] }
 0x10f   :  { %8076 = vmatmul.mubr.bf16.vlgmr.msra.gmra.mrb[0].mxu0 %v768_v1  ;;  %v1076_v1 = vpack.c.bf16 %v6987_v62, %v6986_v61  ;;  %v1382_v62 = vpack.c.bf16 %v7027_v60, %v7026_v59 }
 0x110   :  { %8108 = vmatpush3.bf16.msra.mxu0 %v9382_v40  ;;  %8079 = vmatprep.mubr.bf16.mxu0 %v769_v3  ;;  %v759_v40 = vld [vmem:[%s11251_s0 + $0x272] sm:$0xff] }
 0x111   :  { %8109 = vmatprep.subr.bf16.mxu0 %v9383_v2  ;;  %v779_v44 = vpack.c.bf16 %v760_v41, %v759_v40  ;;  %v6989_v3 = vld [vmem:[%s11251_s0 + $0xb0] sm:$0xff]  ;;  %v1086_v41 = vpack.c.bf16 %v7007_v39, %v7006_v38 }
 0x114   :  { %8110 = vmatpush3.bf16.msra.mxu0 %v9383_v2  ;;  %v6988_v2 = vld [vmem:[%s11251_s0 + $0xa8] sm:$0xff] }
 0x115   :  { %8111 = vmatprep.subr.bf16.mxu0 %v9384_v8  ;;  %v1077_v7 = vpack.c.bf16 %v6989_v3, %v6988_v2  ;;  %v7030_v2 = vld [vmem:[%s11251_s0 + $0xd9] sm:$0xff]  ;;  %v7031_v3 = vld [vmem:[%s11251_s0 + $0xe1] sm:$0xff] }
 0x117   :  { %8080 = vmatmul.mubr.bf16.gmra.mrb[4].mxu0 %v770_v9  ;;  %v1078_v9 = vpack.c.bf16 %v6991_v5, %v6990_v4  ;;  %v9400_v4 = vld [vmem:[#allocation5 + $0x150] sm:$0xff]  }
 0x118   :  { %8083 = vmatprep.mubr.bf16.mxu0 %v771_v12  ;;  %8112 = vmatpush3.bf16.msra.mxu0 %v9384_v8  ;;  %v9393_v8 = vld [vmem:[#allocation5 + $0x118] sm:$0xff]   ;;  %v6993_v12 = vld [vmem:[%s11251_s0 + $0x110] sm:$0xff] }
 0x119   :  { %8113 = vmatprep.subr.bf16.mxu0 %v9385_v10 }
 0x11c   :  { %8114 = vmatpush3.bf16.msra.mxu0 %v9385_v10  ;;  %v6992_v10 = vld [vmem:[%s11251_s0 + $0x108] sm:$0xff] }
 0x11d   :  { %8115 = vmatprep.subr.bf16.mxu0 %v9386_v17  ;;  %v1079_v16 = vpack.c.bf16 %v6993_v12, %v6992_v10  ;;  %v7034_v10 = vld [vmem:[%s11251_s0 + $0x139] sm:$0xff]  ;;  %v7035_v12 = vld [vmem:[%s11251_s0 + $0x141] sm:$0xff] }
 0x11f   :  { %8084 = vmatmul.mubr.bf16.gmra.mrb[8].mxu0 %v772_v18  ;;  %v1080_v18 = vpack.c.bf16 %v6995_v14, %v6994_v13  ;;  %v9402_v13 = vld [vmem:[#allocation5 + $0x160] sm:$0xff]  }
 0x120   :  { %8087 = vmatprep.mubr.bf16.mxu0 %v773_v21  ;;  %8116 = vmatpush3.bf16.msra.mxu0 %v9386_v17  ;;  %v9395_v17 = vld [vmem:[#allocation5 + $0x128] sm:$0xff]   ;;  %v6997_v21 = vld [vmem:[%s11251_s0 + $0x170] sm:$0xff] }
 0x121   :  { %8117 = vmatprep.subr.bf16.mxu0 %v9387_v20 }
 0x124   :  { %8118 = vmatpush3.bf16.msra.mxu0 %v9387_v20  ;;  %v6996_v20 = vld [vmem:[%s11251_s0 + $0x168] sm:$0xff] }
 0x125   :  { %8119 = vmatprep.subr.bf16.mxu0 %v9388_v26  ;;  %v1081_v25 = vpack.c.bf16 %v6997_v21, %v6996_v20  ;;  %v7038_v20 = vld [vmem:[%s11251_s0 + $0x1c9] sm:$0xff]  ;;  %v7039_v21 = vld [vmem:[%s11251_s0 + $0x1d1] sm:$0xff] }
 0x127   :  { %8088 = vmatmul.mubr.bf16.gmra.mrb[12].mxu0 %v774_v28  ;;  %v1082_v28 = vpack.c.bf16 %v6999_v23, %v6998_v22  ;;  %v9404_v22 = vld [vmem:[#allocation5 + $0x170] sm:$0xff]  }
 0x128   :  { %8091 = vmatprep.mubr.bf16.mxu0 %v775_v30  ;;  %8120 = vmatpush3.bf16.msra.mxu0 %v9388_v26  ;;  %v9397_v26 = vld [vmem:[#allocation5 + $0x138] sm:$0xff]   ;;  %v7001_v30 = vld [vmem:[%s11251_s0 + $0x200] sm:$0xff] }
 0x129   :  { %8121 = vmatprep.subr.bf16.mxu0 %v9389_v29 }
 0x12c   :  { %8122 = vmatpush3.bf16.msra.mxu0 %v9389_v29  ;;  %v7000_v29 = vld [vmem:[%s11251_s0 + $0x1f8] sm:$0xff] }
 0x12d   :  { %8155 = vmatprep.subr.bf16.mxu0 %v9390_v35  ;;  %v1083_v34 = vpack.c.bf16 %v7001_v30, %v7000_v29  ;;  %v7042_v29 = vld [vmem:[%s11251_s0 + $0x229] sm:$0xff]  ;;  %v7043_v30 = vld [vmem:[%s11251_s0 + $0x231] sm:$0xff] }
 0x12f   :  { %8092 = vmatmul.mubr.bf16.gmra.mrb[16].mxu0 %v776_v36  ;;  %v7004_v36 = vld [vmem:[%s11251_s0 + $0x258] sm:$0xff] }
 0x130   :  { %8095 = vmatprep.mubr.bf16.mxu0 %v777_v37  ;;  %v7005_v37 = vld [vmem:[%s11251_s0 + $0x260] sm:$0xff] }
 0x131   :  { %v1085_v40 = vpack.c.bf16 %v7005_v37, %v7004_v36  ;;  %v7046_v36 = vld [vmem:[%s11251_s0 + $0x289] sm:$0xff]  ;;  %v7047_v37 = vld [vmem:[%s11251_s0 + $0x291] sm:$0xff] }
 0x132   :  { %v1392_v39 = vpack.c.bf16 %v7047_v37, %v7046_v36 }
 0x137   :  { %8096 = vmatmul.mubr.bf16.gmra.mrb[20].mxu0 %v778_v43  ;;  %v7008_v43 = vld [vmem:[%s11251_s0 + $0x2b8] sm:$0xff] }
 0x138   :  { %8099 = vmatprep.mubr.bf16.mxu0 %v779_v44  ;;  %v7009_v44 = vld [vmem:[%s11251_s0 + $0x2c0] sm:$0xff] }
 0x139   :  { %v1087_v47 = vpack.c.bf16 %v7009_v44, %v7008_v43  ;;  %v7050_v43 = vld [vmem:[%s11251_s0 + $0x2e9] sm:$0xff]  ;;  %v7051_v44 = vld [vmem:[%s11251_s0 + $0x2f1] sm:$0xff] }
 0x13a   :  { %v1394_v46 = vpack.c.bf16 %v7051_v44, %v7050_v43 }
 0x13f   :  { %8100 = vmatmul.mubr.bf16.gmra.mrb[24].mxu0 %v780_v50  ;;  %v7012_v50 = vld [vmem:[%s11251_s0 + $0x318] sm:$0xff] }
 0x140   :  { %8103 = vmatprep.mubr.bf16.mxu0 %v781_v51  ;;  %v7013_v51 = vld [vmem:[%s11251_s0 + $0x320] sm:$0xff] }
 0x141   :  { %v1089_v55 = vpack.c.bf16 %v7013_v51, %v7012_v50  ;;  %v7062_v50 = vld [vmem:[%s11251_s0 + $0x1a] sm:$0xff]  ;;  %v7063_v51 = vld [vmem:[%s11251_s0 + $0x22] sm:$0xff] }
 0x142   :  { %v1686_v53 = vpack.c.bf16 %v7063_v51, %v7062_v50 }
 0x147   :  { %8104 = vmatmul.mubr.bf16.gmra.mrb[28].mxu0 %v782_v57  ;;  %v7024_v57 = vld [vmem:[%s11251_s0 + $0x49] sm:$0xff] }
 0x148   :  { %8123 = vmatprep.mubr.bf16.mxu0 %v1074_v58  ;;  %v7025_v58 = vld [vmem:[%s11251_s0 + $0x51] sm:$0xff] }
 0x149   :  { %v1381_v61 = vpack.c.bf16 %v7025_v58, %v7024_v57  ;;  %v7066_v57 = vld [vmem:[%s11251_s0 + $0x7a] sm:$0xff]  ;;  %v7067_v58 = vld [vmem:[%s11251_s0 + $0x82] sm:$0xff] }
 0x14a   :  { %v1688_v60 = vpack.c.bf16 %v7067_v58, %v7066_v57  ;;  %v7110_v57 = vld [vmem:[%s11251_s0 + $0xf0] sm:$0xff]  ;;  %v7111_v58 = vld [vmem:[%s11251_s0 + $0xf8] sm:$0xff] }
 0x14f   :  { %8124 = vmatmul.mubr.bf16.vlgmr.msra.gmra.mrb[0].mxu0 %v1075_v63  ;;  %v9399_v63 = vld [vmem:[#allocation5 + $0x148] sm:$0xff]  }
 0x150   :  { %8156 = vmatpush3.bf16.msra.mxu0 %v9390_v35  ;;  %8127 = vmatprep.mubr.bf16.mxu0 %v1076_v1  ;;  %v1084_v35 = vpack.c.bf16 %v7003_v32, %v7002_v31  ;;  %v7029_v1 = vld [vmem:[%s11251_s0 + $0xb1] sm:$0xff]  ;;  %v9406_v31 = vld [vmem:[#allocation5 + $0x180] sm:$0xff]  }
 0x151   :  { %8157 = vmatprep.subr.bf16.mxu0 %v9391_v0 }
 0x154   :  { %8158 = vmatpush3.bf16.msra.mxu0 %v9391_v0  ;;  %v7028_v0 = vld [vmem:[%s11251_s0 + $0xa9] sm:$0xff] }
 0x155   :  { %8159 = vmatprep.subr.bf16.mxu0 %v9392_v6  ;;  %v1383_v5 = vpack.c.bf16 %v7029_v1, %v7028_v0  ;;  %v7070_v0 = vld [vmem:[%s11251_s0 + $0xda] sm:$0xff]  ;;  %v7071_v1 = vld [vmem:[%s11251_s0 + $0xe2] sm:$0xff] }
 0x157   :  { %8128 = vmatmul.mubr.bf16.gmra.mrb[4].mxu0 %v1077_v7  ;;  %v9401_v7 = vld [vmem:[#allocation5 + $0x158] sm:$0xff]  }
 0x158   :  { %8131 = vmatprep.mubr.bf16.mxu0 %v1078_v9  ;;  %8160 = vmatpush3.bf16.msra.mxu0 %v9392_v6  ;;  %v1384_v6 = vpack.c.bf16 %v7031_v3, %v7030_v2  ;;  %v7033_v9 = vld [vmem:[%s11251_s0 + $0x111] sm:$0xff] }
 0x159   :  { %8161 = vmatprep.subr.bf16.mxu0 %v9393_v8  ;;  %v9408_v2 = vld [vmem:[#allocation5 + $0x190] sm:$0xff]  }
 0x15c   :  { %8162 = vmatpush3.bf16.msra.mxu0 %v9393_v8  ;;  %v7032_v8 = vld [vmem:[%s11251_s0 + $0x109] sm:$0xff] }
 0x15d   :  { %8163 = vmatprep.subr.bf16.mxu0 %v9394_v15  ;;  %v1385_v14 = vpack.c.bf16 %v7033_v9, %v7032_v8  ;;  %v7074_v8 = vld [vmem:[%s11251_s0 + $0x13a] sm:$0xff]  ;;  %v7075_v9 = vld [vmem:[%s11251_s0 + $0x142] sm:$0xff] }
 0x15f   :  { %8132 = vmatmul.mubr.bf16.gmra.mrb[8].mxu0 %v1079_v16  ;;  %v9403_v16 = vld [vmem:[#allocation5 + $0x168] sm:$0xff]  }
 0x160   :  { %8135 = vmatprep.mubr.bf16.mxu0 %v1080_v18  ;;  %8164 = vmatpush3.bf16.msra.mxu0 %v9394_v15  ;;  %v1386_v15 = vpack.c.bf16 %v7035_v12, %v7034_v10  ;;  %v7037_v18 = vld [vmem:[%s11251_s0 + $0x171] sm:$0xff]  ;;  %v9410_v10 = vld [vmem:[#allocation5 + $0x1a0] sm:$0xff]  }
 0x161   :  { %8165 = vmatprep.subr.bf16.mxu0 %v9395_v17 }
 0x164   :  { %8166 = vmatpush3.bf16.msra.mxu0 %v9395_v17  ;;  %v7036_v17 = vld [vmem:[%s11251_s0 + $0x169] sm:$0xff] }
 0x165   :  { %8167 = vmatprep.subr.bf16.mxu0 %v9396_v24  ;;  %v1387_v23 = vpack.c.bf16 %v7037_v18, %v7036_v17  ;;  %v7078_v17 = vld [vmem:[%s11251_s0 + $0x1ca] sm:$0xff]  ;;  %v7079_v18 = vld [vmem:[%s11251_s0 + $0x1d2] sm:$0xff] }
 0x167   :  { %8136 = vmatmul.mubr.bf16.gmra.mrb[12].mxu0 %v1081_v25  ;;  %v9405_v25 = vld [vmem:[#allocation5 + $0x178] sm:$0xff]  }
 0x168   :  { %8139 = vmatprep.mubr.bf16.mxu0 %v1082_v28  ;;  %8168 = vmatpush3.bf16.msra.mxu0 %v9396_v24  ;;  %v1388_v24 = vpack.c.bf16 %v7039_v21, %v7038_v20  ;;  %v7041_v28 = vld [vmem:[%s11251_s0 + $0x201] sm:$0xff]  ;;  %v9412_v20 = vld [vmem:[#allocation5 + $0x1b0] sm:$0xff]  }
 0x169   :  { %8169 = vmatprep.subr.bf16.mxu0 %v9397_v26 }
 0x16c   :  { %8170 = vmatpush3.bf16.msra.mxu0 %v9397_v26  ;;  %v7040_v26 = vld [vmem:[%s11251_s0 + $0x1f9] sm:$0xff] }
 0x16d   :  { %8203 = vmatprep.subr.bf16.mxu0 %v9398_v33  ;;  %v1389_v32 = vpack.c.bf16 %v7041_v28, %v7040_v26  ;;  %v7082_v26 = vld [vmem:[%s11251_s0 + $0x22a] sm:$0xff]  ;;  %v7083_v28 = vld [vmem:[%s11251_s0 + $0x232] sm:$0xff] }
 0x16f   :  { %8140 = vmatmul.mubr.bf16.gmra.mrb[16].mxu0 %v1083_v34  ;;  %v7044_v34 = vld [vmem:[%s11251_s0 + $0x259] sm:$0xff] }
 0x170   :  { %8143 = vmatprep.mubr.bf16.mxu0 %v1084_v35  ;;  %v7045_v35 = vld [vmem:[%s11251_s0 + $0x261] sm:$0xff] }
 0x171   :  { %v1391_v38 = vpack.c.bf16 %v7045_v35, %v7044_v34  ;;  %v7086_v34 = vld [vmem:[%s11251_s0 + $0x28a] sm:$0xff]  ;;  %v7087_v35 = vld [vmem:[%s11251_s0 + $0x292] sm:$0xff] }
 0x172   :  { %v1698_v37 = vpack.c.bf16 %v7087_v35, %v7086_v34  ;;  %v7151_v34 = vld [vmem:[%s11251_s0 + $0xf9] sm:$0xff]  ;;  %v9424_v35 = vld [vmem:[#allocation5 + $0x210] sm:$0xff]  }
 0x177   :  { %8144 = vmatmul.mubr.bf16.gmra.mrb[20].mxu0 %v1085_v40  ;;  %v7048_v40 = vld [vmem:[%s11251_s0 + $0x2b9] sm:$0xff] }
 0x178   :  { %8147 = vmatprep.mubr.bf16.mxu0 %v1086_v41  ;;  %v7049_v41 = vld [vmem:[%s11251_s0 + $0x2c1] sm:$0xff] }
 0x179   :  { %v1393_v45 = vpack.c.bf16 %v7049_v41, %v7048_v40  ;;  %v7090_v40 = vld [vmem:[%s11251_s0 + $0x2ea] sm:$0xff]  ;;  %v7091_v41 = vld [vmem:[%s11251_s0 + $0x2f2] sm:$0xff] }
 0x17a   :  { %v1700_v44 = vpack.c.bf16 %v7091_v41, %v7090_v40  ;;  %v7153_v40 = vld [vmem:[%s11251_s0 + $0x129] sm:$0xff]  ;;  %v7154_v41 = vld [vmem:[%s11251_s0 + $0x151] sm:$0xff] }
 0x17f   :  { %8148 = vmatmul.mubr.bf16.gmra.mrb[24].mxu0 %v1087_v47  ;;  %v7052_v47 = vld [vmem:[%s11251_s0 + $0x319] sm:$0xff] }
 0x180   :  { %8151 = vmatprep.mubr.bf16.mxu0 %v1088_v49  ;;  %v7053_v49 = vld [vmem:[%s11251_s0 + $0x321] sm:$0xff] }
 0x181   :  { %v1395_v52 = vpack.c.bf16 %v7053_v49, %v7052_v47  ;;  %v7102_v47 = vld [vmem:[%s11251_s0 + $0x30] sm:$0xff]  ;;  %v7103_v49 = vld [vmem:[%s11251_s0 + $0x38] sm:$0xff] }
 0x182   :  { %v1993_v51 = vpack.c.bf16 %v7103_v49, %v7102_v47  ;;  %v9427_v47 = vld [vmem:[#allocation5 + $0x228] sm:$0xff]  }
 0x183   :  { %v7156_v49 = vld [vmem:[%s11251_s0 + $0x181] sm:$0xff] }
 0x187   :  { %8152 = vmatmul.mubr.bf16.gmra.mrb[28].mxu0 %v1089_v55  ;;  %v7064_v55 = vld [vmem:[%s11251_s0 + $0x4a] sm:$0xff] }
 0x188   :  { %8171 = vmatprep.mubr.bf16.mxu0 %v1380_v56  ;;  %v7065_v56 = vld [vmem:[%s11251_s0 + $0x52] sm:$0xff] }
 0x189   :  { %v1687_v59 = vpack.c.bf16 %v7065_v56, %v7064_v55  ;;  %v9415_v56 = vld [vmem:[#allocation5 + $0x1c8] sm:$0xff]  }
 0x18f   :  { %8172 = vmatmul.mubr.bf16.vlgmr.msra.gmra.mrb[0].mxu0 %v1381_v61  ;;  %v9407_v61 = vld [vmem:[#allocation5 + $0x188] sm:$0xff]  }
 0x190   :  { %8204 = vmatpush3.bf16.msra.mxu0 %v9398_v33  ;;  %8175 = vmatprep.mubr.bf16.mxu0 %v1382_v62  ;;  %v1390_v33 = vpack.c.bf16 %v7043_v30, %v7042_v29  ;;  %v7068_v62 = vld [vmem:[%s11251_s0 + $0xaa] sm:$0xff]  ;;  %v9414_v29 = vld [vmem:[#allocation5 + $0x1c0] sm:$0xff]  }
 0x191   :  { %8205 = vmatprep.subr.bf16.mxu0 %v9399_v63 }
 0x194   :  { %8206 = vmatpush3.bf16.msra.mxu0 %v9399_v63  ;;  %v7069_v63 = vld [vmem:[%s11251_s0 + $0xb2] sm:$0xff] }
 0x195   :  { %8207 = vmatprep.subr.bf16.mxu0 %v9400_v4  ;;  %v1689_v3 = vpack.c.bf16 %v7069_v63, %v7068_v62  ;;  %v7115_v62 = vld [vmem:[%s11251_s0 + $0x158] sm:$0xff]  ;;  %v9418_v63 = vld [vmem:[#allocation5 + $0x1e0] sm:$0xff]  }
 0x197   :  { %8176 = vmatmul.mubr.bf16.gmra.mrb[4].mxu0 %v1383_v5  ;;  %v9409_v5 = vld [vmem:[#allocation5 + $0x198] sm:$0xff]  }
 0x198   :  { %8179 = vmatprep.mubr.bf16.mxu0 %v1384_v6  ;;  %8208 = vmatpush3.bf16.msra.mxu0 %v9400_v4  ;;  %v1690_v4 = vpack.c.bf16 %v7071_v1, %v7070_v0  ;;  %v7072_v6 = vld [vmem:[%s11251_s0 + $0x10a] sm:$0xff] }
 0x199   :  { %8209 = vmatprep.subr.bf16.mxu0 %v9401_v7  ;;  %v9419_v1 = vld [vmem:[#allocation5 + $0x1e8] sm:$0xff]  }
 0x19c   :  { %8210 = vmatpush3.bf16.msra.mxu0 %v9401_v7  ;;  %v7073_v7 = vld [vmem:[%s11251_s0 + $0x112] sm:$0xff] }
 0x19d   :  { %8211 = vmatprep.subr.bf16.mxu0 %v9402_v13  ;;  %v1691_v12 = vpack.c.bf16 %v7073_v7, %v7072_v6  ;;  %v9421_v7 = vld [vmem:[#allocation5 + $0x1f8] sm:$0xff]  }
 0x19f   :  { %8180 = vmatmul.mubr.bf16.gmra.mrb[8].mxu0 %v1385_v14  ;;  %v9411_v14 = vld [vmem:[#allocation5 + $0x1a8] sm:$0xff]  }
 0x1a0   :  { %8183 = vmatprep.mubr.bf16.mxu0 %v1386_v15  ;;  %8212 = vmatpush3.bf16.msra.mxu0 %v9402_v13  ;;  %v1692_v13 = vpack.c.bf16 %v7075_v9, %v7074_v8  ;;  %v7076_v15 = vld [vmem:[%s11251_s0 + $0x16a] sm:$0xff]  ;;  %v7122_v8 = vld [vmem:[%s11251_s0 + $0x240] sm:$0xff] }
 0x1a1   :  { %8213 = vmatprep.subr.bf16.mxu0 %v9403_v16  ;;  %v7123_v9 = vld [vmem:[%s11251_s0 + $0x248] sm:$0xff] }
 0x1a4   :  { %8214 = vmatpush3.bf16.msra.mxu0 %v9403_v16  ;;  %v7077_v16 = vld [vmem:[%s11251_s0 + $0x172] sm:$0xff] }
 0x1a5   :  { %8215 = vmatprep.subr.bf16.mxu0 %v9404_v22  ;;  %v1693_v21 = vpack.c.bf16 %v7077_v16, %v7076_v15  ;;  %v7130_v16 = vld [vmem:[%s11251_s0 + $0x300] sm:$0xff] }
 0x1a7   :  { %8184 = vmatmul.mubr.bf16.gmra.mrb[12].mxu0 %v1387_v23  ;;  %v9413_v23 = vld [vmem:[#allocation5 + $0x1b8] sm:$0xff]  }
 0x1a8   :  { %8187 = vmatprep.mubr.bf16.mxu0 %v1388_v24  ;;  %8216 = vmatpush3.bf16.msra.mxu0 %v9404_v22  ;;  %v1694_v22 = vpack.c.bf16 %v7079_v18, %v7078_v17  ;;  %v7080_v24 = vld [vmem:[%s11251_s0 + $0x1fa] sm:$0xff]  ;;  %v7132_v18 = vld [vmem:[%s11251_s0 + $0x330] sm:$0xff] }
 0x1a9   :  { %8217 = vmatprep.subr.bf16.mxu0 %v9405_v25 }
 0x1ac   :  { %8218 = vmatpush3.bf16.msra.mxu0 %v9405_v25  ;;  %v7081_v25 = vld [vmem:[%s11251_s0 + $0x202] sm:$0xff] }
 0x1ad   :  { %8251 = vmatprep.subr.bf16.mxu0 %v9406_v31  ;;  %v1695_v30 = vpack.c.bf16 %v7081_v25, %v7080_v24  ;;  %v7145_v24 = vld [vmem:[%s11251_s0 + $0x69] sm:$0xff]  ;;  %v7146_v25 = vld [vmem:[%s11251_s0 + $0x91] sm:$0xff] }
 0x1af   :  { %8188 = vmatmul.mubr.bf16.gmra.mrb[16].mxu0 %v1389_v32  ;;  %v7084_v32 = vld [vmem:[%s11251_s0 + $0x25a] sm:$0xff] }
 0x1b0   :  { %8191 = vmatprep.mubr.bf16.mxu0 %v1390_v33  ;;  %v7085_v33 = vld [vmem:[%s11251_s0 + $0x262] sm:$0xff] }
 0x1b1   :  { %v1697_v36 = vpack.c.bf16 %v7085_v33, %v7084_v32  ;;  %v7149_v32 = vld [vmem:[%s11251_s0 + $0xc9] sm:$0xff]  ;;  %v7150_v33 = vld [vmem:[%s11251_s0 + $0xf1] sm:$0xff] }
 0x1b7   :  { %8192 = vmatmul.mubr.bf16.gmra.mrb[20].mxu0 %v1391_v38  ;;  %v7088_v38 = vld [vmem:[%s11251_s0 + $0x2ba] sm:$0xff] }
 0x1b8   :  { %8195 = vmatprep.mubr.bf16.mxu0 %v1392_v39  ;;  %v7089_v39 = vld [vmem:[%s11251_s0 + $0x2c2] sm:$0xff] }
 0x1b9   :  { %v1699_v43 = vpack.c.bf16 %v7089_v39, %v7088_v38  ;;  %v9425_v38 = vld [vmem:[#allocation5 + $0x218] sm:$0xff]   ;;  %v7152_v39 = vld [vmem:[%s11251_s0 + $0x121] sm:$0xff] }
 0x1bf   :  { %8196 = vmatmul.mubr.bf16.gmra.mrb[24].mxu0 %v1393_v45  ;;  %v7092_v45 = vld [vmem:[%s11251_s0 + $0x31a] sm:$0xff] }
 0x1c0   :  { %8199 = vmatprep.mubr.bf16.mxu0 %v1394_v46  ;;  %v7093_v46 = vld [vmem:[%s11251_s0 + $0x322] sm:$0xff] }
 0x1c1   :  { %v1701_v50 = vpack.c.bf16 %v7093_v46, %v7092_v45  ;;  %v2304_v45 = vpack.c.bf16 %v7153_v40, %v7152_v39  ;;  %v7200_v40 = vld [vmem:[%s11251_s0 + $0x212] sm:$0xff] }
 0x1c7   :  { %8200 = vmatmul.mubr.bf16.gmra.mrb[28].mxu0 %v1395_v52  ;;  %v7106_v52 = vld [vmem:[%s11251_s0 + $0x90] sm:$0xff] }
 0x1c8   :  { %8219 = vmatprep.mubr.bf16.mxu0 %v1686_v53  ;;  %v7107_v53 = vld [vmem:[%s11251_s0 + $0x98] sm:$0xff] }
 0x1c9   :  { %v1995_v55 = vpack.c.bf16 %v7107_v53, %v7106_v52  ;;  %v7159_v52 = vld [vmem:[%s11251_s0 + $0x1e9] sm:$0xff] }
 0x1ca   :  { %v9428_v53 = vld [vmem:[#allocation5 + $0x230] sm:$0xff]  }
 0x1cf   :  { %8220 = vmatmul.mubr.bf16.vlgmr.msra.gmra.mrb[0].mxu0 %v1687_v59  ;;  %v9416_v59 = vld [vmem:[#allocation5 + $0x1d0] sm:$0xff]  }
 0x1d0   :  { %8252 = vmatpush3.bf16.msra.mxu0 %v9406_v31  ;;  %8223 = vmatprep.mubr.bf16.mxu0 %v1688_v60  ;;  %v1696_v31 = vpack.c.bf16 %v7083_v28, %v7082_v26  ;;  %v1997_v60 = vpack.c.bf16 %v7111_v58, %v7110_v57  ;;  %v7147_v26 = vld [vmem:[%s11251_s0 + $0x99] sm:$0xff]  ;;  %v7160_v58 = vld [vmem:[%s11251_s0 + $0x211] sm:$0xff] }
 0x1d1   :  { %8253 = vmatprep.subr.bf16.mxu0 %v9407_v61  ;;  %v9429_v57 = vld [vmem:[#allocation5 + $0x238] sm:$0xff]  }
 0x1d4   :  { %8254 = vmatpush3.bf16.msra.mxu0 %v9407_v61  ;;  %v9417_v61 = vld [vmem:[#allocation5 + $0x1d8] sm:$0xff]  }
 0x1d5   :  { %8255 = vmatprep.subr.bf16.mxu0 %v9408_v2 }
 0x1d7   :  { %8224 = vmatmul.mubr.bf16.gmra.mrb[4].mxu0 %v1689_v3  ;;  %v7118_v3 = vld [vmem:[%s11251_s0 + $0x1e0] sm:$0xff] }
 0x1d8   :  { %8227 = vmatprep.mubr.bf16.mxu0 %v1690_v4  ;;  %8256 = vmatpush3.bf16.msra.mxu0 %v9408_v2  ;;  %v7117_v2 = vld [vmem:[%s11251_s0 + $0x188] sm:$0xff] }
 0x1d9   :  { %8257 = vmatprep.subr.bf16.mxu0 %v9409_v5  ;;  %v7119_v4 = vld [vmem:[%s11251_s0 + $0x1e8] sm:$0xff] }
 0x1da   :  { %v2001_v6 = vpack.c.bf16 %v7119_v4, %v7118_v3 }
 0x1dc   :  { %8258 = vmatpush3.bf16.msra.mxu0 %v9409_v5 }
 0x1dd   :  { %8259 = vmatprep.subr.bf16.mxu0 %v9410_v10 }
 0x1df   :  { %8228 = vmatmul.mubr.bf16.gmra.mrb[8].mxu0 %v1691_v12  ;;  %v2003_v12 = vpack.c.bf16 %v7123_v9, %v7122_v8 }
 0x1e0   :  { %8231 = vmatprep.mubr.bf16.mxu0 %v1692_v13  ;;  %8260 = vmatpush3.bf16.msra.mxu0 %v9410_v10  ;;  %v9422_v10 = vld [vmem:[#allocation5 + $0x200] sm:$0xff]  }
 0x1e1   :  { %8261 = vmatprep.subr.bf16.mxu0 %v9411_v14  ;;  %v7126_v13 = vld [vmem:[%s11251_s0 + $0x2a0] sm:$0xff] }
 0x1e4   :  { %8262 = vmatpush3.bf16.msra.mxu0 %v9411_v14  ;;  %v7127_v14 = vld [vmem:[%s11251_s0 + $0x2a8] sm:$0xff] }
 0x1e5   :  { %8263 = vmatprep.subr.bf16.mxu0 %v9412_v20  ;;  %v2005_v15 = vpack.c.bf16 %v7127_v14, %v7126_v13  ;;  %v7182_v13 = vld [vmem:[%s11251_s0 + $0x32] sm:$0xff]  ;;  %v7183_v14 = vld [vmem:[%s11251_s0 + $0x3a] sm:$0xff] }
 0x1e7   :  { %8232 = vmatmul.mubr.bf16.gmra.mrb[12].mxu0 %v1693_v21  ;;  %v7143_v21 = vld [vmem:[%s11251_s0 + $0x39] sm:$0xff] }
 0x1e8   :  { %8235 = vmatprep.mubr.bf16.mxu0 %v1694_v22  ;;  %8264 = vmatpush3.bf16.msra.mxu0 %v9412_v20  ;;  %v7142_v20 = vld [vmem:[%s11251_s0 + $0x31] sm:$0xff] }
 0x1e9   :  { %8265 = vmatprep.subr.bf16.mxu0 %v9413_v23 }
 0x1ec   :  { %8266 = vmatpush3.bf16.msra.mxu0 %v9413_v23  ;;  %v2299_v23 = vpack.c.bf16 %v7143_v21, %v7142_v20 }
 0x1ed   :  { %8299 = vmatprep.subr.bf16.mxu0 %v9414_v29 }
 0x1ef   :  { %8236 = vmatmul.mubr.bf16.gmra.mrb[16].mxu0 %v1695_v30  ;;  %v9423_v30 = vld [vmem:[#allocation5 + $0x208] sm:$0xff]  }
 0x1f0   :  { %8239 = vmatprep.mubr.bf16.mxu0 %v1696_v31  ;;  %v7148_v31 = vld [vmem:[%s11251_s0 + $0xc1] sm:$0xff] }
 0x1f7   :  { %8240 = vmatmul.mubr.bf16.gmra.mrb[20].mxu0 %v1697_v36  ;;  %v2302_v36 = vpack.c.bf16 %v7149_v32, %v7148_v31  ;;  %v7195_v31 = vld [vmem:[%s11251_s0 + $0x15a] sm:$0xff] }
 0x1f8   :  { %8243 = vmatprep.mubr.bf16.mxu0 %v1698_v37  ;;  %v2303_v37 = vpack.c.bf16 %v7151_v34, %v7150_v33  ;;  %v7196_v34 = vld [vmem:[%s11251_s0 + $0x182] sm:$0xff] }
 0x1ff   :  { %8244 = vmatmul.mubr.bf16.gmra.mrb[24].mxu0 %v1699_v43  ;;  %v7155_v43 = vld [vmem:[%s11251_s0 + $0x159] sm:$0xff] }
 0x200   :  { %8247 = vmatprep.mubr.bf16.mxu0 %v1700_v44  ;;  %v9426_v44 = vld [vmem:[#allocation5 + $0x220] sm:$0xff]   ;;  %v2305_v46 = vpack.c.bf16 %v7155_v43, %v7154_v41 }
 0x201   :  { %v7201_v41 = vld [vmem:[%s11251_s0 + $0x21a] sm:$0xff]  ;;  %v7202_v43 = vld [vmem:[%s11251_s0 + $0x242] sm:$0xff] }
 0x207   :  { %8248 = vmatmul.mubr.bf16.gmra.mrb[28].mxu0 %v1701_v50  ;;  %v7157_v50 = vld [vmem:[%s11251_s0 + $0x189] sm:$0xff] }
 0x208   :  { %8267 = vmatprep.mubr.bf16.mxu0 %v1993_v51  ;;  %v7158_v51 = vld [vmem:[%s11251_s0 + $0x1e1] sm:$0xff] }
 0x20f   :  { %8268 = vmatmul.mubr.bf16.vlgmr.msra.gmra.mrb[0].mxu0 %v10154_v11  ;;  %v7114_v11 = vld [vmem:[%s11251_s0 + $0x150] sm:$0xff] }
 0x210   :  { %8300 = vmatpush3.bf16.msra.mxu0 %v9414_v29  ;;  %8271 = vmatprep.mubr.bf16.mxu0 %v1995_v55  ;;  %v1999_v0 = vpack.c.bf16 %v7115_v62, %v7114_v11  ;;  %v2301_v29 = vpack.c.bf16 %v7147_v26, %v7146_v25  ;;  %v2306_v55 = vpack.c.bf16 %v7157_v50, %v7156_v49  ;;  %v7205_v49 = vld [vmem:[%s11251_s0 + $0x27a] sm:$0xff]  ;;  %v7206_v50 = vld [vmem:[%s11251_s0 + $0x2a2] sm:$0xff] }
 0x211   :  { %8301 = vmatprep.subr.bf16.mxu0 %v9415_v56 }
 0x214   :  { %8302 = vmatpush3.bf16.msra.mxu0 %v9415_v56  ;;  %v2307_v56 = vpack.c.bf16 %v7159_v52, %v7158_v51  ;;  %v7207_v51 = vld [vmem:[%s11251_s0 + $0x2aa] sm:$0xff] }
 0x215   :  { %8303 = vmatprep.subr.bf16.mxu0 %v9416_v59 }
 0x217   :  { %8272 = vmatmul.mubr.bf16.gmra.mrb[4].mxu0 %v10169_v19  ;;  %v7116_v19 = vld [vmem:[%s11251_s0 + $0x180] sm:$0xff] }
 0x218   :  { %8275 = vmatprep.mubr.bf16.mxu0 %v1997_v60  ;;  %8304 = vmatpush3.bf16.msra.mxu0 %v9416_v59  ;;  %v2000_v5 = vpack.c.bf16 %v7117_v2, %v7116_v19  ;;  %v7161_v59 = vld [vmem:[%s11251_s0 + $0x219] sm:$0xff]  ;;  %v7162_v60 = vld [vmem:[%s11251_s0 + $0x241] sm:$0xff]  ;;  %v7167_v2 = vld [vmem:[%s11251_s0 + $0x2a9] sm:$0xff] }
 0x219   :  { %8305 = vmatprep.subr.bf16.mxu0 %v9417_v61  ;;  %v2308_v11 = vpack.c.bf16 %v7161_v59, %v7160_v58  ;;  %v7166_v19 = vld [vmem:[%s11251_s0 + $0x2a1] sm:$0xff]  ;;  %v7211_v58 = vld [vmem:[%s11251_s0 + $0x30a] sm:$0xff] }
 0x21a   :  { %v2311_v4 = vpack.c.bf16 %v7167_v2, %v7166_v19  ;;  %v9432_v19 = vld [vmem:[#allocation5 + $0x290] sm:$0xff]   ;;  %v9433_v2 = vld [vmem:[#allocation5 + $0x298] sm:$0xff]  }
 0x21c   :  { %8306 = vmatpush3.bf16.msra.mxu0 %v9417_v61  ;;  %v7163_v61 = vld [vmem:[%s11251_s0 + $0x249] sm:$0xff] }
 0x21d   :  { %8307 = vmatprep.subr.bf16.mxu0 %v9418_v63  ;;  %v2309_v62 = vpack.c.bf16 %v7163_v61, %v7162_v60  ;;  %v7212_v61 = vld [vmem:[%s11251_s0 + $0x332] sm:$0xff] }
 0x21f   :  { %8276 = vmatmul.mubr.bf16.gmra.mrb[8].mxu0 %v10184_v27  ;;  %v9420_v27 = vld [vmem:[#allocation5 + $0x1f0] sm:$0xff]  }
 0x220   :  { %8279 = vmatprep.mubr.bf16.mxu0 %v1999_v0  ;;  %8308 = vmatpush3.bf16.msra.mxu0 %v9418_v63  ;;  %v10766_v63 = vld [vmem:[#allocation2 + $0x90] sm:$0xff] }
 0x221   :  { %8309 = vmatprep.subr.bf16.mxu0 %v9419_v1  ;;  %v7164_v0 = vld [vmem:[%s11251_s0 + $0x271] sm:$0xff] }
 0x224   :  { %8310 = vmatpush3.bf16.msra.mxu0 %v9419_v1  ;;  %v7165_v1 = vld [vmem:[%s11251_s0 + $0x279] sm:$0xff] }
 0x225   :  { %8311 = vmatprep.subr.bf16.mxu0 %v9420_v27  ;;  %v2310_v3 = vpack.c.bf16 %v7165_v1, %v7164_v0  ;;  %v9430_v0 = vld [vmem:[#allocation5 + $0x280] sm:$0xff]   ;;  %v9431_v1 = vld [vmem:[#allocation5 + $0x288] sm:$0xff]  }
 0x226   :  { %8395 = vmatprep.subr.bf16.mxu1 %v9430_v0 }
 0x227   :  { %8280 = vmatmul.mubr.bf16.gmra.mrb[12].mxu0 %v2000_v5  ;;  %v7169_v5 = vld [vmem:[%s11251_s0 + $0x2d9] sm:$0xff]  ;;  %8396 = vmatpush3.bf16.msra.mxu1 %v9430_v0  ;;  %v3218_v0 = vld [vmem:[#allocation2 + $0x1] sm:$0xff] }
 0x228   :  { %8283 = vmatprep.mubr.bf16.mxu0 %v2001_v6  ;;  %8312 = vmatpush3.bf16.msra.mxu0 %v9420_v27  ;;  %v7168_v27 = vld [vmem:[%s11251_s0 + $0x2d1] sm:$0xff]  ;;  %v7170_v6 = vld [vmem:[%s11251_s0 + $0x301] sm:$0xff] }
 0x229   :  { %8313 = vmatprep.subr.bf16.mxu0 %v9421_v7  ;;  %v2312_v8 = vpack.c.bf16 %v7169_v5, %v7168_v27  ;;  %8397 = vmatprep.subr.bf16.mxu1 %v9431_v1  ;;  %v9436_v27 = vld [vmem:[#allocation5 + $0x2b0] sm:$0xff]   ;;  %v9437_v5 = vld [vmem:[#allocation5 + $0x2b8] sm:$0xff]  }
 0x22b   :  { %8398 = vmatpush3.bf16.msra.mxu1 %v9431_v1 }
 0x22c   :  { %8314 = vmatpush3.bf16.msra.mxu0 %v9421_v7  ;;  %v7171_v7 = vld [vmem:[%s11251_s0 + $0x309] sm:$0xff]  ;;  %8399 = vmatprep.subr.bf16.mxu1 %v9432_v19 }
 0x22d   :  { %8347 = vmatprep.subr.bf16.mxu0 %v9422_v10  ;;  %v2313_v9 = vpack.c.bf16 %v7171_v7, %v7170_v6  ;;  %v10895_v6 = vld [vmem:[#allocation5 + $0x240] sm:$0xff]  }
 0x22e   :  { %v10898_v7 = vld [vmem:[#allocation8] ss:$0 sm:$0xff] }
 0x22f   :  { %8284 = vmatmul.mubr.bf16.gmra.mrb[16].mxu0 %v10211_v42  ;;  %v7131_v42 = vld [vmem:[%s11251_s0 + $0x308] sm:$0xff]  ;;  %8400 = vmatpush3.bf16.msra.mxu1 %v9432_v19 }
 0x230   :  { %8287 = vmatprep.mubr.bf16.mxu0 %v2003_v12  ;;  %v2007_v17 = vpack.c.bf16 %v7131_v42, %v7130_v16  ;;  %v7173_v12 = vld [vmem:[%s11251_s0 + $0x339] sm:$0xff]  ;;  %v2605_v16 = vpack.c.bf16 %v7183_v14, %v7182_v13  ;;  %v7184_v42 = vld [vmem:[%s11251_s0 + $0x62] sm:$0xff]  ;;  %8401 = vmatprep.subr.bf16.mxu1 %v9433_v2 }
 0x233   :  { %8402 = vmatpush3.bf16.msra.mxu1 %v9433_v2 }
 0x237   :  { %8288 = vmatmul.mubr.bf16.gmra.mrb[20].mxu0 %v10226_v48  ;;  %v7133_v48 = vld [vmem:[%s11251_s0 + $0x338] sm:$0xff] }
 0x238   :  { %8291 = vmatprep.mubr.bf16.mxu0 %v2005_v15  ;;  %v2008_v22 = vpack.c.bf16 %v7133_v48, %v7132_v18  ;;  %v7186_v18 = vld [vmem:[%s11251_s0 + $0x92] sm:$0xff]  ;;  %v7187_v48 = vld [vmem:[%s11251_s0 + $0x9a] sm:$0xff] }
 0x239   :  { %v2607_v21 = vpack.c.bf16 %v7187_v48, %v7186_v18 }
 0x23f   :  { %8292 = vmatmul.mubr.bf16.gmra.mrb[24].mxu0 %v10241_v54  ;;  %v7144_v54 = vld [vmem:[%s11251_s0 + $0x61] sm:$0xff] }
 0x240   :  { %8295 = vmatprep.mubr.bf16.mxu0 %v2007_v17  ;;  %v2300_v28 = vpack.c.bf16 %v7145_v24, %v7144_v54  ;;  %v7185_v17 = vld [vmem:[%s11251_s0 + $0x6a] sm:$0xff]  ;;  %v7190_v54 = vld [vmem:[%s11251_s0 + $0xf2] sm:$0xff]  ;;  %v7191_v24 = vld [vmem:[%s11251_s0 + $0xfa] sm:$0xff] }
 0x241   :  { %v2606_v20 = vpack.c.bf16 %v7185_v17, %v7184_v42  ;;  %v2609_v26 = vpack.c.bf16 %v7191_v24, %v7190_v54  ;;  %v10903_v42 = vld [vmem:[#allocation10] ss:$0 sm:$0xff] }
 0x247   :  { %8296 = vmatmul.mubr.bf16.gmra.mrb[28].mxu0 %v2008_v22  ;;  %v7188_v22 = vld [vmem:[%s11251_s0 + $0xc2] sm:$0xff] }
 0x248   :  { %8315 = vmatprep.mubr.bf16.mxu0 %v2299_v23  ;;  %v7189_v23 = vld [vmem:[%s11251_s0 + $0xca] sm:$0xff] }
 0x249   :  { %v2608_v25 = vpack.c.bf16 %v7189_v23, %v7188_v22 }
 0x24f   :  { %8316 = vmatmul.mubr.bf16.vlgmr.msra.gmra.mrb[0].mxu0 %v2300_v28  ;;  %v7192_v28 = vld [vmem:[%s11251_s0 + $0x122] sm:$0xff] }
 0x250   :  { %8348 = vmatpush3.bf16.msra.mxu0 %v9422_v10  ;;  %8319 = vmatprep.mubr.bf16.mxu0 %v2301_v29  ;;  %v7172_v10 = vld [vmem:[%s11251_s0 + $0x331] sm:$0xff] }
 0x251   :  { %8349 = vmatprep.subr.bf16.mxu0 %v9423_v30  ;;  %v2314_v15 = vpack.c.bf16 %v7173_v12, %v7172_v10  ;;  %v7193_v29 = vld [vmem:[%s11251_s0 + $0x12a] sm:$0xff] }
 0x252   :  { %v2610_v32 = vpack.c.bf16 %v7193_v29, %v7192_v28 }
 0x254   :  { %8350 = vmatpush3.bf16.msra.mxu0 %v9423_v30  ;;  %v7194_v30 = vld [vmem:[%s11251_s0 + $0x152] sm:$0xff] }
 0x255   :  { %8351 = vmatprep.subr.bf16.mxu0 %v9424_v35  ;;  %v2611_v33 = vpack.c.bf16 %v7195_v31, %v7194_v30 }
 0x257   :  { %8320 = vmatmul.mubr.bf16.gmra.mrb[4].mxu0 %v2302_v36  ;;  %v7198_v36 = vld [vmem:[%s11251_s0 + $0x1e2] sm:$0xff] }
 0x258   :  { %8323 = vmatprep.mubr.bf16.mxu0 %v2303_v37  ;;  %8352 = vmatpush3.bf16.msra.mxu0 %v9424_v35  ;;  %v7197_v35 = vld [vmem:[%s11251_s0 + $0x18a] sm:$0xff] }
 0x259   :  { %8353 = vmatprep.subr.bf16.mxu0 %v9425_v38  ;;  %v7199_v37 = vld [vmem:[%s11251_s0 + $0x1ea] sm:$0xff] }
 0x25a   :  { %v2613_v39 = vpack.c.bf16 %v7199_v37, %v7198_v36 }
 0x25c   :  { %8354 = vmatpush3.bf16.msra.mxu0 %v9425_v38  ;;  %v2612_v38 = vpack.c.bf16 %v7197_v35, %v7196_v34 }
 0x25d   :  { %8355 = vmatprep.subr.bf16.mxu0 %v9426_v44 }
 0x25f   :  { %8324 = vmatmul.mubr.bf16.gmra.mrb[8].mxu0 %v2304_v45  ;;  %v2614_v45 = vpack.c.bf16 %v7201_v41, %v7200_v40 }
 0x260   :  { %8327 = vmatprep.mubr.bf16.mxu0 %v2305_v46  ;;  %8356 = vmatpush3.bf16.msra.mxu0 %v9426_v44  ;;  %v7203_v44 = vld [vmem:[%s11251_s0 + $0x24a] sm:$0xff] }
 0x261   :  { %8357 = vmatprep.subr.bf16.mxu0 %v9427_v47  ;;  %v2615_v46 = vpack.c.bf16 %v7203_v44, %v7202_v43 }
 0x264   :  { %8358 = vmatpush3.bf16.msra.mxu0 %v9427_v47  ;;  %v7204_v47 = vld [vmem:[%s11251_s0 + $0x272] sm:$0xff] }
 0x265   :  { %8359 = vmatprep.subr.bf16.mxu0 %v9428_v53  ;;  %v2616_v52 = vpack.c.bf16 %v7205_v49, %v7204_v47 }
 0x267   :  { %8328 = vmatmul.mubr.bf16.gmra.mrb[12].mxu0 %v2306_v55  ;;  %v7208_v55 = vld [vmem:[%s11251_s0 + $0x2d2] sm:$0xff] }
 0x268   :  { %8331 = vmatprep.mubr.bf16.mxu0 %v2307_v56  ;;  %8360 = vmatpush3.bf16.msra.mxu0 %v9428_v53  ;;  %v2617_v53 = vpack.c.bf16 %v7207_v51, %v7206_v50  ;;  %v7209_v56 = vld [vmem:[%s11251_s0 + $0x2da] sm:$0xff] }
 0x269   :  { %8361 = vmatprep.subr.bf16.mxu0 %v9429_v57  ;;  %v2618_v59 = vpack.c.bf16 %v7209_v56, %v7208_v55 }
 0x26c   :  { %8362 = vmatpush3.bf16.msra.mxu0 %v9429_v57  ;;  %v7210_v57 = vld [vmem:[%s11251_s0 + $0x302] sm:$0xff] }
 0x26d   :  { %8791 = vmatprep.subr.bf16.mxu0 %v10766_v63  ;;  %v2619_v60 = vpack.c.bf16 %v7211_v58, %v7210_v57 }
 0x26f   :  { %8332 = vmatmul.mubr.bf16.gmra.mrb[16].mxu0 %v2308_v11  ;;  %v7213_v11 = vld [vmem:[%s11251_s0 + $0x33a] sm:$0xff]  ;;  %s9841_s0 = smov [#allocation16]  }
 0x270   :  { %8335 = vmatprep.mubr.bf16.mxu0 %v2309_v62  ;;  %v2620_v62 = vpack.c.bf16 %v7213_v11, %v7212_v61  ;;  %s6943_s22 = sshll.u32 %s9841_s0, 4  ;;  %s6944_s22 = int_to_ptr.vmem [resolvable:$true] %s6943_s22 }
 0x271   :  { %s9797_s28 = scalar_lea.vmem %s6944_s22, 256  ;;  %p9802_p7 = scmp.lt.s32.totalorder %s6944_s22, %s6944_s22 }
 0x272   :  { %p9798_p6 = scmp.ne.s32.totalorder %s6944_s22, %s9797_s28  ;;  %p9803_p8 = scmp.lt.s32.totalorder %s9797_s28, %s9797_s28 }
 0x274   :  { %p9804_p9 = por %p9803_p8, %p9802_p7 }
 0x276   :  { %p9805_p10 = pnand %p9804_p9, %p9798_p6 }
 0x277   :  { %8336 = vmatmul.mubr.bf16.gmra.mrb[20].mxu0 %v2310_v3  ;;  %v9434_v3 = vld [vmem:[#allocation5 + $0x2a0] sm:$0xff]  }
 0x278   :  { %8339 = vmatprep.mubr.bf16.mxu0 %v2311_v4  ;;  %8403 = vmatprep.subr.bf16.mxu1 %v9434_v3  ;;  %v9435_v4 = vld [vmem:[#allocation5 + $0x2a8] sm:$0xff]  }
 0x279   :  { %8404 = vmatpush3.bf16.msra.mxu1 %v9434_v3 }
 0x27a   :  { %8405 = vmatprep.subr.bf16.mxu1 %v9435_v4 }
 0x27d   :  { %8406 = vmatpush3.bf16.msra.mxu1 %v9435_v4 }
 0x27e   :  { %8407 = vmatprep.subr.bf16.mxu1 %v9436_v27 }
 0x27f   :  { %8340 = vmatmul.mubr.bf16.gmra.mrb[24].mxu0 %v2312_v8 }
 0x280   :  { %8343 = vmatprep.mubr.bf16.mxu0 %v2313_v9 }
 0x281   :  { %8408 = vmatpush3.bf16.msra.mxu1 %v9436_v27 }
 0x282   :  { %8409 = vmatprep.subr.bf16.mxu1 %v9437_v5 }
 0x285   :  { %8410 = vmatpush3.bf16.msra.mxu1 %v9437_v5 }
 0x286   :  { %8419 = vmatprep.subr.bf16.mxu1 %v10895_v6 }
 0x287   :  { %8344 = vmatmul.mubr.bf16.gmra.mrb[28].mxu0 %v2314_v15 }
 0x288   :  { %8363 = vmatprep.mubr.bf16.mxu0 %v2605_v16 }
 0x28f   :  { %8364 = vmatmul.mubr.bf16.vlgmr.msra.gmra.mrb[0].mxu0 %v2606_v20 }
 0x290   :  { %8367 = vmatprep.mubr.bf16.mxu0 %v2607_v21  ;;  %v10906_v21 = vld [vmem:[#allocation11] ss:$0 sm:$0xff] }
 0x297   :  { %8368 = vmatmul.mubr.bf16.gmra.mrb[4].mxu0 %v2608_v25 }
 0x298   :  { %8371 = vmatprep.mubr.bf16.mxu0 %v2609_v26 }
 0x29f   :  { %8372 = vmatmul.mubr.bf16.gmra.mrb[8].mxu0 %v2610_v32 }
 0x2a0   :  { %8375 = vmatprep.mubr.bf16.mxu0 %v2611_v33 }
 0x2a7   :  { %8376 = vmatmul.mubr.bf16.gmra.mrb[12].mxu0 %v2612_v38 }
 0x2a8   :  { %8379 = vmatprep.mubr.bf16.mxu0 %v2613_v39 }
 0x2af   :  { %8380 = vmatmul.mubr.bf16.gmra.mrb[16].mxu0 %v2614_v45 }
 0x2b0   :  { %8383 = vmatprep.mubr.bf16.mxu0 %v2615_v46 }
 0x2b7   :  { %8384 = vmatmul.mubr.bf16.gmra.mrb[20].mxu0 %v2616_v52 }
 0x2b8   :  { %8387 = vmatprep.mubr.bf16.mxu0 %v2617_v53 }
 0x2bf   :  { %8388 = vmatmul.mubr.bf16.gmra.mrb[24].mxu0 %v2618_v59 }
 0x2c0   :  { %8391 = vmatprep.mubr.bf16.mxu0 %v2619_v60 }
 0x2c7   :  { %8392 = vmatmul.mubr.bf16.gmra.mrb[28].mxu0 %v2620_v62 }
 0x362   :  { %v8365_v8 = vpop.f32.mrb[0].mxu0 }
 0x363   :  { %v2888_v9 = vadd.f32 %v8365_v8, %v10898_v7  ;;  %v2720_v10 = vpop.f32.mrb[1].mxu0 }
 0x364   :  { %v2886_v12 = vadd.f32 %v10898_v7, %v2720_v10  ;;  %v8366_v13 = vpop.f32.mrb[2].mxu0 }
 0x365   :  { %v2920_v14 = vmul.f32 0.01, %v2888_v9  ;;  %v2889_v15 = vadd.f32 %v8366_v13, %v10898_v7  ;;  %v2723_v16 = vpop.f32.mrb[3].mxu0 }
 0x366   :  { %v2918_v17 = vmul.f32 0.01, %v2886_v12  ;;  %v2887_v18 = vadd.f32 %v10898_v7, %v2723_v16 }
 0x367   :  { %v2952_v48 = vmax.f32 %v2888_v9, %v2920_v14  ;;  %v2921_v20 = vmul.f32 0.01, %v2889_v15 }
 0x368   :  { %v2950_v22 = vmax.f32 %v2886_v12, %v2918_v17  ;;  %v2919_v23 = vmul.f32 0.01, %v2887_v18 }
 0x369   :  { %v2991_v54 = vmul.f32 %v10903_v42, %v2952_v48  ;;  %v2953_v24 = vmax.f32 %v2889_v15, %v2921_v20 }
 0x36a   :  { %v2989_v25 = vmul.f32 %v10903_v42, %v2950_v22  ;;  %v2951_v26 = vmax.f32 %v2887_v18, %v2919_v23  ;;  %v8369_v28 = vpop.f32.mrb[4].mxu0 }
 0x36b   :  { %v3030_v29 = vadd.f32 %v10906_v21, %v2991_v54  ;;  %v2992_v30 = vmul.f32 %v10903_v42, %v2953_v24  ;;  %v2892_v31 = vadd.f32 %v8369_v28, %v10898_v7  ;;  %v2736_v32 = vpop.f32.mrb[5].mxu0 }
 0x36c   :  { %v3028_v33 = vadd.f32 %v10906_v21, %v2989_v25  ;;  %v2990_v34 = vmul.f32 %v10903_v42, %v2951_v26  ;;  %v2890_v35 = vadd.f32 %v10898_v7, %v2736_v32  ;;  %v8370_v36 = vpop.f32.mrb[6].mxu0 }
 0x36d   :  { %3062 = vst [vmem:[#allocation2 + $0x21] sm:$0x1] %v3030_v29  ;;  %3078 = vst [vmem:[#allocation2 + $0x20] sm:$0x4] %v3030_v29  ;;  %v3031_v37 = vadd.f32 %v10906_v21, %v2992_v30  ;;  %v2924_v38 = vmul.f32 0.01, %v2892_v31  ;;  %v2893_v39 = vadd.f32 %v8370_v36, %v10898_v7 }
 0x36e   :  { %3094 = vst [vmem:[#allocation2 + $0x1f] sm:$0x10] %v3030_v29  ;;  %3110 = vst [vmem:[#allocation2 + $0x1e] sm:$0x40] %v3030_v29  ;;  %v2739_v40 = vpop.f32.mrb[7].mxu0  ;;  %v3029_v41 = vadd.f32 %v10906_v21, %v2990_v34 }
 0x36f   :  { %3061 = vst [vmem:[#allocation2 + $0x11] sm:$0x1] %v3028_v33  ;;  %3077 = vst [vmem:[#allocation2 + $0x10] sm:$0x4] %v3028_v33  ;;  %v2922_v43 = vmul.f32 0.01, %v2890_v35  ;;  %v2891_v44 = vadd.f32 %v10898_v7, %v2739_v40  ;;  %v2956_v45 = vmax.f32 %v2892_v31, %v2924_v38 }
 0x370   :  { %3093 = vst [vmem:[#allocation2 + $0xf] sm:$0x10] %v3028_v33  ;;  %3109 = vst [vmem:[#allocation2 + $0xe] sm:$0x40] %v3028_v33  ;;  %v2925_v46 = vmul.f32 0.01, %v2893_v39 }
 0x371   :  { %3126 = vst [vmem:[#allocation2 + $0x25] sm:$0x1] %v3031_v37  ;;  %3142 = vst [vmem:[#allocation2 + $0x24] sm:$0x4] %v3031_v37  ;;  %v2954_v47 = vmax.f32 %v2890_v35, %v2922_v43  ;;  %v2923_v49 = vmul.f32 0.01, %v2891_v44  ;;  %v2995_v50 = vmul.f32 %v10903_v42, %v2956_v45 }
 0x372   :  { %3158 = vst [vmem:[#allocation2 + $0x23] sm:$0x10] %v3031_v37  ;;  %3174 = vst [vmem:[#allocation2 + $0x22] sm:$0x40] %v3031_v37  ;;  %v2957_v51 = vmax.f32 %v2893_v39, %v2925_v46  ;;  %v8373_v55 = vpop.f32.mrb[8].mxu0 }
 0x373   :  { %3125 = vst [vmem:[#allocation2 + $0x15] sm:$0x1] %v3029_v41  ;;  %3141 = vst [vmem:[#allocation2 + $0x14] sm:$0x4] %v3029_v41  ;;  %v2993_v52 = vmul.f32 %v10903_v42, %v2954_v47  ;;  %v2955_v53 = vmax.f32 %v2891_v44, %v2923_v49  ;;  %v3034_v56 = vadd.f32 %v10906_v21, %v2995_v50  ;;  %v2752_v59 = vpop.f32.mrb[9].mxu0 }
 0x374   :  { %3157 = vst [vmem:[#allocation2 + $0x13] sm:$0x10] %v3029_v41  ;;  %3173 = vst [vmem:[#allocation2 + $0x12] sm:$0x40] %v3029_v41  ;;  %v2996_v57 = vmul.f32 %v10903_v42, %v2957_v51  ;;  %v2896_v58 = vadd.f32 %v8373_v55, %v10898_v7  ;;  %v2894_v11 = vadd.f32 %v10898_v7, %v2752_v59  ;;  %v8374_v62 = vpop.f32.mrb[10].mxu0 }
 0x375   :  { %v3032_v60 = vadd.f32 %v10906_v21, %v2993_v52  ;;  %v2994_v61 = vmul.f32 %v10903_v42, %v2955_v53  ;;  %3064 = vst [vmem:[#allocation2 + $0x41] sm:$0x1] %v3034_v56  ;;  %3080 = vst [vmem:[#allocation2 + $0x40] sm:$0x4] %v3034_v56  ;;  %v2897_v2 = vadd.f32 %v8374_v62, %v10898_v7  ;;  %v2755_v3 = vpop.f32.mrb[11].mxu0 }
 0x376   :  { %3096 = vst [vmem:[#allocation2 + $0x3f] sm:$0x10] %v3034_v56  ;;  %3112 = vst [vmem:[#allocation2 + $0x3e] sm:$0x40] %v3034_v56  ;;  %v3035_v1 = vadd.f32 %v10906_v21, %v2996_v57  ;;  %v2928_v19 = vmul.f32 0.01, %v2896_v58  ;;  %v2895_v5 = vadd.f32 %v10898_v7, %v2755_v3 }
 0x377   :  { %3063 = vst [vmem:[#allocation2 + $0x31] sm:$0x1] %v3032_v60  ;;  %3079 = vst [vmem:[#allocation2 + $0x30] sm:$0x4] %v3032_v60  ;;  %v3033_v4 = vadd.f32 %v10906_v21, %v2994_v61  ;;  %v2926_v27 = vmul.f32 0.01, %v2894_v11 }
 0x378   :  { %3095 = vst [vmem:[#allocation2 + $0x2f] sm:$0x10] %v3032_v60  ;;  %3111 = vst [vmem:[#allocation2 + $0x2e] sm:$0x40] %v3032_v60  ;;  %v2960_v9 = vmax.f32 %v2896_v58, %v2928_v19  ;;  %v2929_v10 = vmul.f32 0.01, %v2897_v2 }
 0x379   :  { %v3219_v8 = vld [vmem:[#allocation2 + $0x21] sm:$0xff]  ;;  %3128 = vst [vmem:[#allocation2 + $0x45] sm:$0x1] %v3035_v1  ;;  %3144 = vst [vmem:[#allocation2 + $0x44] sm:$0x4] %v3035_v1  ;;  %v2958_v13 = vmax.f32 %v2894_v11, %v2926_v27 }
 0x37a   :  { %3160 = vst [vmem:[#allocation2 + $0x43] sm:$0x10] %v3035_v1  ;;  %3176 = vst [vmem:[#allocation2 + $0x42] sm:$0x40] %v3035_v1  ;;  %v3226_v12 = vpack.c.bf16 %v3219_v8, %v3218_v0  ;;  %v2927_v14 = vmul.f32 0.01, %v2895_v5  ;;  %v2999_v15 = vmul.f32 %v10903_v42, %v2960_v9  ;;  %v2961_v16 = vmax.f32 %v2897_v2, %v2929_v10 }
 0x37b   :  { %3127 = vst [vmem:[#allocation2 + $0x35] sm:$0x1] %v3033_v4  ;;  %3143 = vst [vmem:[#allocation2 + $0x34] sm:$0x4] %v3033_v4  ;;  %v2997_v17 = vmul.f32 %v10903_v42, %v2958_v13  ;;  %v8377_v48 = vpop.f32.mrb[12].mxu0  ;;  %v10944_v36 = vld [vmem:[#allocation2 + $0x20] sm:$0xff] }
 0x37c   :  { %3159 = vst [vmem:[#allocation2 + $0x33] sm:$0x10] %v3033_v4  ;;  %3175 = vst [vmem:[#allocation2 + $0x32] sm:$0x40] %v3033_v4  ;;  %8411 = vmatprep.mubr.bf16.mxu1 %v3226_v12  ;;  %v2959_v18 = vmax.f32 %v2895_v5, %v2927_v14  ;;  %v3038_v20 = vadd.f32 %v10906_v21, %v2999_v15  ;;  %v3000_v22 = vmul.f32 %v10903_v42, %v2961_v16  ;;  %v2768_v54 = vpop.f32.mrb[13].mxu0  ;;  %v10952_v45 = vld [vmem:[#allocation2 + $0x22] sm:$0xff] }
 0x37d   :  { %v2900_v23 = vadd.f32 %v8377_v48, %v10898_v7  ;;  %v3036_v24 = vadd.f32 %v10906_v21, %v2997_v17  ;;  %v2898_v26 = vadd.f32 %v10898_v7, %v2768_v54  ;;  %v8378_v28 = vpop.f32.mrb[14].mxu0  ;;  %v9439_v10 = vld [vmem:[#allocation5 + $0x248] sm:$0xff]   ;;  %v9440_v54 = vld [vmem:[#allocation5 + $0x250] sm:$0xff]  }
 0x37e   :  { %v2998_v25 = vmul.f32 %v10903_v42, %v2959_v18  ;;  %3066 = vst [vmem:[#allocation2 + $0x61] sm:$0x1] %v3038_v20  ;;  %3082 = vst [vmem:[#allocation2 + $0x60] sm:$0x4] %v3038_v20  ;;  %v3039_v29 = vadd.f32 %v10906_v21, %v3000_v22  ;;  %v2901_v31 = vadd.f32 %v8378_v28, %v10898_v7  ;;  %v2771_v32 = vpop.f32.mrb[15].mxu0 }
 0x37f   :  { %3098 = vst [vmem:[#allocation2 + $0x5f] sm:$0x10] %v3038_v20  ;;  %3114 = vst [vmem:[#allocation2 + $0x5e] sm:$0x40] %v3038_v20  ;;  %v2932_v30 = vmul.f32 0.01, %v2900_v23  ;;  %v2899_v35 = vadd.f32 %v10898_v7, %v2771_v32 }
 0x380   :  { %3065 = vst [vmem:[#allocation2 + $0x51] sm:$0x1] %v3036_v24  ;;  %3081 = vst [vmem:[#allocation2 + $0x50] sm:$0x4] %v3036_v24  ;;  %v3037_v33 = vadd.f32 %v10906_v21, %v2998_v25  ;;  %v2930_v34 = vmul.f32 0.01, %v2898_v26 }
 0x381   :  { %3097 = vst [vmem:[#allocation2 + $0x4f] sm:$0x10] %v3036_v24  ;;  %3113 = vst [vmem:[#allocation2 + $0x4e] sm:$0x40] %v3036_v24  ;;  %v10946_v37 = vld [vmem:[#allocation2 + $0x40] sm:$0xff]  ;;  %v2964_v39 = vmax.f32 %v2900_v23, %v2932_v30 }
 0x382   :  { %v10948_v38 = vld [vmem:[#allocation2 + $0x42] sm:$0xff]  ;;  %3130 = vst [vmem:[#allocation2 + $0x65] sm:$0x1] %v3039_v29  ;;  %3146 = vst [vmem:[#allocation2 + $0x64] sm:$0x4] %v3039_v29  ;;  %v4082_v41 = vpack.c.bf16 %v10946_v37, %v10944_v36  ;;  %v2962_v43 = vmax.f32 %v2898_v26, %v2930_v34  ;;  %v8381_v52 = vpop.f32.mrb[16].mxu0 }
 0x383   :  { %3162 = vst [vmem:[#allocation2 + $0x63] sm:$0x10] %v3039_v29  ;;  %3178 = vst [vmem:[#allocation2 + $0x62] sm:$0x40] %v3039_v29  ;;  %v2933_v40 = vmul.f32 0.01, %v2901_v31  ;;  %v3003_v46 = vmul.f32 %v10903_v42, %v2964_v39  ;;  %v4382_v49 = vpack.c.bf16 %v10948_v38, %v10952_v45  ;;  %v2904_v56 = vadd.f32 %v8381_v52, %v10898_v7 }
 0x384   :  { %3129 = vst [vmem:[#allocation2 + $0x55] sm:$0x1] %v3037_v33  ;;  %3145 = vst [vmem:[#allocation2 + $0x54] sm:$0x4] %v3037_v33  ;;  %v2931_v44 = vmul.f32 0.01, %v2899_v35  ;;  %v3001_v50 = vmul.f32 %v10903_v42, %v2962_v43 }
 0x385   :  { %3161 = vst [vmem:[#allocation2 + $0x53] sm:$0x10] %v3037_v33  ;;  %3177 = vst [vmem:[#allocation2 + $0x52] sm:$0x40] %v3037_v33  ;;  %v2965_v47 = vmax.f32 %v2901_v31, %v2933_v40  ;;  %v3042_v53 = vadd.f32 %v10906_v21, %v3003_v46  ;;  %v2784_v57 = vpop.f32.mrb[17].mxu0  ;;  %v10968_v4 = vld [vmem:[#allocation2 + $0x41] sm:$0xff] }
 0x386   :  { %v2963_v51 = vmax.f32 %v2899_v35, %v2931_v44  ;;  %v3040_v58 = vadd.f32 %v10906_v21, %v3001_v50  ;;  %v2902_v60 = vadd.f32 %v10898_v7, %v2784_v57  ;;  %v8382_v61 = vpop.f32.mrb[18].mxu0  ;;  %v2936_v62 = vmul.f32 0.01, %v2904_v56  ;;  %v9441_v40 = vld [vmem:[#allocation5 + $0x258] sm:$0xff]  }
 0x387   :  { %v3004_v55 = vmul.f32 %v10903_v42, %v2965_v47  ;;  %3068 = vst [vmem:[#allocation2 + $0x81] sm:$0x1] %v3042_v53  ;;  %3084 = vst [vmem:[#allocation2 + $0x80] sm:$0x4] %v3042_v53  ;;  %v2905_v0 = vadd.f32 %v8382_v61, %v10898_v7  ;;  %v2787_v1 = vpop.f32.mrb[19].mxu0 }
 0x388   :  { %v3002_v59 = vmul.f32 %v10903_v42, %v2963_v51  ;;  %3100 = vst [vmem:[#allocation2 + $0x7f] sm:$0x10] %v3042_v53  ;;  %3116 = vst [vmem:[#allocation2 + $0x7e] sm:$0x40] %v3042_v53  ;;  %v2934_v2 = vmul.f32 0.01, %v2902_v60  ;;  %v2903_v3 = vadd.f32 %v10898_v7, %v2787_v1  ;;  %v2968_v5 = vmax.f32 %v2904_v56, %v2936_v62 }
 0x389   :  { %v3043_v11 = vadd.f32 %v10906_v21, %v3004_v55  ;;  %3067 = vst [vmem:[#allocation2 + $0x71] sm:$0x1] %v3040_v58  ;;  %3083 = vst [vmem:[#allocation2 + $0x70] sm:$0x4] %v3040_v58  ;;  %v2937_v8 = vmul.f32 0.01, %v2905_v0 }
 0x38a   :  { %3099 = vst [vmem:[#allocation2 + $0x6f] sm:$0x10] %v3040_v58  ;;  %3115 = vst [vmem:[#allocation2 + $0x6e] sm:$0x40] %v3040_v58  ;;  %v3041_v19 = vadd.f32 %v10906_v21, %v3002_v59  ;;  %v10970_v27 = vld [vmem:[#allocation2 + $0x61] sm:$0xff]  ;;  %v2966_v12 = vmax.f32 %v2902_v60, %v2934_v2  ;;  %v3007_v14 = vmul.f32 %v10903_v42, %v2968_v5  ;;  %v8385_v18 = vpop.f32.mrb[20].mxu0 }
 0x38b   :  { %3132 = vst [vmem:[#allocation2 + $0x85] sm:$0x1] %v3043_v11  ;;  %3148 = vst [vmem:[#allocation2 + $0x84] sm:$0x4] %v3043_v11  ;;  %v3227_v9 = vpack.c.bf16 %v10970_v27, %v10968_v4  ;;  %v2935_v13 = vmul.f32 0.01, %v2903_v3  ;;  %v2969_v15 = vmax.f32 %v2905_v0, %v2937_v8  ;;  %v2908_v22 = vadd.f32 %v8385_v18, %v10898_v7 }
 0x38c   :  { %3164 = vst [vmem:[#allocation2 + $0x83] sm:$0x10] %v3043_v11  ;;  %3180 = vst [vmem:[#allocation2 + $0x82] sm:$0x40] %v3043_v11  ;;  %v3005_v16 = vmul.f32 %v10903_v42, %v2966_v12  ;;  %v3046_v48 = vadd.f32 %v10906_v21, %v3007_v14  ;;  %v2800_v23 = vpop.f32.mrb[21].mxu0  ;;  %v9442_v58 = vld [vmem:[#allocation5 + $0x260] sm:$0xff]  }
 0x38d   :  { %3131 = vst [vmem:[#allocation2 + $0x75] sm:$0x1] %v3041_v19  ;;  %3147 = vst [vmem:[#allocation2 + $0x74] sm:$0x4] %v3041_v19  ;;  %8412 = vmatmul.mubr.bf16.vlgmr.msra.gmra.mrb[0].mxu1 %v3227_v9  ;;  %v2967_v17 = vmax.f32 %v2903_v3, %v2935_v13  ;;  %v3008_v20 = vmul.f32 %v10903_v42, %v2969_v15  ;;  %v2906_v26 = vadd.f32 %v10898_v7, %v2800_v23  ;;  %v8386_v28 = vpop.f32.mrb[22].mxu0  ;;  %v3222_v62 = vld [vmem:[#allocation2 + $0xa1] sm:$0xff] }
 0x38e   :  { %3163 = vst [vmem:[#allocation2 + $0x73] sm:$0x10] %v3041_v19  ;;  %3179 = vst [vmem:[#allocation2 + $0x72] sm:$0x40] %v3041_v19  ;;  %8420 = vmatpush3.bf16.msra.mxu1 %v10895_v6  ;;  %v3044_v24 = vadd.f32 %v10906_v21, %v3005_v16  ;;  %v2940_v29 = vmul.f32 0.01, %v2908_v22  ;;  %v2909_v30 = vadd.f32 %v8386_v28, %v10898_v7 }
 0x38f   :  { %8421 = vmatprep.subr.bf16.mxu1 %v9439_v10  ;;  %v3006_v25 = vmul.f32 %v10903_v42, %v2967_v17  ;;  %3070 = vst [vmem:[#allocation2 + $0xc1] sm:$0x1] %v3046_v48  ;;  %3086 = vst [vmem:[#allocation2 + $0xc0] sm:$0x4] %v3046_v48  ;;  %v3047_v6 = vadd.f32 %v10906_v21, %v3008_v20  ;;  %v2803_v31 = vpop.f32.mrb[23].mxu0  ;;  %v9443_v14 = vld [vmem:[#allocation5 + $0x268] sm:$0xff]  }
 0x390   :  { %3102 = vst [vmem:[#allocation2 + $0xbf] sm:$0x10] %v3046_v48  ;;  %3118 = vst [vmem:[#allocation2 + $0xbe] sm:$0x40] %v3046_v48  ;;  %v2938_v33 = vmul.f32 0.01, %v2906_v26  ;;  %v2907_v34 = vadd.f32 %v10898_v7, %v2803_v31  ;;  %v2972_v35 = vmax.f32 %v2908_v22, %v2940_v29 }
 0x391   :  { %3069 = vst [vmem:[#allocation2 + $0xb1] sm:$0x1] %v3044_v24  ;;  %3085 = vst [vmem:[#allocation2 + $0xb0] sm:$0x4] %v3044_v24  ;;  %v3045_v32 = vadd.f32 %v10906_v21, %v3006_v25  ;;  %v2941_v39 = vmul.f32 0.01, %v2909_v30 }
 0x392   :  { %3101 = vst [vmem:[#allocation2 + $0xaf] sm:$0x10] %v3044_v24  ;;  %3117 = vst [vmem:[#allocation2 + $0xae] sm:$0x40] %v3044_v24  ;;  %8422 = vmatpush3.bf16.msra.mxu1 %v9439_v10  ;;  %v2970_v43 = vmax.f32 %v2906_v26, %v2938_v33  ;;  %v2939_v44 = vmul.f32 0.01, %v2907_v34  ;;  %v3011_v46 = vmul.f32 %v10903_v42, %v2972_v35 }
 0x393   :  { %3134 = vst [vmem:[#allocation2 + $0xc5] sm:$0x1] %v3047_v6  ;;  %3150 = vst [vmem:[#allocation2 + $0xc4] sm:$0x4] %v3047_v6  ;;  %8423 = vmatprep.subr.bf16.mxu1 %v9440_v54  ;;  %v2973_v47 = vmax.f32 %v2909_v30, %v2941_v39  ;;  %v8389_v52 = vpop.f32.mrb[24].mxu0  ;;  %v9444_v26 = vld [vmem:[#allocation5 + $0x270] sm:$0xff]  }
 0x394   :  { %3166 = vst [vmem:[#allocation2 + $0xc3] sm:$0x10] %v3047_v6  ;;  %3182 = vst [vmem:[#allocation2 + $0xc2] sm:$0x40] %v3047_v6  ;;  %v3009_v50 = vmul.f32 %v10903_v42, %v2970_v43  ;;  %v2971_v51 = vmax.f32 %v2907_v34, %v2939_v44  ;;  %v3050_v53 = vadd.f32 %v10906_v21, %v3011_v46  ;;  %v2816_v57 = vpop.f32.mrb[25].mxu0 }
 0x395   :  { %3133 = vst [vmem:[#allocation2 + $0xb5] sm:$0x1] %v3045_v32  ;;  %3149 = vst [vmem:[#allocation2 + $0xb4] sm:$0x4] %v3045_v32  ;;  %v3012_v55 = vmul.f32 %v10903_v42, %v2973_v47  ;;  %v2912_v56 = vadd.f32 %v8389_v52, %v10898_v7  ;;  %v2910_v61 = vadd.f32 %v10898_v7, %v2816_v57  ;;  %v8390_v11 = vpop.f32.mrb[26].mxu0  ;;  %v9445_v52 = vld [vmem:[#allocation5 + $0x278] sm:$0xff]  }
 0x396   :  { %3165 = vst [vmem:[#allocation2 + $0xb3] sm:$0x10] %v3045_v32  ;;  %3181 = vst [vmem:[#allocation2 + $0xb2] sm:$0x40] %v3045_v32  ;;  %8424 = vmatpush3.bf16.msra.mxu1 %v9440_v54  ;;  %v3048_v59 = vadd.f32 %v10906_v21, %v3009_v50  ;;  %v3010_v60 = vmul.f32 %v10903_v42, %v2971_v51  ;;  %v2913_v19 = vadd.f32 %v8390_v11, %v10898_v7  ;;  %v2819_v2 = vpop.f32.mrb[27].mxu0 }
 0x397   :  { %8425 = vmatprep.subr.bf16.mxu1 %v9441_v40  ;;  %3072 = vst [vmem:[#allocation2 + $0xe1] sm:$0x1] %v3050_v53  ;;  %3088 = vst [vmem:[#allocation2 + $0xe0] sm:$0x4] %v3050_v53  ;;  %v3051_v0 = vadd.f32 %v10906_v21, %v3012_v55  ;;  %v2944_v1 = vmul.f32 0.01, %v2912_v56  ;;  %v2911_v8 = vadd.f32 %v10898_v7, %v2819_v2 }
 0x398   :  { %3104 = vst [vmem:[#allocation2 + $0xdf] sm:$0x10] %v3050_v53  ;;  %3120 = vst [vmem:[#allocation2 + $0xde] sm:$0x40] %v3050_v53  ;;  %v3049_v3 = vadd.f32 %v10906_v21, %v3010_v60  ;;  %v2942_v5 = vmul.f32 0.01, %v2910_v61 }
 0x399   :  { %3071 = vst [vmem:[#allocation2 + $0xd1] sm:$0x1] %v3048_v59  ;;  %3087 = vst [vmem:[#allocation2 + $0xd0] sm:$0x4] %v3048_v59  ;;  %v2976_v10 = vmax.f32 %v2912_v56, %v2944_v1  ;;  %v2945_v12 = vmul.f32 0.01, %v2913_v19 }
 0x39a   :  { %3103 = vst [vmem:[#allocation2 + $0xcf] sm:$0x10] %v3048_v59  ;;  %3119 = vst [vmem:[#allocation2 + $0xce] sm:$0x40] %v3048_v59  ;;  %8426 = vmatpush3.bf16.msra.mxu1 %v9441_v40  ;;  %v2974_v15 = vmax.f32 %v2910_v61, %v2942_v5  ;;  %v2943_v16 = vmul.f32 0.01, %v2911_v8 }
 0x39b   :  { %v10999_v9 = vld [vmem:[#allocation2 + $0xc1] sm:$0xff]  ;;  %3136 = vst [vmem:[#allocation2 + $0xe5] sm:$0x1] %v3051_v0  ;;  %3152 = vst [vmem:[#allocation2 + $0xe4] sm:$0x4] %v3051_v0  ;;  %8427 = vmatprep.subr.bf16.mxu1 %v9442_v58  ;;  %v3015_v17 = vmul.f32 %v10903_v42, %v2976_v10  ;;  %v2977_v18 = vmax.f32 %v2913_v19, %v2945_v12  ;;  %v8393_v22 = vpop.f32.mrb[28].mxu0  ;;  %v3197_v10 = vpack.c.bf16 %v10944_v36, %v10766_v63 }
 0x39c   :  { %3168 = vst [vmem:[#allocation2 + $0xe3] sm:$0x10] %v3051_v0  ;;  %3184 = vst [vmem:[#allocation2 + $0xe2] sm:$0x40] %v3051_v0  ;;  %v3228_v13 = vpack.c.bf16 %v10999_v9, %v3222_v62  ;;  %v3013_v48 = vmul.f32 %v10903_v42, %v2974_v15  ;;  %v2975_v20 = vmax.f32 %v2911_v8, %v2943_v16  ;;  %v2832_v25 = vpop.f32.mrb[29].mxu0  ;;  %v11012_v35 = vld [vmem:[#allocation2 + $0xc0] sm:$0xff] }
 0x39d   :  { %3135 = vst [vmem:[#allocation2 + $0xd5] sm:$0x1] %v3049_v3  ;;  %3151 = vst [vmem:[#allocation2 + $0xd4] sm:$0x4] %v3049_v3  ;;  %v3054_v23 = vadd.f32 %v10906_v21, %v3015_v17  ;;  %v3016_v54 = vmul.f32 %v10903_v42, %v2977_v18  ;;  %v2916_v24 = vadd.f32 %v8393_v22, %v10898_v7  ;;  %v8394_v30 = vpop.f32.mrb[30].mxu0  ;;  %v11026_v57 = vld [vmem:[#allocation2 + $0xc2] sm:$0xff] }
 0x39e   :  { %3167 = vst [vmem:[#allocation2 + $0xd3] sm:$0x10] %v3049_v3  ;;  %3183 = vst [vmem:[#allocation2 + $0xd2] sm:$0x40] %v3049_v3  ;;  %8415 = vmatprep.mubr.bf16.mxu1 %v3228_v13  ;;  %8428 = vmatpush3.bf16.msra.mxu1 %v9442_v58  ;;  %v3052_v28 = vadd.f32 %v10906_v21, %v3013_v48  ;;  %v3014_v6 = vmul.f32 %v10903_v42, %v2975_v20  ;;  %v2835_v34 = vpop.f32.mrb[31].mxu0  ;;  %v9446_v1 = vld [vmem:[#allocation5 + $0x2c0] sm:$0xff]  }
 0x39f   :  { %8429 = vmatprep.subr.bf16.mxu1 %v9443_v14  ;;  %v2914_v29 = vadd.f32 %v10898_v7, %v2832_v25  ;;  %3074 = vst [vmem:[#allocation2 + $0x101] sm:$0x1] %v3054_v23  ;;  %3090 = vst [vmem:[#allocation2 + $0x100] sm:$0x4] %v3054_v23  ;;  %v3055_v31 = vadd.f32 %v10906_v21, %v3016_v54  ;;  %v2948_v32 = vmul.f32 0.01, %v2916_v24 }
 0x3a0   :  { %3106 = vst [vmem:[#allocation2 + $0xff] sm:$0x10] %v3054_v23  ;;  %3122 = vst [vmem:[#allocation2 + $0xfe] sm:$0x40] %v3054_v23  ;;  %v2917_v33 = vadd.f32 %v8394_v30, %v10898_v7  ;;  %v3053_v39 = vadd.f32 %v10906_v21, %v3014_v6  ;;  %v2915_v43 = vadd.f32 %v10898_v7, %v2835_v34  ;;  %v9447_v13 = vld [vmem:[#allocation5 + $0x2c8] sm:$0xff]   ;;  %v9448_v15 = vld [vmem:[#allocation5 + $0x2d0] sm:$0xff]  }
 0x3a1   :  { %3073 = vst [vmem:[#allocation2 + $0xf1] sm:$0x1] %v3052_v28  ;;  %3089 = vst [vmem:[#allocation2 + $0xf0] sm:$0x4] %v3052_v28  ;;  %v2946_v40 = vmul.f32 0.01, %v2914_v29  ;;  %v2980_v50 = vmax.f32 %v2916_v24, %v2948_v32 }
 0x3a2   :  { %3105 = vst [vmem:[#allocation2 + $0xef] sm:$0x10] %v3052_v28  ;;  %3121 = vst [vmem:[#allocation2 + $0xee] sm:$0x40] %v3052_v28  ;;  %8430 = vmatpush3.bf16.msra.mxu1 %v9443_v14  ;;  %v2949_v51 = vmul.f32 0.01, %v2917_v33  ;;  %v3199_v14 = vpack.c.bf16 %v11012_v35, %v10766_v63 }
 0x3a3   :  { %v11016_v44 = vld [vmem:[#allocation2 + $0xe1] sm:$0xff]  ;;  %3138 = vst [vmem:[#allocation2 + $0x105] sm:$0x1] %v3055_v31  ;;  %3154 = vst [vmem:[#allocation2 + $0x104] sm:$0x4] %v3055_v31  ;;  %8431 = vmatprep.subr.bf16.mxu1 %v9444_v26  ;;  %v2978_v55 = vmax.f32 %v2914_v29, %v2946_v40  ;;  %v3019_v58 = vmul.f32 %v10903_v42, %v2980_v50  ;;  %v9449_v48 = vld [vmem:[#allocation5 + $0x2d8] sm:$0xff]  }
 0x3a4   :  { %v11018_v46 = vld [vmem:[#allocation2 + $0xe0] sm:$0xff]  ;;  %3170 = vst [vmem:[#allocation2 + $0x103] sm:$0x10] %v3055_v31  ;;  %3186 = vst [vmem:[#allocation2 + $0x102] sm:$0x40] %v3055_v31  ;;  %v4234_v7 = vpack.c.bf16 %v11016_v44, %v10999_v9  ;;  %v2981_v59 = vmax.f32 %v2917_v33, %v2949_v51  ;;  %v9451_v22 = vld [vmem:[#allocation5 + $0x2e8] sm:$0xff]  }
 0x3a5   :  { %v11020_v47 = vld [vmem:[#allocation2 + $0xe2] sm:$0xff]  ;;  %v4084_v53 = vpack.c.bf16 %v11018_v46, %v11012_v35  ;;  %3137 = vst [vmem:[#allocation2 + $0xf5] sm:$0x1] %v3053_v39  ;;  %3153 = vst [vmem:[#allocation2 + $0xf4] sm:$0x4] %v3053_v39  ;;  %v3017_v61 = vmul.f32 %v10903_v42, %v2978_v55  ;;  %v3058_v62 = vadd.f32 %v10906_v21, %v3019_v58  ;;  %v9452_v23 = vld [vmem:[#allocation5 + $0x2f0] sm:$0xff]  }
 0x3a6   :  { %3169 = vst [vmem:[#allocation2 + $0xf3] sm:$0x10] %v3053_v39  ;;  %3185 = vst [vmem:[#allocation2 + $0xf2] sm:$0x40] %v3053_v39  ;;  %v2947_v56 = vmul.f32 0.01, %v2915_v43  ;;  %v4384_v60 = vpack.c.bf16 %v11020_v47, %v11026_v57  ;;  %8432 = vmatpush3.bf16.msra.mxu1 %v9444_v26  ;;  %v3020_v0 = vmul.f32 %v10903_v42, %v2981_v59 }
 0x3a7   :  { %8433 = vmatprep.subr.bf16.mxu1 %v9445_v52  ;;  %v3056_v19 = vadd.f32 %v10906_v21, %v3017_v61  ;;  %3076 = vst [vmem:[#allocation2 + $0x121] sm:$0x1] %v3058_v62  ;;  %3092 = vst [vmem:[#allocation2 + $0x120] sm:$0x4] %v3058_v62  ;;  %v3473_v17 = vld [vmem:[#allocation2 + $0x2] sm:$0xff]  ;;  %v9453_v54 = vld [vmem:[#allocation5 + $0x2f8] sm:$0xff]  }
 0x3a8   :  { %v2979_v11 = vmax.f32 %v2915_v43, %v2947_v56  ;;  %3108 = vst [vmem:[#allocation2 + $0x11f] sm:$0x10] %v3058_v62  ;;  %3124 = vst [vmem:[#allocation2 + $0x11e] sm:$0x40] %v3058_v62  ;;  %v3059_v3 = vadd.f32 %v10906_v21, %v3020_v0  ;;  %v3481_v20 = vpack.c.bf16 %v10952_v45, %v3473_v17  ;;  %v9450_v63 = vld [vmem:[#allocation5 + $0x2e0] sm:$0xff]   ;;  %v9455_v6 = vld [vmem:[#allocation5 + $0x308] sm:$0xff]  }
 0x3a9   :  { %3075 = vst [vmem:[#allocation2 + $0x111] sm:$0x1] %v3056_v19  ;;  %3091 = vst [vmem:[#allocation2 + $0x110] sm:$0x4] %v3056_v19  ;;  %v9454_v24 = vld [vmem:[#allocation5 + $0x300] sm:$0xff]   ;;  %v9456_v30 = vld [vmem:[#allocation5 + $0x310] sm:$0xff]  }
 0x3aa   :  { %v3018_v2 = vmul.f32 %v10903_v42, %v2979_v11  ;;  %3107 = vst [vmem:[#allocation2 + $0x10f] sm:$0x10] %v3056_v19  ;;  %3123 = vst [vmem:[#allocation2 + $0x10e] sm:$0x40] %v3056_v19  ;;  %8434 = vmatpush3.bf16.msra.mxu1 %v9445_v52  ;;  %v11055_v25 = vld [vmem:[#allocation2 + $0x62] sm:$0xff]  ;;  %v3624_v32 = vld [vmem:[#allocation2 + $0x30] sm:$0xff] }
 0x3ab   :  { %v11038_v8 = vld [vmem:[#allocation2 + $0x101] sm:$0xff]  ;;  %3140 = vst [vmem:[#allocation2 + $0x125] sm:$0x1] %v3059_v3  ;;  %3156 = vst [vmem:[#allocation2 + $0x124] sm:$0x4] %v3059_v3  ;;  %8443 = vmatprep.subr.bf16.mxu1 %v9446_v1  ;;  %v3482_v28 = vpack.c.bf16 %v11055_v25, %v10948_v38  ;;  %v3623_v34 = vld [vmem:[#allocation2 + $0x10] sm:$0xff] }
 0x3ac   :  { %v3057_v5 = vadd.f32 %v10906_v21, %v3018_v2  ;;  %3172 = vst [vmem:[#allocation2 + $0x123] sm:$0x10] %v3059_v3  ;;  %3188 = vst [vmem:[#allocation2 + $0x122] sm:$0x40] %v3059_v3  ;;  %v3229_v42 = vpack.c.bf16 %v11038_v8, %v11016_v44  ;;  %v11044_v21 = vld [vmem:[#allocation2 + $0x60] sm:$0xff]  ;;  %v9457_v39 = vld [vmem:[#allocation5 + $0x318] sm:$0xff]   ;;  %v3631_v40 = vpack.c.bf16 %v3624_v32, %v3623_v34 }
 0x3ad   :  { %v3198_v12 = vpack.c.bf16 %v11044_v21, %v10946_v37  ;;  %v11050_v16 = vld [vmem:[#allocation2 + $0x100] sm:$0xff]  ;;  %v9459_v50 = vld [vmem:[#allocation5 + $0x328] sm:$0xff]   ;;  %v9460_v51 = vld [vmem:[#allocation5 + $0x330] sm:$0xff]  }
 0x3ae   :  { %3139 = vst [vmem:[#allocation2 + $0x115] sm:$0x1] %v3057_v5  ;;  %3155 = vst [vmem:[#allocation2 + $0x114] sm:$0x4] %v3057_v5  ;;  %8416 = vmatmul.mubr.bf16.gmra.mrb[4].mxu1 %v3229_v42  ;;  %v3200_v18 = vpack.c.bf16 %v11050_v16, %v11018_v46  ;;  %v3477_v26 = vld [vmem:[#allocation2 + $0xa2] sm:$0xff]  ;;  %v9461_v52 = vld [vmem:[#allocation5 + $0x338] sm:$0xff]  }
 0x3af   :  { %3171 = vst [vmem:[#allocation2 + $0x113] sm:$0x10] %v3057_v5  ;;  %3187 = vst [vmem:[#allocation2 + $0x112] sm:$0x40] %v3057_v5  ;;  %8435 = vmatprep.mubr.bf16.mxu1 %v3197_v10  ;;  %v3483_v29 = vpack.c.bf16 %v11026_v57, %v3477_v26  ;;  %v11060_v31 = vld [vmem:[#allocation2 + $0x102] sm:$0xff]  ;;  %v3626_v56 = vld [vmem:[#allocation2 + $0x70] sm:$0xff] }
 0x3b0   :  { %v3484_v33 = vpack.c.bf16 %v11060_v31, %v11020_v47  ;;  %v9458_v43 = vld [vmem:[#allocation5 + $0x320] sm:$0xff]   ;;  %v3628_v58 = vld [vmem:[#allocation2 + $0xd0] sm:$0xff]  ;;  %v9463_v62 = vld [vmem:[#allocation5 + $0x348] sm:$0xff]  }
 0x3b1   :  { %v9462_v55 = vld [vmem:[#allocation5 + $0x340] sm:$0xff]   ;;  %v3625_v59 = vld [vmem:[#allocation2 + $0x50] sm:$0xff]  ;;  %v9465_v10 = vld [vmem:[#allocation5 + $0x358] sm:$0xff]  }
 0x3b2   :  { %v3632_v61 = vpack.c.bf16 %v3626_v56, %v3625_v59  ;;  %v3627_v11 = vld [vmem:[#allocation2 + $0xb0] sm:$0xff]  ;;  %v9469_v17 = vld [vmem:[#allocation5 + $0x378] sm:$0xff]   ;;  %v9487_v36 = vld [vmem:[#allocation5 + $0x408] sm:$0xff]  }
 0x3b3   :  { %v3633_v0 = vpack.c.bf16 %v3628_v58, %v3627_v11  ;;  %v3774_v2 = vld [vmem:[#allocation2 + $0x31] sm:$0xff]  ;;  %v9491_v35 = vld [vmem:[#allocation5 + $0x428] sm:$0xff]  }
 0x3b4   :  { %v3629_v3 = vld [vmem:[#allocation2 + $0xf0] sm:$0xff]  ;;  %v9499_v9 = vld [vmem:[#allocation5 + $0x468] sm:$0xff]   ;;  %v9509_v57 = vld [vmem:[#allocation5 + $0x4f8] sm:$0xff]  }
 0x3b5   :  { %v3773_v42 = vld [vmem:[#allocation2 + $0x11] sm:$0xff]  ;;  %v4381_v38 = vld [vmem:[#allocation2 + $0x122] sm:$0xff] }
 0x3b6   :  { %8436 = vmatmul.mubr.bf16.vlgmr.msra.gmra.mrb[0].mxu1 %v3198_v12  ;;  %v3630_v19 = vld [vmem:[#allocation2 + $0x110] sm:$0xff]  ;;  %v3781_v12 = vpack.c.bf16 %v3774_v2, %v3773_v42  ;;  %v9481_v2 = vld [vmem:[#allocation5 + $0x3d8] sm:$0xff]   ;;  %v4385_v45 = vpack.c.bf16 %v4381_v38, %v11060_v31  ;;  %v7297_v31 = vld [vmem:[#allocation8 + $0x1] ss:$0 sm:$0xff] }
 0x3b7   :  { %8444 = vmatpush3.bf16.msra.mxu1 %v9446_v1  ;;  %8439 = vmatprep.mubr.bf16.mxu1 %v3199_v14  ;;  %v9464_v1 = vld [vmem:[#allocation5 + $0x350] sm:$0xff]   ;;  %v3634_v5 = vpack.c.bf16 %v3630_v19, %v3629_v3  ;;  %v9467_v14 = vld [vmem:[#allocation5 + $0x368] sm:$0xff]   ;;  %v9482_v3 = vld [vmem:[#allocation5 + $0x3e0] sm:$0xff]  }
 0x3b8   :  { %8445 = vmatprep.subr.bf16.mxu1 %v9447_v13  ;;  %v9472_v26 = vld [vmem:[#allocation5 + $0x390] sm:$0xff]   ;;  %v4646_v38 = vld [vmem:[#allocation3 + $0x61] sm:$0xff] }
 0x3b9   :  { %v3923_v32 = vld [vmem:[#allocation2 + $0x12] sm:$0xff] }
 0x3ba   :  { %v3925_v56 = vld [vmem:[#allocation2 + $0x52] sm:$0xff] }
 0x3bb   :  { %8446 = vmatpush3.bf16.msra.mxu1 %v9447_v13  ;;  %v9466_v13 = vld [vmem:[#allocation5 + $0x360] sm:$0xff]   ;;  %v3927_v59 = vld [vmem:[#allocation2 + $0xb2] sm:$0xff] }
 0x3bc   :  { %8447 = vmatprep.subr.bf16.mxu1 %v9448_v15  ;;  %v9484_v42 = vld [vmem:[#allocation5 + $0x3f0] sm:$0xff]  }
 0x3bd   :  { %v9488_v37 = vld [vmem:[#allocation5 + $0x410] sm:$0xff]  }
 0x3be   :  { %8440 = vmatmul.mubr.bf16.gmra.mrb[4].mxu1 %v3200_v18  ;;  %v9470_v18 = vld [vmem:[#allocation5 + $0x380] sm:$0xff]   ;;  %v9492_v46 = vld [vmem:[#allocation5 + $0x430] sm:$0xff]  }
 0x3bf   :  { %8448 = vmatpush3.bf16.msra.mxu1 %v9448_v15  ;;  %8459 = vmatprep.mubr.bf16.mxu1 %v3481_v20  ;;  %v9468_v15 = vld [vmem:[#allocation5 + $0x370] sm:$0xff]  }
 0x3c0   :  { %8449 = vmatprep.subr.bf16.mxu1 %v9449_v48  ;;  %v3778_v20 = vld [vmem:[#allocation2 + $0xd1] sm:$0xff] }
 0x3c1   :  { %v9500_v44 = vld [vmem:[#allocation5 + $0x470] sm:$0xff]  }
 0x3c2   :  { %v9508_v47 = vld [vmem:[#allocation5 + $0x4f0] sm:$0xff]  }
 0x3c3   :  { %8450 = vmatpush3.bf16.msra.mxu1 %v9449_v48  ;;  %v3776_v48 = vld [vmem:[#allocation2 + $0x71] sm:$0xff] }
 0x3c4   :  { %8451 = vmatprep.subr.bf16.mxu1 %v9450_v63 }
 0x3c7   :  { %8452 = vmatpush3.bf16.msra.mxu1 %v9450_v63  ;;  %v3775_v63 = vld [vmem:[#allocation2 + $0x51] sm:$0xff] }
 0x3c8   :  { %8453 = vmatprep.subr.bf16.mxu1 %v9451_v22 }
 0x3cb   :  { %8454 = vmatpush3.bf16.msra.mxu1 %v9451_v22  ;;  %v3782_v22 = vpack.c.bf16 %v3776_v48, %v3775_v63  ;;  %v9495_v63 = vld [vmem:[#allocation5 + $0x448] sm:$0xff]  }
 0x3cc   :  { %8455 = vmatprep.subr.bf16.mxu1 %v9452_v23 }
 0x3cf   :  { %8456 = vmatpush3.bf16.msra.mxu1 %v9452_v23  ;;  %v3777_v23 = vld [vmem:[#allocation2 + $0xb1] sm:$0xff] }
 0x3d0   :  { %8457 = vmatprep.subr.bf16.mxu1 %v9453_v54 }
 0x3d3   :  { %8458 = vmatpush3.bf16.msra.mxu1 %v9453_v54  ;;  %v9471_v54 = vld [vmem:[#allocation5 + $0x388] sm:$0xff]  }
 0x3d4   :  { %8467 = vmatprep.subr.bf16.mxu1 %v9454_v24 }
 0x3d6   :  { %8460 = vmatmul.mubr.bf16.vlgmr.msra.gmra.mrb[0].mxu1 %v3482_v28  ;;  %v3780_v28 = vld [vmem:[#allocation2 + $0x111] sm:$0xff] }
 0x3d7   :  { %8463 = vmatprep.mubr.bf16.mxu1 %v3483_v29  ;;  %8468 = vmatpush3.bf16.msra.mxu1 %v9454_v24  ;;  %v3783_v24 = vpack.c.bf16 %v3778_v20, %v3777_v23  ;;  %v3779_v29 = vld [vmem:[#allocation2 + $0xf1] sm:$0xff]  ;;  %v4227_v20 = vld [vmem:[#allocation2 + $0x81] sm:$0xff] }
 0x3d8   :  { %8469 = vmatprep.subr.bf16.mxu1 %v9455_v6  ;;  %v4231_v23 = vld [vmem:[#allocation2 + $0x121] sm:$0xff] }
 0x3db   :  { %8470 = vmatpush3.bf16.msra.mxu1 %v9455_v6  ;;  %v3924_v6 = vld [vmem:[#allocation2 + $0x32] sm:$0xff] }
 0x3dc   :  { %8471 = vmatprep.subr.bf16.mxu1 %v9456_v30  ;;  %v3931_v34 = vpack.c.bf16 %v3924_v6, %v3923_v32  ;;  %v9504_v6 = vld [vmem:[#allocation5 + $0x4d0] sm:$0xff]  }
 0x3de   :  { %8464 = vmatmul.mubr.bf16.gmra.mrb[4].mxu1 %v3484_v33  ;;  %v9473_v33 = vld [vmem:[#allocation5 + $0x398] sm:$0xff]  }
 0x3df   :  { %8472 = vmatpush3.bf16.msra.mxu1 %v9456_v30  ;;  %8483 = vmatprep.mubr.bf16.mxu1 %v3631_v40  ;;  %v3784_v30 = vpack.c.bf16 %v3780_v28, %v3779_v29  ;;  %v9475_v40 = vld [vmem:[#allocation5 + $0x3a8] sm:$0xff]   ;;  %v9505_v29 = vld [vmem:[#allocation5 + $0x4d8] sm:$0xff]  }
 0x3e0   :  { %8473 = vmatprep.subr.bf16.mxu1 %v9457_v39 }
 0x3e3   :  { %8474 = vmatpush3.bf16.msra.mxu1 %v9457_v39  ;;  %v9474_v39 = vld [vmem:[#allocation5 + $0x3a0] sm:$0xff]  }
 0x3e4   :  { %8475 = vmatprep.subr.bf16.mxu1 %v9458_v43 }
 0x3e7   :  { %8476 = vmatpush3.bf16.msra.mxu1 %v9458_v43  ;;  %v9476_v43 = vld [vmem:[#allocation5 + $0x3b0] sm:$0xff]  }
 0x3e8   :  { %8477 = vmatprep.subr.bf16.mxu1 %v9459_v50 }
 0x3eb   :  { %8478 = vmatpush3.bf16.msra.mxu1 %v9459_v50  ;;  %v9477_v50 = vld [vmem:[#allocation5 + $0x3b8] sm:$0xff]  }
 0x3ec   :  { %8479 = vmatprep.subr.bf16.mxu1 %v9460_v51 }
 0x3ef   :  { %8480 = vmatpush3.bf16.msra.mxu1 %v9460_v51  ;;  %v9478_v51 = vld [vmem:[#allocation5 + $0x3c0] sm:$0xff]  }
 0x3f0   :  { %8481 = vmatprep.subr.bf16.mxu1 %v9461_v52 }
 0x3f3   :  { %8482 = vmatpush3.bf16.msra.mxu1 %v9461_v52  ;;  %v3926_v52 = vld [vmem:[#allocation2 + $0x72] sm:$0xff] }
 0x3f4   :  { %8491 = vmatprep.subr.bf16.mxu1 %v9462_v55  ;;  %v3932_v58 = vpack.c.bf16 %v3926_v52, %v3925_v56  ;;  %v7298_v52 = vld [vmem:[#allocation10 + $0x1] ss:$0 sm:$0xff] }
 0x3f6   :  { %8484 = vmatmul.mubr.bf16.vlgmr.msra.gmra.mrb[0].mxu1 %v3632_v61  ;;  %v9479_v61 = vld [vmem:[#allocation5 + $0x3c8] sm:$0xff]  }
 0x3f7   :  { %8487 = vmatprep.mubr.bf16.mxu1 %v3633_v0  ;;  %8492 = vmatpush3.bf16.msra.mxu1 %v9462_v55  ;;  %v3928_v55 = vld [vmem:[#allocation2 + $0xd2] sm:$0xff] }
 0x3f8   :  { %8493 = vmatprep.subr.bf16.mxu1 %v9463_v62  ;;  %v3933_v11 = vpack.c.bf16 %v3928_v55, %v3927_v59  ;;  %v3930_v0 = vld [vmem:[#allocation2 + $0x112] sm:$0xff] }
 0x3fb   :  { %8494 = vmatpush3.bf16.msra.mxu1 %v9463_v62  ;;  %v9480_v62 = vld [vmem:[#allocation5 + $0x3d0] sm:$0xff]  }
 0x3fc   :  { %8495 = vmatprep.subr.bf16.mxu1 %v9464_v1 }
 0x3fe   :  { %8488 = vmatmul.mubr.bf16.gmra.mrb[4].mxu1 %v3634_v5  ;;  %v9483_v5 = vld [vmem:[#allocation5 + $0x3e8] sm:$0xff]  }
 0x3ff   :  { %8496 = vmatpush3.bf16.msra.mxu1 %v9464_v1  ;;  %8507 = vmatprep.mubr.bf16.mxu1 %v3781_v12  ;;  %v3929_v1 = vld [vmem:[#allocation2 + $0xf2] sm:$0xff]  ;;  %v9486_v12 = vld [vmem:[#allocation5 + $0x400] sm:$0xff]  }
 0x400   :  { %8497 = vmatprep.subr.bf16.mxu1 %v9465_v10  ;;  %v3934_v19 = vpack.c.bf16 %v3930_v0, %v3929_v1 }
 0x403   :  { %8498 = vmatpush3.bf16.msra.mxu1 %v9465_v10  ;;  %v9485_v10 = vld [vmem:[#allocation5 + $0x3f8] sm:$0xff]  }
 0x404   :  { %8499 = vmatprep.subr.bf16.mxu1 %v9466_v13 }
 0x407   :  { %8500 = vmatpush3.bf16.msra.mxu1 %v9466_v13  ;;  %v4077_v13 = vld [vmem:[#allocation2 + $0x80] sm:$0xff] }
 0x408   :  { %8501 = vmatprep.subr.bf16.mxu1 %v9467_v14 }
 0x40b   :  { %8502 = vmatpush3.bf16.msra.mxu1 %v9467_v14  ;;  %v4083_v14 = vpack.c.bf16 %v4077_v13, %v11044_v21  ;;  %v9490_v21 = vld [vmem:[#allocation5 + $0x420] sm:$0xff]  }
 0x40c   :  { %8503 = vmatprep.subr.bf16.mxu1 %v9468_v15 }
 0x40f   :  { %8504 = vmatpush3.bf16.msra.mxu1 %v9468_v15 }
 0x410   :  { %8505 = vmatprep.subr.bf16.mxu1 %v9469_v17 }
 0x413   :  { %8506 = vmatpush3.bf16.msra.mxu1 %v9469_v17  ;;  %v4224_v17 = vld [vmem:[#allocation2 + $0x21] sm:$0xff] }
 0x414   :  { %8515 = vmatprep.subr.bf16.mxu1 %v9470_v18  ;;  %v4232_v48 = vpack.c.bf16 %v10968_v4, %v4224_v17  ;;  %v4233_v4 = vpack.c.bf16 %v4227_v20, %v10970_v27  ;;  %v9498_v27 = vld [vmem:[#allocation5 + $0x460] sm:$0xff]  }
 0x416   :  { %8508 = vmatmul.mubr.bf16.vlgmr.msra.gmra.mrb[0].mxu1 %v3782_v22  ;;  %v9496_v22 = vld [vmem:[#allocation5 + $0x450] sm:$0xff]  }
 0x417   :  { %8511 = vmatprep.mubr.bf16.mxu1 %v3783_v24  ;;  %8516 = vmatpush3.bf16.msra.mxu1 %v9470_v18  ;;  %v9489_v18 = vld [vmem:[#allocation5 + $0x418] sm:$0xff]  }
 0x418   :  { %8517 = vmatprep.subr.bf16.mxu1 %v9471_v54  ;;  %v9497_v24 = vld [vmem:[#allocation5 + $0x458] sm:$0xff]  }
 0x41b   :  { %8518 = vmatpush3.bf16.msra.mxu1 %v9471_v54  ;;  %v4235_v54 = vpack.c.bf16 %v4231_v23, %v11038_v8  ;;  %v9502_v8 = vld [vmem:[#allocation5 + $0x4c0] sm:$0xff]  }
 0x41c   :  { %8519 = vmatprep.subr.bf16.mxu1 %v9472_v26 }
 0x41e   :  { %8512 = vmatmul.mubr.bf16.gmra.mrb[4].mxu1 %v3784_v30  ;;  %v9507_v30 = vld [vmem:[#allocation5 + $0x4e8] sm:$0xff]  }
 0x41f   :  { %8520 = vmatpush3.bf16.msra.mxu1 %v9472_v26  ;;  %8531 = vmatprep.mubr.bf16.mxu1 %v3931_v34  ;;  %v4377_v26 = vld [vmem:[#allocation2 + $0x82] sm:$0xff] }
 0x420   :  { %8521 = vmatprep.subr.bf16.mxu1 %v9473_v33  ;;  %v4383_v28 = vpack.c.bf16 %v4377_v26, %v11055_v25  ;;  %v9506_v25 = vld [vmem:[#allocation5 + $0x4e0] sm:$0xff]  }
 0x423   :  { %8522 = vmatpush3.bf16.msra.mxu1 %v9473_v33 }
 0x424   :  { %8523 = vmatprep.subr.bf16.mxu1 %v9474_v39 }
 0x427   :  { %8524 = vmatpush3.bf16.msra.mxu1 %v9474_v39 }
 0x428   :  { %8525 = vmatprep.subr.bf16.mxu1 %v9475_v40 }
 0x42b   :  { %8526 = vmatpush3.bf16.msra.mxu1 %v9475_v40 }
 0x42c   :  { %8527 = vmatprep.subr.bf16.mxu1 %v9476_v43 }
 0x42f   :  { %8528 = vmatpush3.bf16.msra.mxu1 %v9476_v43 }
 0x430   :  { %8529 = vmatprep.subr.bf16.mxu1 %v9477_v50 }
 0x433   :  { %8530 = vmatpush3.bf16.msra.mxu1 %v9477_v50 }
 0x434   :  { %8539 = vmatprep.subr.bf16.mxu1 %v9478_v51 }
 0x436   :  { %8532 = vmatmul.mubr.bf16.vlgmr.msra.gmra.mrb[0].mxu1 %v3932_v58 }
 0x437   :  { %8535 = vmatprep.mubr.bf16.mxu1 %v3933_v11  ;;  %8540 = vmatpush3.bf16.msra.mxu1 %v9478_v51 }
 0x438   :  { %8541 = vmatprep.subr.bf16.mxu1 %v9479_v61 }
 0x43b   :  { %8542 = vmatpush3.bf16.msra.mxu1 %v9479_v61  ;;  %v7299_v61 = vld [vmem:[#allocation11 + $0x1] ss:$0 sm:$0xff] }
 0x43c   :  { %8543 = vmatprep.subr.bf16.mxu1 %v9480_v62 }
 0x43e   :  { %8536 = vmatmul.mubr.bf16.gmra.mrb[4].mxu1 %v3934_v19 }
 0x43f   :  { %8544 = vmatpush3.bf16.msra.mxu1 %v9480_v62  ;;  %8555 = vmatprep.mubr.bf16.mxu1 %v4082_v41  ;;  %v4081_v41 = vld [vmem:[#allocation2 + $0x120] sm:$0xff] }
 0x440   :  { %8545 = vmatprep.subr.bf16.mxu1 %v9481_v2  ;;  %v4085_v15 = vpack.c.bf16 %v4081_v41, %v11050_v16  ;;  %v9494_v16 = vld [vmem:[#allocation5 + $0x440] sm:$0xff]  }
 0x443   :  { %8546 = vmatpush3.bf16.msra.mxu1 %v9481_v2 }
 0x444   :  { %8547 = vmatprep.subr.bf16.mxu1 %v9482_v3 }
 0x447   :  { %8548 = vmatpush3.bf16.msra.mxu1 %v9482_v3 }
 0x448   :  { %8549 = vmatprep.subr.bf16.mxu1 %v9483_v5 }
 0x44b   :  { %8550 = vmatpush3.bf16.msra.mxu1 %v9483_v5 }
 0x44c   :  { %8551 = vmatprep.subr.bf16.mxu1 %v9484_v42 }
 0x44f   :  { %8552 = vmatpush3.bf16.msra.mxu1 %v9484_v42 }
 0x450   :  { %8553 = vmatprep.subr.bf16.mxu1 %v9485_v10 }
 0x453   :  { %8554 = vmatpush3.bf16.msra.mxu1 %v9485_v10 }
 0x454   :  { %8563 = vmatprep.subr.bf16.mxu1 %v9486_v12 }
 0x456   :  { %8556 = vmatmul.mubr.bf16.vlgmr.msra.gmra.mrb[0].mxu1 %v4083_v14 }
 0x457   :  { %8559 = vmatprep.mubr.bf16.mxu1 %v4084_v53  ;;  %8564 = vmatpush3.bf16.msra.mxu1 %v9486_v12  ;;  %v9493_v53 = vld [vmem:[#allocation5 + $0x438] sm:$0xff]  }
 0x458   :  { %8565 = vmatprep.subr.bf16.mxu1 %v9487_v36 }
 0x45b   :  { %8566 = vmatpush3.bf16.msra.mxu1 %v9487_v36 }
 0x45c   :  { %8567 = vmatprep.subr.bf16.mxu1 %v9488_v37 }
 0x45e   :  { %8560 = vmatmul.mubr.bf16.gmra.mrb[4].mxu1 %v4085_v15 }
 0x45f   :  { %8568 = vmatpush3.bf16.msra.mxu1 %v9488_v37  ;;  %8579 = vmatprep.mubr.bf16.mxu1 %v4232_v48 }
 0x460   :  { %8569 = vmatprep.subr.bf16.mxu1 %v9489_v18 }
 0x463   :  { %8570 = vmatpush3.bf16.msra.mxu1 %v9489_v18 }
 0x464   :  { %8571 = vmatprep.subr.bf16.mxu1 %v9490_v21 }
 0x467   :  { %8572 = vmatpush3.bf16.msra.mxu1 %v9490_v21 }
 0x468   :  { %8573 = vmatprep.subr.bf16.mxu1 %v9491_v35 }
 0x46b   :  { %8574 = vmatpush3.bf16.msra.mxu1 %v9491_v35 }
 0x46c   :  { %8575 = vmatprep.subr.bf16.mxu1 %v9492_v46 }
 0x46f   :  { %8576 = vmatpush3.bf16.msra.mxu1 %v9492_v46 }
 0x470   :  { %8577 = vmatprep.subr.bf16.mxu1 %v9493_v53 }
 0x473   :  { %8578 = vmatpush3.bf16.msra.mxu1 %v9493_v53 }
 0x474   :  { %8587 = vmatprep.subr.bf16.mxu1 %v9494_v16 }
 0x476   :  { %8580 = vmatmul.mubr.bf16.vlgmr.msra.gmra.mrb[0].mxu1 %v4233_v4 }
 0x477   :  { %8583 = vmatprep.mubr.bf16.mxu1 %v4234_v7  ;;  %8588 = vmatpush3.bf16.msra.mxu1 %v9494_v16  ;;  %v9501_v7 = vld [vmem:[#allocation5 + $0x478] sm:$0xff]  }
 0x478   :  { %8589 = vmatprep.subr.bf16.mxu1 %v9495_v63 }
 0x47b   :  { %8590 = vmatpush3.bf16.msra.mxu1 %v9495_v63 }
 0x47c   :  { %8591 = vmatprep.subr.bf16.mxu1 %v9496_v22 }
 0x47e   :  { %8584 = vmatmul.mubr.bf16.gmra.mrb[4].mxu1 %v4235_v54 }
 0x47f   :  { %8592 = vmatpush3.bf16.msra.mxu1 %v9496_v22  ;;  %8603 = vmatprep.mubr.bf16.mxu1 %v4382_v49  ;;  %v9503_v49 = vld [vmem:[#allocation5 + $0x4c8] sm:$0xff]  }
 0x480   :  { %8593 = vmatprep.subr.bf16.mxu1 %v9497_v24 }
 0x483   :  { %8594 = vmatpush3.bf16.msra.mxu1 %v9497_v24 }
 0x484   :  { %8595 = vmatprep.subr.bf16.mxu1 %v9498_v27 }
 0x487   :  { %8596 = vmatpush3.bf16.msra.mxu1 %v9498_v27 }
 0x488   :  { %8597 = vmatprep.subr.bf16.mxu1 %v9499_v9 }
 0x48b   :  { %8598 = vmatpush3.bf16.msra.mxu1 %v9499_v9 }
 0x48c   :  { %8599 = vmatprep.subr.bf16.mxu1 %v9500_v44 }
 0x48f   :  { %8600 = vmatpush3.bf16.msra.mxu1 %v9500_v44 }
 0x490   :  { %8601 = vmatprep.subr.bf16.mxu1 %v9501_v7 }
 0x493   :  { %8602 = vmatpush3.bf16.msra.mxu1 %v9501_v7  ;;  %v4644_v7 = vld [vmem:[#allocation3 + $0x1] sm:$0xff] }
 0x494   :  { %8611 = vmatprep.subr.bf16.mxu1 %v9502_v8 }
 0x496   :  { %8604 = vmatmul.mubr.bf16.vlgmr.msra.gmra.mrb[0].mxu1 %v4383_v28 }
 0x497   :  { %8607 = vmatprep.mubr.bf16.mxu1 %v4384_v60  ;;  %8612 = vmatpush3.bf16.msra.mxu1 %v9502_v8  ;;  %v11086_v60 = vld [vmem:[#allocation5 + $0x480] sm:$0xff]  }
 0x498   :  { %8613 = vmatprep.subr.bf16.mxu1 %v9503_v49 }
 0x49b   :  { %8614 = vmatpush3.bf16.msra.mxu1 %v9503_v49 }
 0x49c   :  { %8615 = vmatprep.subr.bf16.mxu1 %v9504_v6 }
 0x49e   :  { %8608 = vmatmul.mubr.bf16.gmra.mrb[4].mxu1 %v4385_v45 }
 0x49f   :  { %8616 = vmatpush3.bf16.msra.mxu1 %v9504_v6 }
 0x4a0   :  { %8617 = vmatprep.subr.bf16.mxu1 %v9505_v29 }
 0x4a3   :  { %8618 = vmatpush3.bf16.msra.mxu1 %v9505_v29  ;;  %v9511_v29 = vld [vmem:[#allocation5 + $0x488] sm:$0xff]  }
 0x4a4   :  { %8619 = vmatprep.subr.bf16.mxu1 %v9506_v25 }
 0x4a7   :  { %8620 = vmatpush3.bf16.msra.mxu1 %v9506_v25  ;;  %v11097_v25 = vld [vmem:[#allocation2 + $0x90] sm:$0xff] }
 0x4a8   :  { %8621 = vmatprep.subr.bf16.mxu1 %v9507_v30  ;;  %8807 = vmatprep.mubr.msk.bf16.mxu0 %vm9840_vm0, %v11097_v25 }
 0x4ab   :  { %8622 = vmatpush3.bf16.msra.mxu1 %v9507_v30 }
 0x4ac   :  { %8623 = vmatprep.subr.bf16.mxu1 %v9508_v47 }
 0x4af   :  { %8624 = vmatpush3.bf16.msra.mxu1 %v9508_v47  ;;  %v9512_v47 = vld [vmem:[#allocation5 + $0x490] sm:$0xff]  }
 0x4b0   :  { %8625 = vmatprep.subr.bf16.mxu1 %v9509_v57 }
 0x4b3   :  { %8626 = vmatpush3.bf16.msra.mxu1 %v9509_v57  ;;  %v9513_v57 = vld [vmem:[#allocation5 + $0x498] sm:$0xff]  }
 0x4b4   :  { %8631 = vmatprep.subr.bf16.mxu1 %v11086_v60 }
 0x569   :  { %v8605_v32 = vpop.f32.mrb[0].mxu1 }
 0x56a   :  { %v4534_v33 = vadd.f32 %v8605_v32, %v7297_v31  ;;  %v4485_v34 = vpop.f32.mrb[1].mxu1  ;;  %v9515_v32 = vld [vmem:[#allocation5 + $0x4a8] sm:$0xff]  }
 0x56b   :  { %v4532_v39 = vadd.f32 %v7297_v31, %v4485_v34  ;;  %v8606_v40 = vpop.f32.mrb[2].mxu1  ;;  %v9517_v34 = vld [vmem:[#allocation5 + $0x4b8] sm:$0xff]  }
 0x56c   :  { %v4542_v43 = vmul.f32 0.01, %v4534_v33  ;;  %v4535_v50 = vadd.f32 %v8606_v40, %v7297_v31  ;;  %v4488_v51 = vpop.f32.mrb[3].mxu1  ;;  %v4861_v40 = vld [vmem:[#allocation3 + $0x2] sm:$0xff] }
 0x56d   :  { %v4540_v55 = vmul.f32 0.01, %v4532_v39  ;;  %v4533_v56 = vadd.f32 %v7297_v31, %v4488_v51  ;;  %v9519_v51 = vld [vmem:[#allocation5 + $0x508] sm:$0xff]  }
 0x56e   :  { %v4550_v58 = vmax.f32 %v4534_v33, %v4542_v43  ;;  %v4543_v59 = vmul.f32 0.01, %v4535_v50  ;;  %v9516_v33 = vld [vmem:[#allocation5 + $0x4b0] sm:$0xff]  }
 0x56f   :  { %v4548_v11 = vmax.f32 %v4532_v39, %v4540_v55  ;;  %v4541_v62 = vmul.f32 0.01, %v4533_v56  ;;  %v9520_v55 = vld [vmem:[#allocation5 + $0x510] sm:$0xff]  }
 0x570   :  { %v4566_v0 = vmul.f32 %v7298_v52, %v4550_v58  ;;  %v4551_v1 = vmax.f32 %v4535_v50, %v4543_v59  ;;  %v9522_v58 = vld [vmem:[#allocation5 + $0x520] sm:$0xff]   ;;  %v9523_v59 = vld [vmem:[#allocation5 + $0x528] sm:$0xff]  }
 0x571   :  { %v4564_v19 = vmul.f32 %v7298_v52, %v4548_v11  ;;  %v4549_v2 = vmax.f32 %v4533_v56, %v4541_v62  ;;  %v8609_v3 = vpop.f32.mrb[4].mxu1  ;;  %v9521_v56 = vld [vmem:[#allocation5 + $0x518] sm:$0xff]   ;;  %v9526_v62 = vld [vmem:[#allocation5 + $0x540] sm:$0xff]  }
 0x572   :  { %v4582_v5 = vadd.f32 %v7299_v61, %v4566_v0  ;;  %v4567_v42 = vmul.f32 %v7298_v52, %v4551_v1  ;;  %v4538_v10 = vadd.f32 %v8609_v3, %v7297_v31  ;;  %v4501_v12 = vpop.f32.mrb[5].mxu1  ;;  %v9525_v11 = vld [vmem:[#allocation5 + $0x538] sm:$0xff]   ;;  %v4863_v0 = vld [vmem:[#allocation3 + $0x62] sm:$0xff] }
 0x573   :  { %v4580_v13 = vadd.f32 %v7299_v61, %v4564_v19  ;;  %v4565_v14 = vmul.f32 %v7298_v52, %v4549_v2  ;;  %v4536_v36 = vadd.f32 %v7297_v31, %v4501_v12  ;;  %v8610_v37 = vpop.f32.mrb[6].mxu1  ;;  %v9529_v12 = vld [vmem:[#allocation5 + $0x558] sm:$0xff]  }
 0x574   :  { %4591 = vst [vmem:[#allocation3 + $0x31] sm:$0x1] %v4582_v5  ;;  %4599 = vst [vmem:[#allocation3 + $0x30] sm:$0x4] %v4582_v5  ;;  %v4583_v41 = vadd.f32 %v7299_v61, %v4567_v42  ;;  %v4546_v15 = vmul.f32 0.01, %v4538_v10  ;;  %v4539_v17 = vadd.f32 %v8610_v37, %v7297_v31 }
 0x575   :  { %4607 = vst [vmem:[#allocation3 + $0x2f] sm:$0x10] %v4582_v5  ;;  %4615 = vst [vmem:[#allocation3 + $0x2e] sm:$0x40] %v4582_v5  ;;  %v4504_v18 = vpop.f32.mrb[7].mxu1  ;;  %v4581_v48 = vadd.f32 %v7299_v61, %v4565_v14  ;;  %v9527_v5 = vld [vmem:[#allocation5 + $0x548] sm:$0xff]  }
 0x576   :  { %4589 = vst [vmem:[#allocation3 + $0x11] sm:$0x1] %v4580_v13  ;;  %4597 = vst [vmem:[#allocation3 + $0x10] sm:$0x4] %v4580_v13  ;;  %v4544_v21 = vmul.f32 0.01, %v4536_v36  ;;  %v4537_v35 = vadd.f32 %v7297_v31, %v4504_v18  ;;  %v4554_v46 = vmax.f32 %v4538_v10, %v4546_v15 }
 0x577   :  { %4605 = vst [vmem:[#allocation3 + $0xf] sm:$0x10] %v4580_v13  ;;  %4613 = vst [vmem:[#allocation3 + $0xe] sm:$0x40] %v4580_v13  ;;  %v4547_v53 = vmul.f32 0.01, %v4539_v17 }
 0x578   :  { %4592 = vst [vmem:[#allocation3 + $0x41] sm:$0x1] %v4583_v41  ;;  %4600 = vst [vmem:[#allocation3 + $0x40] sm:$0x4] %v4583_v41  ;;  %v4552_v16 = vmax.f32 %v4536_v36, %v4544_v21  ;;  %v4545_v20 = vmul.f32 0.01, %v4537_v35  ;;  %v4570_v4 = vmul.f32 %v7298_v52, %v4554_v46 }
 0x579   :  { %4608 = vst [vmem:[#allocation3 + $0x3f] sm:$0x10] %v4583_v41  ;;  %4616 = vst [vmem:[#allocation3 + $0x3e] sm:$0x40] %v4583_v41  ;;  %v4555_v63 = vmax.f32 %v4539_v17, %v4547_v53  ;;  %v9514_v31 = vld [vmem:[#allocation5 + $0x4a0] sm:$0xff]   ;;  %v9528_v10 = vld [vmem:[#allocation5 + $0x550] sm:$0xff]  }
 0x57a   :  { %4590 = vst [vmem:[#allocation3 + $0x21] sm:$0x1] %v4581_v48  ;;  %4598 = vst [vmem:[#allocation3 + $0x20] sm:$0x4] %v4581_v48  ;;  %v4568_v22 = vmul.f32 %v7298_v52, %v4552_v16  ;;  %v4553_v23 = vmax.f32 %v4537_v35, %v4545_v20  ;;  %v4586_v54 = vadd.f32 %v7299_v61, %v4570_v4  ;;  %v9530_v13 = vld [vmem:[#allocation5 + $0x560] sm:$0xff]   ;;  %v9531_v14 = vld [vmem:[#allocation5 + $0x568] sm:$0xff]  }
 0x57b   :  { %4606 = vst [vmem:[#allocation3 + $0x1f] sm:$0x10] %v4581_v48  ;;  %4614 = vst [vmem:[#allocation3 + $0x1e] sm:$0x40] %v4581_v48  ;;  %v4571_v24 = vmul.f32 %v7298_v52, %v4555_v63  ;;  %v9532_v36 = vld [vmem:[#allocation5 + $0x570] sm:$0xff]   ;;  %v9533_v37 = vld [vmem:[#allocation5 + $0x578] sm:$0xff]  }
 0x57c   :  { %v4584_v27 = vadd.f32 %v7299_v61, %v4568_v22  ;;  %v4569_v9 = vmul.f32 %v7298_v52, %v4553_v23  ;;  %4595 = vst [vmem:[#allocation3 + $0x91] sm:$0x1] %v4586_v54  ;;  %4603 = vst [vmem:[#allocation3 + $0x90] sm:$0x4] %v4586_v54  ;;  %v4986_v2 = vld [vmem:[#allocation3 + $0x30] sm:$0xff]  ;;  %v9534_v41 = vld [vmem:[#allocation5 + $0x580] sm:$0xff]  }
 0x57d   :  { %4611 = vst [vmem:[#allocation3 + $0x8f] sm:$0x10] %v4586_v54  ;;  %4619 = vst [vmem:[#allocation3 + $0x8e] sm:$0x40] %v4586_v54  ;;  %v4587_v44 = vadd.f32 %v7299_v61, %v4571_v24  ;;  %v5110_v48 = vld [vmem:[#allocation3 + $0x31] sm:$0xff]  ;;  %v9535_v35 = vld [vmem:[#allocation5 + $0x588] sm:$0xff]  }
 0x57e   :  { %4593 = vst [vmem:[#allocation3 + $0x71] sm:$0x1] %v4584_v27  ;;  %4601 = vst [vmem:[#allocation3 + $0x70] sm:$0x4] %v4584_v27  ;;  %v4585_v8 = vadd.f32 %v7299_v61, %v4569_v9  ;;  %v9524_v61 = vld [vmem:[#allocation5 + $0x530] sm:$0xff]   ;;  %v9537_v16 = vld [vmem:[#allocation5 + $0x598] sm:$0xff]  }
 0x57f   :  { %4609 = vst [vmem:[#allocation3 + $0x6f] sm:$0x10] %v4584_v27  ;;  %4617 = vst [vmem:[#allocation3 + $0x6e] sm:$0x40] %v4584_v27  ;;  %v4985_v19 = vld [vmem:[#allocation3 + $0x10] sm:$0xff]  ;;  %v9538_v20 = vld [vmem:[#allocation5 + $0x5a0] sm:$0xff]  }
 0x580   :  { %4596 = vst [vmem:[#allocation3 + $0xa1] sm:$0x1] %v4587_v44  ;;  %4604 = vst [vmem:[#allocation3 + $0xa0] sm:$0x4] %v4587_v44  ;;  %v4989_v42 = vpack.c.bf16 %v4986_v2, %v4985_v19  ;;  %v5109_v18 = vld [vmem:[#allocation3 + $0x11] sm:$0xff]  ;;  %v9539_v4 = vld [vmem:[#allocation5 + $0x5a8] sm:$0xff]  }
 0x581   :  { %4612 = vst [vmem:[#allocation3 + $0x9f] sm:$0x10] %v4587_v44  ;;  %4620 = vst [vmem:[#allocation3 + $0x9e] sm:$0x40] %v4587_v44  ;;  %v5113_v46 = vpack.c.bf16 %v5110_v48, %v5109_v18  ;;  %v9536_v53 = vld [vmem:[#allocation5 + $0x590] sm:$0xff]   ;;  %v9541_v22 = vld [vmem:[#allocation5 + $0x5b8] sm:$0xff]  }
 0x582   :  { %v11089_v26 = vld [vmem:[#allocation3 + $0x21] sm:$0xff]  ;;  %4594 = vst [vmem:[#allocation3 + $0x81] sm:$0x1] %v4585_v8  ;;  %4602 = vst [vmem:[#allocation3 + $0x80] sm:$0x4] %v4585_v8  ;;  %v9540_v63 = vld [vmem:[#allocation5 + $0x5b0] sm:$0xff]  }
 0x583   :  { %4610 = vst [vmem:[#allocation3 + $0x7f] sm:$0x10] %v4585_v8  ;;  %4618 = vst [vmem:[#allocation3 + $0x7e] sm:$0x40] %v4585_v8  ;;  %v4648_v28 = vpack.c.bf16 %v11089_v26, %v4644_v7  ;;  %v11092_v45 = vld [vmem:[#allocation3 + $0x20] sm:$0xff]  ;;  %v5233_v27 = vld [vmem:[#allocation3 + $0x12] sm:$0xff] }
 0x584   :  { %v4625_v30 = vpack.c.bf16 %v11092_v45, %v11097_v25  ;;  %v11104_v43 = vld [vmem:[#allocation3 + $0x22] sm:$0xff]  ;;  %v4988_v17 = vld [vmem:[#allocation3 + $0x90] sm:$0xff]  ;;  %v9597_v18 = vld [vmem:[#allocation5 + $0x778] sm:$0xff]  }
 0x585   :  { %8627 = vmatprep.mubr.bf16.mxu1 %v4648_v28  ;;  %v4865_v52 = vpack.c.bf16 %v11104_v43, %v4861_v40  ;;  %v9542_v23 = vld [vmem:[#allocation5 + $0x5c0] sm:$0xff]   ;;  %v5112_v24 = vld [vmem:[#allocation3 + $0x91] sm:$0xff]  ;;  %v9543_v7 = vld [vmem:[#allocation5 + $0x5c8] sm:$0xff]  }
 0x586   :  { %v4987_v15 = vld [vmem:[#allocation3 + $0x70] sm:$0xff]  ;;  %v9574_v28 = vld [vmem:[#allocation5 + $0x700] sm:$0xff]  }
 0x587   :  { %v4990_v21 = vpack.c.bf16 %v4988_v17, %v4987_v15  ;;  %v5111_v54 = vld [vmem:[#allocation3 + $0x71] sm:$0xff]  ;;  %8792 = vmatpush3.bf16.msra.mxu0 %v9574_v28  ;;  %v9583_v19 = vld [vmem:[#allocation5 + $0x740] sm:$0xff]   ;;  %v9567_v28 = vld [vmem:[#allocation5 + $0x688] sm:$0xff]  }
 0x588   :  { %v5234_v9 = vld [vmem:[#allocation3 + $0x32] sm:$0xff]  ;;  %v5114_v44 = vpack.c.bf16 %v5112_v24, %v5111_v54  ;;  %8793 = vmatprep.subr.bf16.mxu0 %v11097_v25  ;;  %v5361_v15 = vld [vmem:[#allocation3 + $0xa0] sm:$0xff]  ;;  %v9563_v54 = vld [vmem:[#allocation5 + $0x668] sm:$0xff]  }
 0x589   :  { %v5237_v8 = vpack.c.bf16 %v5234_v9, %v5233_v27  ;;  %v9580_v40 = vld [vmem:[#allocation5 + $0x730] sm:$0xff]   ;;  %v9558_v17 = vld [vmem:[#allocation5 + $0x640] sm:$0xff]   ;;  %v9565_v27 = vld [vmem:[#allocation5 + $0x678] sm:$0xff]  }
 0x58a   :  { %v11094_v49 = vld [vmem:[#allocation3 + $0x81] sm:$0xff]  ;;  %v9552_v2 = vld [vmem:[#allocation5 + $0x610] sm:$0xff]  }
 0x58b   :  { %v4649_v6 = vpack.c.bf16 %v11094_v49, %v4646_v38  ;;  %v11102_v39 = vld [vmem:[#allocation3 + $0x80] sm:$0xff]  ;;  %v9544_v38 = vld [vmem:[#allocation5 + $0x5d0] sm:$0xff]  }
 0x58c   :  { %v4626_v50 = vpack.c.bf16 %v11102_v39, %v11097_v25  ;;  %v11109_v1 = vld [vmem:[#allocation3 + $0x82] sm:$0xff]  ;;  %v9564_v24 = vld [vmem:[#allocation5 + $0x670] sm:$0xff]  }
 0x58d   :  { %8628 = vmatmul.mubr.bf16.vlgmr.msra.gmra.mrb[8].mxu1 %v4649_v6  ;;  %v4866_v3 = vpack.c.bf16 %v11109_v1, %v4863_v0  ;;  %v9575_v6 = vld [vmem:[#allocation5 + $0x708] sm:$0xff]   ;;  %v9566_v9 = vld [vmem:[#allocation5 + $0x680] sm:$0xff]  }
 0x58e   :  { %8632 = vmatpush3.bf16.msra.mxu1 %v11086_v60  ;;  %8647 = vmatprep.mubr.bf16.mxu1 %v4625_v30  ;;  %v9518_v60 = vld [vmem:[#allocation5 + $0x500] sm:$0xff]   ;;  %v9576_v30 = vld [vmem:[#allocation5 + $0x710] sm:$0xff]  }
 0x58f   :  { %8633 = vmatprep.subr.bf16.mxu1 %v9511_v29  ;;  %8794 = vmatpush3.bf16.msra.mxu0 %v9575_v6  ;;  %v6001_v48 = vld [vmem:[#allocation4 + $0x2] sm:$0xff]  ;;  %v9568_v6 = vld [vmem:[#allocation5 + $0x690] sm:$0xff]  }
 0x590   :  { %8795 = vmatprep.subr.bf16.mxu0 %v11097_v25 }
 0x592   :  { %8634 = vmatpush3.bf16.msra.mxu1 %v9511_v29  ;;  %v9545_v29 = vld [vmem:[#allocation5 + $0x5d8] sm:$0xff]  }
 0x593   :  { %8635 = vmatprep.subr.bf16.mxu1 %v9512_v47  ;;  %8796 = vmatpush3.bf16.msra.mxu0 %v9576_v30  ;;  %v9570_v30 = vld [vmem:[#allocation5 + $0x6a0] sm:$0xff]  }
 0x594   :  { %8797 = vmatprep.subr.bf16.mxu0 %v11097_v25 }
 0x596   :  { %8636 = vmatpush3.bf16.msra.mxu1 %v9512_v47  ;;  %v9546_v47 = vld [vmem:[#allocation5 + $0x5e0] sm:$0xff]  }
 0x597   :  { %8637 = vmatprep.subr.bf16.mxu1 %v9513_v57 }
 0x59a   :  { %8638 = vmatpush3.bf16.msra.mxu1 %v9513_v57  ;;  %v9577_v57 = vld [vmem:[#allocation5 + $0x718] sm:$0xff]  }
 0x59b   :  { %8639 = vmatprep.subr.bf16.mxu1 %v9514_v31  ;;  %8798 = vmatpush3.bf16.msra.mxu0 %v9577_v57  ;;  %v5609_v57 = vld [vmem:[#allocation3 + $0xa2] sm:$0xff] }
 0x59c   :  { %8799 = vmatprep.subr.bf16.mxu0 %v11097_v25 }
 0x59e   :  { %8640 = vmatpush3.bf16.msra.mxu1 %v9514_v31  ;;  %v9547_v31 = vld [vmem:[#allocation5 + $0x5e8] sm:$0xff]  }
 0x59f   :  { %8641 = vmatprep.subr.bf16.mxu1 %v9515_v32 }
 0x5a2   :  { %8642 = vmatpush3.bf16.msra.mxu1 %v9515_v32  ;;  %v9578_v32 = vld [vmem:[#allocation5 + $0x720] sm:$0xff]  }
 0x5a3   :  { %8643 = vmatprep.subr.bf16.mxu1 %v9516_v33  ;;  %8800 = vmatpush3.bf16.msra.mxu0 %v9578_v32  ;;  %v5611_v32 = vpack.c.bf16 %v5609_v57, %v11109_v1  ;;  %v9590_v1 = vld [vmem:[#allocation5 + $0x6e0] sm:$0xff]  }
 0x5a4   :  { %8801 = vmatprep.subr.bf16.mxu0 %v11097_v25 }
 0x5a6   :  { %8644 = vmatpush3.bf16.msra.mxu1 %v9516_v33  ;;  %v9548_v33 = vld [vmem:[#allocation5 + $0x5f0] sm:$0xff]  }
 0x5a7   :  { %8645 = vmatprep.subr.bf16.mxu1 %v9517_v34 }
 0x5aa   :  { %8646 = vmatpush3.bf16.msra.mxu1 %v9517_v34  ;;  %v9579_v34 = vld [vmem:[#allocation5 + $0x728] sm:$0xff]  }
 0x5ab   :  { %8651 = vmatprep.subr.bf16.mxu1 %v9518_v60  ;;  %8802 = vmatpush3.bf16.msra.mxu0 %v9579_v34  ;;  %v9586_v34 = vld [vmem:[#allocation5 + $0x6d0] sm:$0xff]  }
 0x5ac   :  { %8803 = vmatprep.subr.bf16.mxu0 %v11097_v25 }
 0x5ad   :  { %8648 = vmatmul.mubr.bf16.vlgmr.msra.gmra.mrb[8].mxu1 %v4626_v50  ;;  %v5236_v50 = vld [vmem:[#allocation3 + $0x92] sm:$0xff] }
 0x5ae   :  { %8652 = vmatpush3.bf16.msra.mxu1 %v9518_v60  ;;  %8667 = vmatprep.mubr.bf16.mxu1 %v4865_v52  ;;  %v9549_v60 = vld [vmem:[#allocation5 + $0x5f8] sm:$0xff]  }
 0x5af   :  { %8653 = vmatprep.subr.bf16.mxu1 %v9519_v51  ;;  %8804 = vmatpush3.bf16.msra.mxu0 %v9580_v40  ;;  %v9581_v52 = vld [vmem:[#allocation5 + $0x738] sm:$0xff]   ;;  %v9592_v40 = vld [vmem:[#allocation5 + $0x6e8] sm:$0xff]  }
 0x5b0   :  { %8805 = vmatprep.subr.bf16.mxu0 %v11097_v25 }
 0x5b2   :  { %8654 = vmatpush3.bf16.msra.mxu1 %v9519_v51  ;;  %v9550_v51 = vld [vmem:[#allocation5 + $0x600] sm:$0xff]  }
 0x5b3   :  { %8655 = vmatprep.subr.bf16.mxu1 %v9520_v55  ;;  %8806 = vmatpush3.bf16.msra.mxu0 %v9581_v52  ;;  %v5785_v52 = vpack.c.bf16 %v11097_v25, %v11097_v25 }
 0x5b4   :  { %8831 = vmatprep.subr.bf16.mxu0 %v11097_v25 }
 0x5b6   :  { %8656 = vmatpush3.bf16.msra.mxu1 %v9520_v55  ;;  %v5235_v55 = vld [vmem:[#allocation3 + $0x72] sm:$0xff] }
 0x5b7   :  { %8657 = vmatprep.subr.bf16.mxu1 %v9521_v56 }
 0x5ba   :  { %8658 = vmatpush3.bf16.msra.mxu1 %v9521_v56  ;;  %v5803_v56 = vld [vmem:[#allocation4 + $0x1] sm:$0xff] }
 0x5bb   :  { %8659 = vmatprep.subr.bf16.mxu1 %v9522_v58 }
 0x5be   :  { %8660 = vmatpush3.bf16.msra.mxu1 %v9522_v58  ;;  %v5804_v58 = vld [vmem:[#allocation4 + $0x41] sm:$0xff] }
 0x5bf   :  { %8661 = vmatprep.subr.bf16.mxu1 %v9523_v59 }
 0x5c2   :  { %8662 = vmatpush3.bf16.msra.mxu1 %v9523_v59  ;;  %v5359_v59 = vld [vmem:[#allocation3 + $0x40] sm:$0xff] }
 0x5c3   :  { %8663 = vmatprep.subr.bf16.mxu1 %v9524_v61  ;;  %v5362_v0 = vpack.c.bf16 %v5359_v59, %v11092_v45  ;;  %v9587_v45 = vld [vmem:[#allocation5 + $0x750] sm:$0xff]   ;;  %v9604_v59 = vld [vmem:[#allocation5 + $0x798] sm:$0xff]  }
 0x5c6   :  { %8664 = vmatpush3.bf16.msra.mxu1 %v9524_v61  ;;  %v5238_v61 = vpack.c.bf16 %v5236_v50, %v5235_v55  ;;  %v9594_v50 = vld [vmem:[#allocation5 + $0x6f0] sm:$0xff]   ;;  %v9598_v55 = vld [vmem:[#allocation5 + $0x780] sm:$0xff]  }
 0x5c7   :  { %8665 = vmatprep.subr.bf16.mxu1 %v9525_v11 }
 0x5ca   :  { %8666 = vmatpush3.bf16.msra.mxu1 %v9525_v11  ;;  %v9551_v11 = vld [vmem:[#allocation5 + $0x608] sm:$0xff]  }
 0x5cb   :  { %8671 = vmatprep.subr.bf16.mxu1 %v9526_v62 }
 0x5cd   :  { %8668 = vmatmul.mubr.bf16.vlgmr.msra.gmra.mrb[8].mxu1 %v4866_v3  ;;  %v9585_v3 = vld [vmem:[#allocation5 + $0x748] sm:$0xff]  }
 0x5ce   :  { %8672 = vmatpush3.bf16.msra.mxu1 %v9526_v62  ;;  %8687 = vmatprep.mubr.bf16.mxu1 %v4989_v42  ;;  %v5805_v62 = vpack.c.bf16 %v5804_v58, %v5803_v56  ;;  %v9554_v42 = vld [vmem:[#allocation5 + $0x620] sm:$0xff]   ;;  %v9600_v56 = vld [vmem:[#allocation5 + $0x788] sm:$0xff]   ;;  %v9602_v58 = vld [vmem:[#allocation5 + $0x790] sm:$0xff]  }
 0x5cf   :  { %8673 = vmatprep.subr.bf16.mxu1 %v9527_v5 }
 0x5d0   :  { %8808 = vmatmul.mubr.bf16.vlgmr.msra.gmra.mrb[32].mxu0 %v5805_v62  ;;  %v9607_v62 = vld [vmem:[#allocation5 + $0x7e0] sm:$0xff]  }
 0x5d1   :  { %8832 = vmatpush3.bf16.msra.mxu0 %v9583_v19  ;;  %8847 = vmatprep.mubr.msk.bf16.mxu0 %vm9840_vm0, %v11097_v25  ;;  %v9609_v19 = vld [vmem:[#allocation5 + $0x7e8] sm:$0xff]  }
 0x5d2   :  { %8674 = vmatpush3.bf16.msra.mxu1 %v9527_v5  ;;  %8833 = vmatprep.subr.bf16.mxu0 %v11097_v25  ;;  %v9553_v5 = vld [vmem:[#allocation5 + $0x618] sm:$0xff]  }
 0x5d3   :  { %8675 = vmatprep.subr.bf16.mxu1 %v9528_v10 }
 0x5d5   :  { %8834 = vmatpush3.bf16.msra.mxu0 %v9585_v3  ;;  %v9611_v3 = vld [vmem:[#allocation5 + $0x7f0] sm:$0xff]  }
 0x5d6   :  { %8676 = vmatpush3.bf16.msra.mxu1 %v9528_v10  ;;  %8835 = vmatprep.subr.bf16.mxu0 %v11097_v25  ;;  %v9589_v10 = vld [vmem:[#allocation5 + $0x758] sm:$0xff]  }
 0x5d7   :  { %8677 = vmatprep.subr.bf16.mxu1 %v9529_v12 }
 0x5d9   :  { %8836 = vmatpush3.bf16.msra.mxu0 %v9587_v45  ;;  %v9613_v45 = vld [vmem:[#allocation5 + $0x7f8] sm:$0xff]  }
 0x5da   :  { %8678 = vmatpush3.bf16.msra.mxu1 %v9529_v12  ;;  %8837 = vmatprep.subr.bf16.mxu0 %v11097_v25  ;;  %v9555_v12 = vld [vmem:[#allocation5 + $0x628] sm:$0xff]  }
 0x5db   :  { %8679 = vmatprep.subr.bf16.mxu1 %v9530_v13 }
 0x5dd   :  { %8838 = vmatpush3.bf16.msra.mxu0 %v9589_v10 }
 0x5de   :  { %8680 = vmatpush3.bf16.msra.mxu1 %v9530_v13  ;;  %v9591_v13 = vld [vmem:[#allocation5 + $0x760] sm:$0xff]   ;;  %8839 = vmatprep.subr.bf16.mxu0 %v11097_v25 }
 0x5df   :  { %8681 = vmatprep.subr.bf16.mxu1 %v9531_v14 }
 0x5e1   :  { %8840 = vmatpush3.bf16.msra.mxu0 %v9591_v13 }
 0x5e2   :  { %8682 = vmatpush3.bf16.msra.mxu1 %v9531_v14  ;;  %v9556_v14 = vld [vmem:[#allocation5 + $0x630] sm:$0xff]   ;;  %8841 = vmatprep.subr.bf16.mxu0 %v11097_v25 }
 0x5e3   :  { %8683 = vmatprep.subr.bf16.mxu1 %v9532_v36 }
 0x5e6   :  { %8684 = vmatpush3.bf16.msra.mxu1 %v9532_v36  ;;  %v9593_v36 = vld [vmem:[#allocation5 + $0x768] sm:$0xff]  }
 0x5e7   :  { %8685 = vmatprep.subr.bf16.mxu1 %v9533_v37  ;;  %8842 = vmatpush3.bf16.msra.mxu0 %v9593_v36 }
 0x5e8   :  { %8843 = vmatprep.subr.bf16.mxu0 %v11097_v25 }
 0x5ea   :  { %8686 = vmatpush3.bf16.msra.mxu1 %v9533_v37  ;;  %v9557_v37 = vld [vmem:[#allocation5 + $0x638] sm:$0xff]  }
 0x5eb   :  { %8691 = vmatprep.subr.bf16.mxu1 %v9534_v41 }
 0x5ed   :  { %8688 = vmatmul.mubr.bf16.vlgmr.msra.gmra.mrb[8].mxu1 %v4990_v21  ;;  %v6002_v21 = vld [vmem:[#allocation4 + $0x42] sm:$0xff] }
 0x5ee   :  { %8692 = vmatpush3.bf16.msra.mxu1 %v9534_v41  ;;  %8707 = vmatprep.mubr.bf16.mxu1 %v5113_v46  ;;  %v9595_v41 = vld [vmem:[#allocation5 + $0x770] sm:$0xff]   ;;  %v5363_v46 = vpack.c.bf16 %v5361_v15, %v11102_v39  ;;  %v7372_v15 = vld [vmem:[#allocation8 + $0x2] ss:$0 sm:$0xff] }
 0x5ef   :  { %8693 = vmatprep.subr.bf16.mxu1 %v9535_v35  ;;  %8844 = vmatpush3.bf16.msra.mxu0 %v9595_v41  ;;  %v9603_v39 = vld [vmem:[#allocation5 + $0x7d0] sm:$0xff]  }
 0x5f0   :  { %8845 = vmatprep.subr.bf16.mxu0 %v11097_v25 }
 0x5f2   :  { %8694 = vmatpush3.bf16.msra.mxu1 %v9535_v35  ;;  %v5483_v35 = vld [vmem:[#allocation3 + $0x41] sm:$0xff] }
 0x5f3   :  { %8695 = vmatprep.subr.bf16.mxu1 %v9536_v53  ;;  %8846 = vmatpush3.bf16.msra.mxu0 %v9597_v18 }
 0x5f4   :  { %8871 = vmatprep.subr.bf16.mxu0 %v11097_v25 }
 0x5f6   :  { %8696 = vmatpush3.bf16.msra.mxu1 %v9536_v53  ;;  %v9559_v53 = vld [vmem:[#allocation5 + $0x648] sm:$0xff]  }
 0x5f7   :  { %8697 = vmatprep.subr.bf16.mxu1 %v9537_v16 }
 0x5fa   :  { %8698 = vmatpush3.bf16.msra.mxu1 %v9537_v16  ;;  %v6003_v16 = vpack.c.bf16 %v6002_v21, %v6001_v48 }
 0x5fb   :  { %8699 = vmatprep.subr.bf16.mxu1 %v9538_v20 }
 0x5fc   :  { %8848 = vmatmul.mubr.bf16.vlgmr.msra.gmra.mrb[36].mxu0 %v6003_v16 }
 0x5fd   :  { %8887 = vmatprep.mubr.msk.bf16.mxu0 %vm9840_vm0, %v11097_v25 }
 0x5fe   :  { %8700 = vmatpush3.bf16.msra.mxu1 %v9538_v20  ;;  %v5486_v20 = vpack.c.bf16 %v5483_v35, %v11089_v26  ;;  %v9561_v26 = vld [vmem:[#allocation5 + $0x658] sm:$0xff]  }
 0x5ff   :  { %8701 = vmatprep.subr.bf16.mxu1 %v9539_v4 }
 0x602   :  { %8702 = vmatpush3.bf16.msra.mxu1 %v9539_v4  ;;  %v9599_v4 = vld [vmem:[#allocation5 + $0x7c0] sm:$0xff]  }
 0x603   :  { %8703 = vmatprep.subr.bf16.mxu1 %v9540_v63  ;;  %8872 = vmatpush3.bf16.msra.mxu0 %v9599_v4 }
 0x604   :  { %8873 = vmatprep.subr.bf16.mxu0 %v11097_v25 }
 0x606   :  { %8704 = vmatpush3.bf16.msra.mxu1 %v9540_v63  ;;  %v9560_v63 = vld [vmem:[#allocation5 + $0x650] sm:$0xff]  }
 0x607   :  { %8705 = vmatprep.subr.bf16.mxu1 %v9541_v22 }
 0x60a   :  { %8706 = vmatpush3.bf16.msra.mxu1 %v9541_v22  ;;  %v9601_v22 = vld [vmem:[#allocation5 + $0x7c8] sm:$0xff]  }
 0x60b   :  { %8711 = vmatprep.subr.bf16.mxu1 %v9542_v23  ;;  %8874 = vmatpush3.bf16.msra.mxu0 %v9601_v22 }
 0x60c   :  { %8875 = vmatprep.subr.bf16.mxu0 %v11097_v25 }
 0x60d   :  { %8708 = vmatmul.mubr.bf16.vlgmr.msra.gmra.mrb[8].mxu1 %v5114_v44  ;;  %v5485_v44 = vld [vmem:[#allocation3 + $0xa1] sm:$0xff] }
 0x60e   :  { %8712 = vmatpush3.bf16.msra.mxu1 %v9542_v23  ;;  %8727 = vmatprep.mubr.bf16.mxu1 %v5237_v8  ;;  %v9562_v23 = vld [vmem:[#allocation5 + $0x660] sm:$0xff]   ;;  %v5487_v8 = vpack.c.bf16 %v5485_v44, %v11094_v49  ;;  %v9572_v49 = vld [vmem:[#allocation5 + $0x6b0] sm:$0xff]  }
 0x60f   :  { %8713 = vmatprep.subr.bf16.mxu1 %v9543_v7  ;;  %8876 = vmatpush3.bf16.msra.mxu0 %v9603_v39  ;;  %v7374_v39 = vld [vmem:[#allocation11 + $0x2] ss:$0 sm:$0xff] }
 0x610   :  { %8877 = vmatprep.subr.bf16.mxu0 %v11097_v25 }
 0x612   :  { %8714 = vmatpush3.bf16.msra.mxu1 %v9543_v7  ;;  %v5607_v7 = vld [vmem:[#allocation3 + $0x42] sm:$0xff] }
 0x613   :  { %8715 = vmatprep.subr.bf16.mxu1 %v9544_v38 }
 0x616   :  { %8716 = vmatpush3.bf16.msra.mxu1 %v9544_v38  ;;  %v5610_v38 = vpack.c.bf16 %v5607_v7, %v11104_v43  ;;  %v9573_v43 = vld [vmem:[#allocation5 + $0x6b8] sm:$0xff]  }
 0x617   :  { %8717 = vmatprep.subr.bf16.mxu1 %v9545_v29 }
 0x61a   :  { %8718 = vmatpush3.bf16.msra.mxu1 %v9545_v29  ;;  %v9569_v29 = vld [vmem:[#allocation5 + $0x698] sm:$0xff]  }
 0x61b   :  { %8719 = vmatprep.subr.bf16.mxu1 %v9546_v47 }
 0x61e   :  { %8720 = vmatpush3.bf16.msra.mxu1 %v9546_v47  ;;  %v9571_v47 = vld [vmem:[#allocation5 + $0x6a8] sm:$0xff]  }
 0x61f   :  { %8721 = vmatprep.subr.bf16.mxu1 %v9547_v31 }
 0x622   :  { %8722 = vmatpush3.bf16.msra.mxu1 %v9547_v31  ;;  %v9582_v31 = vld [vmem:[#allocation5 + $0x6c0] sm:$0xff]  }
 0x623   :  { %8723 = vmatprep.subr.bf16.mxu1 %v9548_v33 }
 0x626   :  { %8724 = vmatpush3.bf16.msra.mxu1 %v9548_v33  ;;  %v9584_v33 = vld [vmem:[#allocation5 + $0x6c8] sm:$0xff]  }
 0x627   :  { %8725 = vmatprep.subr.bf16.mxu1 %v9549_v60 }
 0x62a   :  { %8726 = vmatpush3.bf16.msra.mxu1 %v9549_v60  ;;  %v9588_v60 = vld [vmem:[#allocation5 + $0x6d8] sm:$0xff]  }
 0x62b   :  { %8731 = vmatprep.subr.bf16.mxu1 %v9550_v51 }
 0x62d   :  { %8728 = vmatmul.mubr.bf16.vlgmr.msra.gmra.mrb[8].mxu1 %v5238_v61  ;;  %v9605_v61 = vld [vmem:[#allocation5 + $0x7d8] sm:$0xff]  }
 0x62e   :  { %8732 = vmatpush3.bf16.msra.mxu1 %v9550_v51  ;;  %8747 = vmatprep.mubr.bf16.mxu1 %v5362_v0  ;;  %v9596_v51 = vld [vmem:[#allocation5 + $0x6f8] sm:$0xff]   ;;  %v9608_v0 = vld [vmem:[#allocation5 + $0x7a8] sm:$0xff]  }
 0x62f   :  { %8733 = vmatprep.subr.bf16.mxu1 %v9551_v11  ;;  %8878 = vmatpush3.bf16.msra.mxu0 %v9605_v61  ;;  %v9623_v61 = vld [vmem:[#allocation5 + $0x860] sm:$0xff]  }
 0x630   :  { %8879 = vmatprep.subr.bf16.mxu0 %v11097_v25 }
 0x632   :  { %8734 = vmatpush3.bf16.msra.mxu1 %v9551_v11  ;;  %v9606_v11 = vld [vmem:[#allocation5 + $0x7a0] sm:$0xff]  }
 0x633   :  { %8735 = vmatprep.subr.bf16.mxu1 %v9552_v2  ;;  %8880 = vmatpush3.bf16.msra.mxu0 %v9607_v62 }
 0x634   :  { %8881 = vmatprep.subr.bf16.mxu0 %v11097_v25 }
 0x636   :  { %8736 = vmatpush3.bf16.msra.mxu1 %v9552_v2  ;;  %v9610_v2 = vld [vmem:[#allocation5 + $0x7b0] sm:$0xff]  }
 0x637   :  { %8737 = vmatprep.subr.bf16.mxu1 %v9553_v5  ;;  %8882 = vmatpush3.bf16.msra.mxu0 %v9609_v19 }
 0x638   :  { %8883 = vmatprep.subr.bf16.mxu0 %v11097_v25 }
 0x63a   :  { %8738 = vmatpush3.bf16.msra.mxu1 %v9553_v5  ;;  %v9612_v5 = vld [vmem:[#allocation5 + $0x7b8] sm:$0xff]  }
 0x63b   :  { %8739 = vmatprep.subr.bf16.mxu1 %v9554_v42  ;;  %8884 = vmatpush3.bf16.msra.mxu0 %v9611_v3  ;;  %v9625_v3 = vld [vmem:[#allocation5 + $0x868] sm:$0xff]  }
 0x63c   :  { %8885 = vmatprep.subr.bf16.mxu0 %v11097_v25 }
 0x63e   :  { %8740 = vmatpush3.bf16.msra.mxu1 %v9554_v42 }
 0x63f   :  { %8741 = vmatprep.subr.bf16.mxu1 %v9555_v12  ;;  %8886 = vmatpush3.bf16.msra.mxu0 %v9613_v45  ;;  %v9627_v45 = vld [vmem:[#allocation5 + $0x870] sm:$0xff]  }
 0x640   :  { %8911 = vmatprep.subr.bf16.mxu0 %v11097_v25 }
 0x642   :  { %8742 = vmatpush3.bf16.msra.mxu1 %v9555_v12 }
 0x643   :  { %8743 = vmatprep.subr.bf16.mxu1 %v9556_v14 }
 0x646   :  { %8744 = vmatpush3.bf16.msra.mxu1 %v9556_v14 }
 0x647   :  { %8745 = vmatprep.subr.bf16.mxu1 %v9557_v37 }
 0x64a   :  { %8746 = vmatpush3.bf16.msra.mxu1 %v9557_v37 }
 0x64b   :  { %8751 = vmatprep.subr.bf16.mxu1 %v9558_v17 }
 0x64d   :  { %8748 = vmatmul.mubr.bf16.vlgmr.msra.gmra.mrb[8].mxu1 %v5363_v46 }
 0x64e   :  { %8752 = vmatpush3.bf16.msra.mxu1 %v9558_v17  ;;  %8767 = vmatprep.mubr.bf16.mxu1 %v5486_v20  ;;  %v7373_v20 = vld [vmem:[#allocation10 + $0x2] ss:$0 sm:$0xff] }
 0x64f   :  { %8753 = vmatprep.subr.bf16.mxu1 %v9559_v53 }
 0x652   :  { %8754 = vmatpush3.bf16.msra.mxu1 %v9559_v53 }
 0x653   :  { %8755 = vmatprep.subr.bf16.mxu1 %v9560_v63 }
 0x656   :  { %8756 = vmatpush3.bf16.msra.mxu1 %v9560_v63 }
 0x657   :  { %8757 = vmatprep.subr.bf16.mxu1 %v9561_v26 }
 0x65a   :  { %8758 = vmatpush3.bf16.msra.mxu1 %v9561_v26 }
 0x65b   :  { %8759 = vmatprep.subr.bf16.mxu1 %v9562_v23 }
 0x65e   :  { %8760 = vmatpush3.bf16.msra.mxu1 %v9562_v23 }
 0x65f   :  { %8761 = vmatprep.subr.bf16.mxu1 %v9563_v54 }
 0x662   :  { %8762 = vmatpush3.bf16.msra.mxu1 %v9563_v54 }
 0x663   :  { %8763 = vmatprep.subr.bf16.mxu1 %v9564_v24 }
 0x666   :  { %8764 = vmatpush3.bf16.msra.mxu1 %v9564_v24 }
 0x667   :  { %8765 = vmatprep.subr.bf16.mxu1 %v9565_v27 }
 0x66a   :  { %8766 = vmatpush3.bf16.msra.mxu1 %v9565_v27 }
 0x66b   :  { %8771 = vmatprep.subr.bf16.mxu1 %v9566_v9 }
 0x66d   :  { %8768 = vmatmul.mubr.bf16.vlgmr.msra.gmra.mrb[8].mxu1 %v5487_v8 }
 0x66e   :  { %8772 = vmatpush3.bf16.msra.mxu1 %v9566_v9  ;;  %8787 = vmatprep.mubr.bf16.mxu1 %v5610_v38 }
 0x66f   :  { %8773 = vmatprep.subr.bf16.mxu1 %v9567_v28 }
 0x672   :  { %8774 = vmatpush3.bf16.msra.mxu1 %v9567_v28 }
 0x673   :  { %8775 = vmatprep.subr.bf16.mxu1 %v9568_v6 }
 0x676   :  { %8776 = vmatpush3.bf16.msra.mxu1 %v9568_v6 }
 0x677   :  { %8777 = vmatprep.subr.bf16.mxu1 %v9569_v29 }
 0x67a   :  { %8778 = vmatpush3.bf16.msra.mxu1 %v9569_v29 }
 0x67b   :  { %8779 = vmatprep.subr.bf16.mxu1 %v9570_v30 }
 0x67e   :  { %8780 = vmatpush3.bf16.msra.mxu1 %v9570_v30 }
 0x67f   :  { %8781 = vmatprep.subr.bf16.mxu1 %v9571_v47 }
 0x682   :  { %8782 = vmatpush3.bf16.msra.mxu1 %v9571_v47 }
 0x683   :  { %8783 = vmatprep.subr.bf16.mxu1 %v9572_v49 }
 0x686   :  { %8784 = vmatpush3.bf16.msra.mxu1 %v9572_v49  ;;  %v9614_v49 = vld [vmem:[#allocation5 + $0x800] sm:$0xff]  }
 0x687   :  { %8785 = vmatprep.subr.bf16.mxu1 %v9573_v43 }
 0x68a   :  { %8786 = vmatpush3.bf16.msra.mxu1 %v9573_v43 }
 0x68b   :  { %8811 = vmatprep.subr.bf16.mxu1 %v11097_v25 }
 0x68d   :  { %8788 = vmatmul.mubr.bf16.vlgmr.msra.gmra.mrb[8].mxu1 %v5611_v32 }
 0x68e   :  { %8812 = vmatpush3.bf16.msra.mxu1 %v9582_v31  ;;  %8827 = vmatprep.mubr.msk.bf16.mxu1 %vm9840_vm0, %v11097_v25  ;;  %v9615_v31 = vld [vmem:[#allocation5 + $0x840] sm:$0xff]  }
 0x68f   :  { %8813 = vmatprep.subr.bf16.mxu1 %v11097_v25 }
 0x692   :  { %8814 = vmatpush3.bf16.msra.mxu1 %v9584_v33 }
 0x693   :  { %8815 = vmatprep.subr.bf16.mxu1 %v11097_v25 }
 0x696   :  { %8816 = vmatpush3.bf16.msra.mxu1 %v9586_v34  ;;  %v9616_v34 = vld [vmem:[#allocation5 + $0x808] sm:$0xff]  }
 0x697   :  { %8817 = vmatprep.subr.bf16.mxu1 %v11097_v25 }
 0x69a   :  { %8818 = vmatpush3.bf16.msra.mxu1 %v9588_v60  ;;  %v9617_v60 = vld [vmem:[#allocation5 + $0x848] sm:$0xff]  }
 0x69b   :  { %8819 = vmatprep.subr.bf16.mxu1 %v11097_v25 }
 0x69e   :  { %8820 = vmatpush3.bf16.msra.mxu1 %v9590_v1  ;;  %v9618_v1 = vld [vmem:[#allocation5 + $0x810] sm:$0xff]  }
 0x69f   :  { %8821 = vmatprep.subr.bf16.mxu1 %v11097_v25 }
 0x6a2   :  { %8822 = vmatpush3.bf16.msra.mxu1 %v9592_v40  ;;  %v9619_v40 = vld [vmem:[#allocation5 + $0x850] sm:$0xff]  }
 0x6a3   :  { %8823 = vmatprep.subr.bf16.mxu1 %v11097_v25  ;;  %v11171_v42 = vpop.f32.mrb[32].mxu0 }
 0x6a4   :  { %v8809_v10 = vpop.f32.mrb[33].mxu0 }
 0x6a5   :  { %v11173_v12 = vpop.f32.mrb[34].mxu0  ;;  %v9629_v10 = vld [vmem:[#allocation5 + $0x878] sm:$0xff]  }
 0x6a6   :  { %8824 = vmatpush3.bf16.msra.mxu1 %v9594_v50  ;;  %v8810_v13 = vpop.f32.mrb[35].mxu0  ;;  %v9620_v50 = vld [vmem:[#allocation5 + $0x818] sm:$0xff]  }
 0x6a7   :  { %8825 = vmatprep.subr.bf16.mxu1 %v11097_v25 }
 0x6aa   :  { %8826 = vmatpush3.bf16.msra.mxu1 %v9596_v51  ;;  %v9621_v51 = vld [vmem:[#allocation5 + $0x858] sm:$0xff]  }
 0x6ab   :  { %8851 = vmatprep.subr.bf16.mxu1 %v11097_v25 }
 0x6ad   :  { %8828 = vmatmul.mubr.bf16.vlgmr.msra.gmra.mrb[12].mxu1 %v5785_v52 }
 0x6ae   :  { %8852 = vmatpush3.bf16.msra.mxu1 %v9598_v55  ;;  %8867 = vmatprep.mubr.msk.bf16.mxu1 %vm9840_vm0, %v11097_v25 }
 0x6af   :  { %8853 = vmatprep.subr.bf16.mxu1 %v11097_v25 }
 0x6b2   :  { %8854 = vmatpush3.bf16.msra.mxu1 %v9600_v56 }
 0x6b3   :  { %8855 = vmatprep.subr.bf16.mxu1 %v11097_v25 }
 0x6b6   :  { %8856 = vmatpush3.bf16.msra.mxu1 %v9602_v58 }
 0x6b7   :  { %8857 = vmatprep.subr.bf16.mxu1 %v11097_v25 }
 0x6ba   :  { %8858 = vmatpush3.bf16.msra.mxu1 %v9604_v59  ;;  %v9622_v59 = vld [vmem:[#allocation5 + $0x820] sm:$0xff]  }
 0x6bb   :  { %8859 = vmatprep.subr.bf16.mxu1 %v11097_v25 }
 0x6be   :  { %8860 = vmatpush3.bf16.msra.mxu1 %v9606_v11 }
 0x6bf   :  { %8861 = vmatprep.subr.bf16.mxu1 %v11097_v25 }
 0x6c2   :  { %8862 = vmatpush3.bf16.msra.mxu1 %v9608_v0 }
 0x6c3   :  { %8863 = vmatprep.subr.bf16.mxu1 %v11097_v25 }
 0x6c6   :  { %8864 = vmatpush3.bf16.msra.mxu1 %v9610_v2  ;;  %v9624_v2 = vld [vmem:[#allocation5 + $0x828] sm:$0xff]  }
 0x6c7   :  { %8865 = vmatprep.subr.bf16.mxu1 %v11097_v25 }
 0x6ca   :  { %8866 = vmatpush3.bf16.msra.mxu1 %v9612_v5  ;;  %v9626_v5 = vld [vmem:[#allocation5 + $0x830] sm:$0xff]  }
 0x6cb   :  { %8891 = vmatprep.subr.bf16.mxu1 %v11097_v25 }
 0x6cf   :  { %v11175_v14 = vpop.f32.mrb[36].mxu0 }
 0x6d0   :  { %v8849_v36 = vpop.f32.mrb[37].mxu0 }
 0x6d1   :  { %v11177_v37 = vpop.f32.mrb[38].mxu0 }
 0x6d2   :  { %v8850_v41 = vpop.f32.mrb[39].mxu0 }
 0x6d3   :  { %v9631_v41 = vld [vmem:[#allocation5 + $0x8c0] sm:$0xff]  }
 0x760   :  { %v8789_v17 = vpop.f32.mrb[8].mxu1 }
 0x761   :  { %v5740_v18 = vadd.f32 %v8789_v17, %v7372_v15  ;;  %v5711_v48 = vpop.f32.mrb[9].mxu1 }
 0x762   :  { %v5738_v21 = vadd.f32 %v7372_v15, %v5711_v48  ;;  %v8790_v35 = vpop.f32.mrb[10].mxu1  ;;  %v9633_v48 = vld [vmem:[#allocation5 + $0x8c8] sm:$0xff]  }
 0x763   :  { %v5744_v46 = vmul.f32 0.01, %v5740_v18  ;;  %v5741_v53 = vadd.f32 %v8790_v35, %v7372_v15  ;;  %v5714_v16 = vpop.f32.mrb[11].mxu1  ;;  %v9635_v35 = vld [vmem:[#allocation5 + $0x8d0] sm:$0xff]  }
 0x764   :  { %v5742_v4 = vmul.f32 0.01, %v5738_v21  ;;  %v5739_v63 = vadd.f32 %v7372_v15, %v5714_v16  ;;  %v9637_v16 = vld [vmem:[#allocation5 + $0x8d8] sm:$0xff]  }
 0x765   :  { %v5748_v22 = vmax.f32 %v5740_v18, %v5744_v46  ;;  %v5745_v26 = vmul.f32 0.01, %v5741_v53  ;;  %v9632_v18 = vld [vmem:[#allocation5 + $0x888] sm:$0xff]   ;;  %v11213_v46 = vld [vmem:[#allocation2 + $0x90] sm:$0xff] }
 0x766   :  { %v5746_v23 = vmax.f32 %v5738_v21, %v5742_v4  ;;  %v5743_v54 = vmul.f32 0.01, %v5739_v63  ;;  %v9634_v21 = vld [vmem:[#allocation5 + $0x890] sm:$0xff]   ;;  %v9640_v4 = vld [vmem:[#allocation5 + $0x8a8] sm:$0xff]  }
 0x767   :  { %v5760_v24 = vmul.f32 %v7373_v20, %v5748_v22  ;;  %v5749_v27 = vmax.f32 %v5741_v53, %v5745_v26  ;;  %v9636_v53 = vld [vmem:[#allocation5 + $0x898] sm:$0xff]   ;;  %v9642_v22 = vld [vmem:[#allocation5 + $0x8b0] sm:$0xff]  }
 0x768   :  { %v5758_v9 = vmul.f32 %v7373_v20, %v5746_v23  ;;  %v5747_v44 = vmax.f32 %v5739_v63, %v5743_v54  ;;  %v9641_v63 = vld [vmem:[#allocation5 + $0x8e8] sm:$0xff]   ;;  %v9643_v26 = vld [vmem:[#allocation5 + $0x8f0] sm:$0xff]   ;;  %v9645_v23 = vld [vmem:[#allocation5 + $0x8f8] sm:$0xff]  }
 0x769   :  { %v5772_v7 = vadd.f32 %v7374_v39, %v5760_v24  ;;  %v5761_v8 = vmul.f32 %v7373_v20, %v5749_v27 }
 0x76a   :  { %v5770_v28 = vadd.f32 %v7374_v39, %v5758_v9  ;;  %v5759_v38 = vmul.f32 %v7373_v20, %v5747_v44  ;;  %v9639_v20 = vld [vmem:[#allocation5 + $0x8e0] sm:$0xff]  }
 0x76b   :  { %5777 = vst [vmem:[#allocation4 + $0x51] sm:$0x1] %v5772_v7  ;;  %5781 = vst [vmem:[#allocation4 + $0x50] sm:$0x4] %v5772_v7  ;;  %v5773_v6 = vadd.f32 %v7374_v39, %v5761_v8  ;;  %v9646_v8 = vld [vmem:[#allocation13] sm:$0xff]  }
 0x76c   :  { %5775 = vst [vmem:[#allocation4 + $0x11] sm:$0x1] %v5770_v28  ;;  %5779 = vst [vmem:[#allocation4 + $0x10] sm:$0x4] %v5770_v28  ;;  %v5771_v29 = vadd.f32 %v7374_v39, %v5759_v38  ;;  %v9644_v39 = vld [vmem:[#allocation5 + $0x8b8] sm:$0xff]  }
 0x76d   :  { %5778 = vst [vmem:[#allocation4 + $0x61] sm:$0x1] %v5773_v6  ;;  %5782 = vst [vmem:[#allocation4 + $0x60] sm:$0x4] %v5773_v6  ;;  %v9647_v28 = vld [vmem:[#allocation13 + $0x8] sm:$0xff]   ;;  %v9648_v38 = vld [vmem:[#allocation13 + $0x10] sm:$0xff]  }
 0x76e   :  { %5776 = vst [vmem:[#allocation4 + $0x21] sm:$0x1] %v5771_v29  ;;  %5780 = vst [vmem:[#allocation4 + $0x20] sm:$0x4] %v5771_v29  ;;  %v9649_v6 = vld [vmem:[#allocation13 + $0x18] sm:$0xff]   ;;  %v9650_v29 = vld [vmem:[#allocation13 + $0x20] sm:$0xff]  }
 0x772   :  { %v6113_v30 = vld [vmem:[#allocation4 + $0x50] sm:$0xff] }
 0x773   :  { %v6224_v47 = vld [vmem:[#allocation4 + $0x51] sm:$0xff] }
 0x774   :  { %v6112_v43 = vld [vmem:[#allocation4 + $0x10] sm:$0xff]  ;;  %v6447_v36 = vld [vmem:[#allocation4 + $0x60] sm:$0xff] }
 0x775   :  { %v6223_v57 = vld [vmem:[#allocation4 + $0x11] sm:$0xff]  ;;  %v6114_v32 = vpack.c.bf16 %v6113_v30, %v6112_v43  ;;  %v6558_v54 = vld [vmem:[#allocation4 + $0x61] sm:$0xff] }
 0x776   :  { %v6225_v33 = vpack.c.bf16 %v6224_v47, %v6223_v57  ;;  %v6334_v13 = vld [vmem:[#allocation4 + $0x12] sm:$0xff]  ;;  %v6557_v24 = vld [vmem:[#allocation4 + $0x21] sm:$0xff] }
 0x777   :  { %8868 = vmatmul.mubr.bf16.vlgmr.msra.gmra.mrb[16].mxu1 %v6114_v32  ;;  %v6668_v27 = vld [vmem:[#allocation4 + $0x22] sm:$0xff]  ;;  %v6559_v44 = vpack.c.bf16 %v6558_v54, %v6557_v24  ;;  %v9651_v30 = vld [vmem:[#allocation13 + $0x28] sm:$0xff]   ;;  %v7450_v54 = vld [vmem:[#allocation14] ss:$0 sm:$0xff] }
 0x778   :  { %8888 = vmatmul.mubr.bf16.vlgmr.msra.gmra.mrb[40].mxu0 %v6225_v33  ;;  %8892 = vmatpush3.bf16.msra.mxu1 %v9614_v49  ;;  %v6669_v9 = vld [vmem:[#allocation4 + $0x62] sm:$0xff] }
 0x779   :  { %8912 = vmatpush3.bf16.msra.mxu0 %v9615_v31  ;;  %8893 = vmatprep.subr.bf16.mxu1 %v11097_v25  ;;  %v6670_v7 = vpack.c.bf16 %v6669_v9, %v6668_v27  ;;  %v9652_v47 = vld [vmem:[#allocation13 + $0x30] sm:$0xff]   ;;  %v9653_v49 = vld [vmem:[#allocation13 + $0x38] sm:$0xff]  }
 0x77a   :  { %8913 = vmatprep.subr.bf16.mxu0 %v11097_v25  ;;  %8907 = vmatprep.mubr.msk.bf16.mxu1 %vm9840_vm0, %v11097_v25 }
 0x77b   :  { %8927 = vmatprep.mubr.msk.bf16.mxu0 %vm9840_vm0, %v11097_v25 }
 0x77c   :  { %8894 = vmatpush3.bf16.msra.mxu1 %v9616_v34 }
 0x77d   :  { %8914 = vmatpush3.bf16.msra.mxu0 %v9617_v60  ;;  %8895 = vmatprep.subr.bf16.mxu1 %v11097_v25 }
 0x77e   :  { %8915 = vmatprep.subr.bf16.mxu0 %v11097_v25 }
 0x780   :  { %8896 = vmatpush3.bf16.msra.mxu1 %v9618_v1  ;;  %v5994_v52 = vpop.f32.mrb[12].mxu1 }
 0x781   :  { %8916 = vmatpush3.bf16.msra.mxu0 %v9619_v40  ;;  %8897 = vmatprep.subr.bf16.mxu1 %v11097_v25  ;;  %v5995_v55 = vadd.f32 %v5994_v52, %v11171_v42  ;;  %v8829_v56 = vpop.f32.mrb[13].mxu1  ;;  %v9628_v42 = vld [vmem:[#allocation5 + $0x838] sm:$0xff]  }
 0x782   :  { %8917 = vmatprep.subr.bf16.mxu0 %v11097_v25  ;;  %v5997_v58 = vpop.f32.mrb[14].mxu1 }
 0x783   :  { %v5998_v11 = vadd.f32 %v5997_v58, %v11173_v12  ;;  %v11192_v62 = vadd.f32 %v11175_v14, %v5995_v55  ;;  %v8830_v0 = vpop.f32.mrb[15].mxu1  ;;  %v6335_v12 = vld [vmem:[#allocation4 + $0x52] sm:$0xff]  ;;  %v6446_v14 = vld [vmem:[#allocation4 + $0x20] sm:$0xff] }
 0x784   :  { %8898 = vmatpush3.bf16.msra.mxu1 %v9620_v50  ;;  %v6336_v15 = vpack.c.bf16 %v6335_v12, %v6334_v13  ;;  %v6448_v17 = vpack.c.bf16 %v6447_v36, %v6446_v14  ;;  %v7447_v14 = vld [vmem:[#allocation8 + $0x3] ss:$0 sm:$0xff] }
 0x785   :  { %8918 = vmatpush3.bf16.msra.mxu0 %v9621_v51  ;;  %8899 = vmatprep.subr.bf16.mxu1 %v11097_v25  ;;  %v11197_v19 = vadd.f32 %v11177_v37, %v5998_v11  ;;  %v9630_v37 = vld [vmem:[#allocation5 + $0x880] sm:$0xff]  }
 0x786   :  { %8919 = vmatprep.subr.bf16.mxu0 %v11097_v25 }
 0x788   :  { %8900 = vmatpush3.bf16.msra.mxu1 %v9622_v59 }
 0x789   :  { %8920 = vmatpush3.bf16.msra.mxu0 %v9623_v61  ;;  %8901 = vmatprep.subr.bf16.mxu1 %v11097_v25 }
 0x78a   :  { %8921 = vmatprep.subr.bf16.mxu0 %v11097_v25 }
 0x78c   :  { %8902 = vmatpush3.bf16.msra.mxu1 %v9624_v2 }
 0x78d   :  { %8922 = vmatpush3.bf16.msra.mxu0 %v9625_v3  ;;  %8903 = vmatprep.subr.bf16.mxu1 %v11097_v25 }
 0x78e   :  { %8923 = vmatprep.subr.bf16.mxu0 %v11097_v25 }
 0x790   :  { %8904 = vmatpush3.bf16.msra.mxu1 %v9626_v5 }
 0x791   :  { %8924 = vmatpush3.bf16.msra.mxu0 %v9627_v45  ;;  %8905 = vmatprep.subr.bf16.mxu1 %v11097_v25 }
 0x792   :  { %8925 = vmatprep.subr.bf16.mxu0 %v11097_v25 }
 0x794   :  { %8906 = vmatpush3.bf16.msra.mxu1 %v9628_v42 }
 0x795   :  { %8926 = vmatpush3.bf16.msra.mxu0 %v9629_v10  ;;  %8931 = vmatprep.subr.bf16.mxu1 %v11097_v25 }
 0x796   :  { %8951 = vmatprep.subr.bf16.mxu0 %v11097_v25 }
 0x797   :  { %8908 = vmatmul.mubr.bf16.vlgmr.msra.gmra.mrb[20].mxu1 %v6336_v15 }
 0x798   :  { %8928 = vmatmul.mubr.bf16.vlgmr.msra.gmra.mrb[44].mxu0 %v6448_v17  ;;  %8932 = vmatpush3.bf16.msra.mxu1 %v9630_v37 }
 0x799   :  { %8952 = vmatpush3.bf16.msra.mxu0 %v9631_v41  ;;  %8933 = vmatprep.subr.bf16.mxu1 %v11097_v25 }
 0x79a   :  { %8953 = vmatprep.subr.bf16.mxu0 %v11097_v25  ;;  %8947 = vmatprep.mubr.msk.bf16.mxu1 %vm9840_vm0, %v11097_v25 }
 0x79b   :  { %8967 = vmatprep.mubr.msk.bf16.mxu0 %vm9840_vm0, %v11097_v25  ;;  %v9638_v25 = vld [vmem:[#allocation5 + $0x8a0] sm:$0xff]  }
 0x79c   :  { %8934 = vmatpush3.bf16.msra.mxu1 %v9632_v18 }
 0x79d   :  { %8954 = vmatpush3.bf16.msra.mxu0 %v9633_v48  ;;  %8935 = vmatprep.subr.bf16.mxu1 %v11213_v46 }
 0x79e   :  { %8955 = vmatprep.subr.bf16.mxu0 %v11213_v46 }
 0x7a0   :  { %8936 = vmatpush3.bf16.msra.mxu1 %v9634_v21 }
 0x7a1   :  { %8956 = vmatpush3.bf16.msra.mxu0 %v9635_v35  ;;  %8937 = vmatprep.subr.bf16.mxu1 %v11213_v46 }
 0x7a2   :  { %8957 = vmatprep.subr.bf16.mxu0 %v11213_v46 }
 0x7a4   :  { %8938 = vmatpush3.bf16.msra.mxu1 %v9636_v53  ;;  %v7448_v53 = vld [vmem:[#allocation10 + $0x3] ss:$0 sm:$0xff] }
 0x7a5   :  { %8958 = vmatpush3.bf16.msra.mxu0 %v9637_v16  ;;  %8939 = vmatprep.subr.bf16.mxu1 %v11213_v46 }
 0x7a6   :  { %8959 = vmatprep.subr.bf16.mxu0 %v11213_v46 }
 0x7a8   :  { %8940 = vmatpush3.bf16.msra.mxu1 %v9638_v25 }
 0x7a9   :  { %8960 = vmatpush3.bf16.msra.mxu0 %v9639_v20  ;;  %8941 = vmatprep.subr.bf16.mxu1 %v11213_v46 }
 0x7aa   :  { %8961 = vmatprep.subr.bf16.mxu0 %v11213_v46 }
 0x7ac   :  { %8942 = vmatpush3.bf16.msra.mxu1 %v9640_v4 }
 0x7ad   :  { %8962 = vmatpush3.bf16.msra.mxu0 %v9641_v63  ;;  %8943 = vmatprep.subr.bf16.mxu1 %v11213_v46  ;;  %v7449_v63 = vld [vmem:[#allocation11 + $0x3] ss:$0 sm:$0xff] }
 0x7ae   :  { %8963 = vmatprep.subr.bf16.mxu0 %v11213_v46 }
 0x7b0   :  { %8944 = vmatpush3.bf16.msra.mxu1 %v9642_v22 }
 0x7b1   :  { %8964 = vmatpush3.bf16.msra.mxu0 %v9643_v26  ;;  %8945 = vmatprep.subr.bf16.mxu1 %v11213_v46 }
 0x7b2   :  { %8965 = vmatprep.subr.bf16.mxu0 %v11213_v46 }
 0x7b4   :  { %8946 = vmatpush3.bf16.msra.mxu1 %v9644_v39 }
 0x7b5   :  { %8966 = vmatpush3.bf16.msra.mxu0 %v9645_v23  ;;  %8971 = vmatprep.subr.bf16.mxu1 %v11213_v46 }
 0x7b7   :  { %8948 = vmatmul.mubr.bf16.vlgmr.msra.gmra.mrb[24].mxu1 %v6559_v44 }
 0x7b8   :  { %8968 = vmatmul.mubr.bf16.vlgmr.msra.gmra.mrb[48].mxu0 %v6670_v7  ;;  %8987 = vmatprep.mubr.msk.bf16.mxu1 %vm9840_vm0, %v11213_v46 }
 0x7b9   :  { %8972 = vmatpush3.bf16.msra.mxu1 %v9646_v8 }
 0x7ba   :  { %8973 = vmatprep.subr.bf16.mxu1 %v11213_v46 }
 0x7bd   :  { %8974 = vmatpush3.bf16.msra.mxu1 %v9647_v28 }
 0x7be   :  { %8975 = vmatprep.subr.bf16.mxu1 %v11213_v46 }
 0x7c1   :  { %8976 = vmatpush3.bf16.msra.mxu1 %v9648_v38 }
 0x7c2   :  { %8977 = vmatprep.subr.bf16.mxu1 %v11213_v46 }
 0x7c5   :  { %8978 = vmatpush3.bf16.msra.mxu1 %v9649_v6 }
 0x7c6   :  { %8979 = vmatprep.subr.bf16.mxu1 %v11213_v46 }
 0x7c9   :  { %8980 = vmatpush3.bf16.msra.mxu1 %v9650_v29 }
 0x7ca   :  { %8981 = vmatprep.subr.bf16.mxu1 %v11213_v46 }
 0x7cd   :  { %8982 = vmatpush3.bf16.msra.mxu1 %v9651_v30 }
 0x7ce   :  { %8983 = vmatprep.subr.bf16.mxu1 %v11213_v46 }
 0x7d1   :  { %8984 = vmatpush3.bf16.msra.mxu1 %v9652_v47 }
 0x7d2   :  { %8985 = vmatprep.subr.bf16.mxu1 %v11213_v46 }
 0x7d5   :  { %8986 = vmatpush3.bf16.msra.mxu1 %v9653_v49 }
 0x84a   :  { %v6214_v43 = vpop.f32.mrb[16].mxu1 }
 0x84b   :  { %v6325_v57 = vpop.f32.mrb[40].mxu0  ;;  %v6221_v31 = vadd.f32 %v6214_v43, %v11192_v62  ;;  %v8869_v32 = vpop.f32.mrb[17].mxu1 }
 0x84c   :  { %v8889_v33 = vpop.f32.mrb[41].mxu0  ;;  %v6217_v34 = vpop.f32.mrb[18].mxu1 }
 0x84d   :  { %v6328_v60 = vpop.f32.mrb[42].mxu0  ;;  %v6332_v1 = vadd.f32 %v6325_v57, %v6221_v31  ;;  %v6222_v40 = vadd.f32 %v6217_v34, %v11197_v19  ;;  %v8870_v50 = vpop.f32.mrb[19].mxu1 }
 0x84e   :  { %v8890_v51 = vpop.f32.mrb[43].mxu0 }
 0x84f   :  { %v6333_v52 = vadd.f32 %v6328_v60, %v6222_v40 }
 0x86a   :  { %v6436_v55 = vpop.f32.mrb[20].mxu1 }
 0x86b   :  { %v6548_v56 = vpop.f32.mrb[44].mxu0  ;;  %v6443_v58 = vadd.f32 %v6436_v55, %v6332_v1  ;;  %v8909_v59 = vpop.f32.mrb[21].mxu1 }
 0x86c   :  { %v8929_v61 = vpop.f32.mrb[45].mxu0  ;;  %v6439_v11 = vpop.f32.mrb[22].mxu1 }
 0x86d   :  { %v6551_v0 = vpop.f32.mrb[46].mxu0  ;;  %v6555_v2 = vadd.f32 %v6548_v56, %v6443_v58  ;;  %v6444_v3 = vadd.f32 %v6439_v11, %v6333_v52  ;;  %v8910_v62 = vpop.f32.mrb[23].mxu1 }
 0x86e   :  { %v8930_v5 = vpop.f32.mrb[47].mxu0 }
 0x86f   :  { %v6556_v45 = vadd.f32 %v6551_v0, %v6444_v3 }
 0x88a   :  { %v6659_v42 = vpop.f32.mrb[24].mxu1 }
 0x88b   :  { %v6770_v10 = vpop.f32.mrb[48].mxu0  ;;  %v6666_v12 = vadd.f32 %v6659_v42, %v6555_v2  ;;  %v8949_v13 = vpop.f32.mrb[25].mxu1 }
 0x88c   :  { %v8969_v19 = vpop.f32.mrb[49].mxu0  ;;  %v6662_v36 = vpop.f32.mrb[26].mxu1 }
 0x88d   :  { %v6773_v37 = vpop.f32.mrb[50].mxu0  ;;  %v6777_v41 = vadd.f32 %v6770_v10, %v6666_v12  ;;  %v6667_v15 = vadd.f32 %v6662_v36, %v6556_v45  ;;  %v8950_v17 = vpop.f32.mrb[27].mxu1 }
 0x88e   :  { %v8970_v18 = vpop.f32.mrb[51].mxu0 }
 0x88f   :  { %v6787_v48 = vadd.f32 %v7447_v14, %v6777_v41  ;;  %v6778_v21 = vadd.f32 %v6773_v37, %v6667_v15 }
 0x891   :  { %v6789_v35 = vmul.f32 0.01, %v6787_v48  ;;  %v6788_v46 = vadd.f32 %v7447_v14, %v6778_v21 }
 0x893   :  { %v6791_v16 = vmax.f32 %v6787_v48, %v6789_v35  ;;  %v6790_v25 = vmul.f32 0.01, %v6788_v46 }
 0x895   :  { %v6801_v20 = vmul.f32 %v7448_v53, %v6791_v16  ;;  %v6792_v4 = vmax.f32 %v6788_v46, %v6790_v25 }
 0x897   :  { %v6802_v22 = vmul.f32 %v7448_v53, %v6792_v4  ;;  %v6811_v26 = vadd.f32 %v7449_v63, %v6801_v20 }
 0x899   :  { %v6812_v39 = vadd.f32 %v7449_v63, %v6802_v22 }
 0x89b   :  { %v6813_v23 = vpack.c.bf16 %v6812_v39, %v6811_v26 }
 0x89d   :  { %8988 = vmatmul.mubr.bf16.vlgmr.msra.gmra.mrb[28].mxu1 %v6813_v23 }
 0x970   :  { %v6919_v24 = vpop.f32.mrb[28].mxu1 }
 0x971   :  { %v6920_v27 = vadd.f32 %v7450_v54, %v6919_v24  ;;  %v8989_v9 = vpop.f32.mrb[29].mxu1 }
 0x972   :  { %v6922_v44 = vpop.f32.mrb[30].mxu1 }
 0x973   :  { %v6926_v7 = vsub.f32 0.0, %v6920_v27  ;;  %v6923_v8 = vadd.f32 %v7450_v54, %v6922_v44  ;;  %v8990_v28 = vpop.f32.mrb[31].mxu1 }
 0x975   :  { %v6928_v38 = vmul.f32 1.442695, %v6926_v7  ;;  %v6927_v6 = vsub.f32 0.0, %v6923_v8 }
 0x977   :  { %9654 = vpow2.f32 %v6928_v38  ;;  %v6930_v29 = vmul.f32 1.442695, %v6927_v6 }
 0x979   :  { %9656 = vpow2.f32 %v6930_v29 }
 0x981   :  { %v9655_v30 = vpop.eup %9654 }
 0x982   :  { %v6932_v47 = vadd.f32 1.0, %v9655_v30 }
 0x983   :  { %v9657_v49 = vpop.eup %9656 }
 0x984   :  { %9658 = vrcp.f32 %v6932_v47  ;;  %v6933_v43 = vadd.f32 1.0, %v9657_v49 }
 0x986   :  { %9660 = vrcp.f32 %v6933_v43 }
 0x98e   :  { %v9659_v57 = vpop.eup %9658 }
 0x98f   :  { %6936 = vst [vmem:[#allocation16] sm:$0xff] %v9659_v57 }
 0x990   :  { %v9661_v31 = vpop.eup %9660 }
 0x991   :  { %6937 = vst [vmem:[#allocation16 + $0x8] sm:$0xff] %v9661_v31 }
 0x992   :  { %9808 = shalt.err (!%p9805_p10)
}
 0x993   :  { %s9809_s29 = scalar_lea.hbm %s11258_s7, 256 }
 0x994   :  { %p9810_p11 = scmp.ne.s32.totalorder %s11258_s7, %s9809_s29  ;;  %p9813_p12 = scmp.lt.u32.totalorder %s9809_s29, %s11258_s7 }
 0x996   :  { %p9815_p13 = pnand %p9813_p12, %p9810_p11 }
 0x998   :  { %9818 = shalt.err (!%p9815_p13)
}
 0x999   :  { %s9842_s13 = smov 128   ;;  %s9843_s14 = smov 8  }
 0x99a   :  { %6949 = dma.vmem_to_hbm [thread:$0]  %s6944_s22, 256, %s11258_s7, [#allocation7], %s9842_s13, %s9842_s13, %s9843_s14  }
 0x99b   :  { %9827 = dma.done.wait [#allocation7], 256  }
 0x99c   :  { %9828 = vsyncadd [#allocation7], 4294967040 }
 0x99d   :  { %6953 = vsyncpa [#allocation6], 1 }
 0x99e   :  { %6954 = vsyncpa [#allocation9], 1 }
 0x99f   :  { %6955 = vsyncpa [#allocation12], 1 }
 0x9a0   :  { %6956 = vsyncpa [#allocation15], 1 }
 0x9a1   :  { %6957 = vsyncpa [#allocation7], 1 }

</bundles_post_ra>
